<compile_context>
chip_gen: v5e
topology: v5e:2x2
jax: 0.10.0
libtpu: 0.0.40
codegen_flags: <defaults>
</compile_context>

<pallas_src>
import functools

import jax
import jax.numpy as jnp
from jax.experimental import pallas as pl
from jax.experimental.pallas import tpu as pltpu

_EPS = 1e-5


# ---------------------------------------------------------------------------
# helpers used inside kernels
# ---------------------------------------------------------------------------
def _mxu(a, b):
    """bf16 x bf16 -> f32 matmul on the MXU."""
    return jnp.dot(a.astype(jnp.bfloat16), b.astype(jnp.bfloat16),
                   preferred_element_type=jnp.float32)


def _bn_stats(ssum, ssq, count):
    """Global per-channel (mean, inv_std) from per-batch partial sums.

    ssum, ssq: (B, C, 1) partial sums over the point axis.  Returns (C, 1).
    """
    mean = jnp.sum(ssum, axis=0) / count
    var = jnp.sum(ssq, axis=0) / count - mean * mean
    return mean, jax.lax.rsqrt(var + _EPS)


def _partial_sums(h):
    """Per-batch (sum, sum of squares) over the point (lane) axis."""
    return (jnp.sum(h, axis=-1, keepdims=True),
            jnp.sum(h * h, axis=-1, keepdims=True))


# ---------------------------------------------------------------------------
# kernels -- each grid step processes one batch element in NCW layout
# ---------------------------------------------------------------------------
def proj_kernel(x_ref, w_ref, h_ref, ss_ref, sq_ref):
    """h = W @ x (1x1 conv, no bias) + per-batch BN partial sums."""
    h = _mxu(w_ref[...], x_ref[0])                      # (C_out, N)
    h_ref[0] = h
    ss_ref[0], sq_ref[0] = _partial_sums(h)


def bn_proj_kernel(h_ref, ss_ref, sq_ref, g_ref, b_ref, w_ref,
                   ho_ref, sso_ref, sqo_ref):
    """a = relu(BN(h)); h_out = W @ a; plus partial sums of h_out."""
    h = h_ref[0]
    count = ss_ref.shape[0] * h.shape[-1]               # B * N
    mean, inv = _bn_stats(ss_ref[...], sq_ref[...], count)
    a = jnp.maximum((h - mean) * inv * g_ref[...] + b_ref[...], 0.0)
    h2 = _mxu(w_ref[...], a)
    ho_ref[0] = h2
    sso_ref[0], sqo_ref[0] = _partial_sums(h2)


def bn_sa_kernel(h_ref, ss_ref, sq_ref, g_ref, b_ref, *rest, has_residual):
    """a = [residual +] relu(BN(h)); PCT self-attention on a;
       h_t = t_w @ (a - x_r) + t_b; plus partial sums of h_t."""
    if has_residual:
        (res_ref, qkw_ref, vw_ref, vb_ref, tw_ref, tb_ref,
         a_ref, ht_ref, sso_ref, sqo_ref) = rest
    else:
        (qkw_ref, vw_ref, vb_ref, tw_ref, tb_ref,
         a_ref, ht_ref, sso_ref, sqo_ref) = rest

    h = h_ref[0]
    count = ss_ref.shape[0] * h.shape[-1]               # B * N
    mean, inv = _bn_stats(ss_ref[...], sq_ref[...], count)
    a = jnp.maximum((h - mean) * inv * g_ref[...] + b_ref[...], 0.0)
    if has_residual:
        a = res_ref[0] + a
    a_ref[0] = a

    # q_conv and k_conv share their weight -> a single shared projection.
    qk = _mxu(qkw_ref[...], a)                          # (C/4, N)
    v = _mxu(vw_ref[...], a) + vb_ref[...]              # (C, N)

    # energy[i, j] = <qk[:, i], qk[:, j]>  ==  x_q @ x_k in the PyTorch code
    energy = _mxu(qk.T, qk)                             # (N, N), f32 accum

    # softmax over the key axis, then PCT re-normalisation over the query axis
    m = jnp.max(energy, axis=-1, keepdims=True)
    e = jnp.exp(energy - m)
    attn = e * pl.reciprocal(jnp.sum(e, axis=-1, keepdims=True), approx=True)
    col = jnp.sum(attn, axis=0, keepdims=True)          # (1, N)
    attn = attn * pl.reciprocal(1e-9 + col, approx=True)

    x_r = _mxu(v, attn)                                 # (C, N) == x_v @ attn
    ht = _mxu(tw_ref[...], a - x_r) + tb_ref[...]       # trans_conv(a - x_r)
    ht_ref[0] = ht
    sso_ref[0], sqo_ref[0] = _partial_sums(ht)


def bn_res_concat_kernel(h_ref, ss_ref, sq_ref, g_ref, b_ref, x1_ref, out_ref):
    """x2 = x1 + relu(BN(h)); out = concat([x1, x2]) along channels."""
    h = h_ref[0]
    count = ss_ref.shape[0] * h.shape[-1]
    mean, inv = _bn_stats(ss_ref[...], sq_ref[...], count)
    x1 = x1_ref[0]
    x2 = x1 + jnp.maximum((h - mean) * inv * g_ref[...] + b_ref[...], 0.0)
    out_ref[0] = jnp.concatenate([x1, x2], axis=0)      # one lane-dense store


# ---------------------------------------------------------------------------
# pallas_call builders (grid over batch, "parallel" semantics)
# ---------------------------------------------------------------------------
def _compiler_params():
    return pltpu.CompilerParams(
        dimension_semantics=("parallel",),           # shard batch over TCs
        vmem_limit_bytes=48 * 1024 * 1024)           # explicit, < v7x's 64 MiB


def _batch_spec(c, n):
    return pl.BlockSpec((1, c, n), lambda b: (b, 0, 0))


def _full_spec(shape):
    nd = len(shape)
    return pl.BlockSpec(shape, lambda b: (0,) * nd)


def _call_proj(x, w):
    B, C, N = x.shape
    Co = w.shape[0]
    return pl.pallas_call(
        proj_kernel,
        grid=(B,),
        in_specs=[_batch_spec(C, N), _full_spec(w.shape)],
        out_specs=(_batch_spec(Co, N), _batch_spec(Co, 1), _batch_spec(Co, 1)),
        out_shape=(jax.ShapeDtypeStruct((B, Co, N), jnp.float32),
                   jax.ShapeDtypeStruct((B, Co, 1), jnp.float32),
                   jax.ShapeDtypeStruct((B, Co, 1), jnp.float32)),
        compiler_params=_compiler_params(),
    )(x, w)


def _call_bn_proj(h, ssum, ssq, gamma, beta, w):
    B, C, N = h.shape
    Co = w.shape[0]
    return pl.pallas_call(
        bn_proj_kernel,
        grid=(B,),
        in_specs=[_batch_spec(C, N),
                  _full_spec(ssum.shape), _full_spec(ssq.shape),
                  _full_spec(gamma.shape), _full_spec(beta.shape),
                  _full_spec(w.shape)],
        out_specs=(_batch_spec(Co, N), _batch_spec(Co, 1), _batch_spec(Co, 1)),
        out_shape=(jax.ShapeDtypeStruct((B, Co, N), jnp.float32),
                   jax.ShapeDtypeStruct((B, Co, 1), jnp.float32),
                   jax.ShapeDtypeStruct((B, Co, 1), jnp.float32)),
        compiler_params=_compiler_params(),
    )(h, ssum, ssq, gamma, beta, w)


def _call_bn_sa(h, ssum, ssq, gamma, beta, residual, qkw, vw, vb, tw, tb):
    B, C, N = h.shape
    has_residual = residual is not None
    in_specs = [_batch_spec(C, N),
                _full_spec(ssum.shape), _full_spec(ssq.shape),
                _full_spec(gamma.shape), _full_spec(beta.shape)]
    args = [h, ssum, ssq, gamma, beta]
    if has_residual:
        in_specs.append(_batch_spec(C, N))
        args.append(residual)
    in_specs += [_full_spec(qkw.shape), _full_spec(vw.shape),
                 _full_spec(vb.shape), _full_spec(tw.shape),
                 _full_spec(tb.shape)]
    args += [qkw, vw, vb, tw, tb]
    return pl.pallas_call(
        functools.partial(bn_sa_kernel, has_residual=has_residual),
        grid=(B,),
        in_specs=in_specs,
        out_specs=(_batch_spec(C, N), _batch_spec(C, N),
                   _batch_spec(C, 1), _batch_spec(C, 1)),
        out_shape=(jax.ShapeDtypeStruct((B, C, N), jnp.float32),   # a (post-BN)
                   jax.ShapeDtypeStruct((B, C, N), jnp.float32),   # trans_conv out
                   jax.ShapeDtypeStruct((B, C, 1), jnp.float32),
                   jax.ShapeDtypeStruct((B, C, 1), jnp.float32)),
        compiler_params=_compiler_params(),
    )(*args)


def _call_bn_res_concat(h, ssum, ssq, gamma, beta, x1):
    B, C, N = h.shape
    return pl.pallas_call(
        bn_res_concat_kernel,
        grid=(B,),
        in_specs=[_batch_spec(C, N),
                  _full_spec(ssum.shape), _full_spec(ssq.shape),
                  _full_spec(gamma.shape), _full_spec(beta.shape),
                  _batch_spec(C, N)],
        out_specs=pl.BlockSpec((1, 2 * C, N), lambda b: (b, 0, 0)),
        out_shape=jax.ShapeDtypeStruct((B, 2 * C, N), jnp.float32),
        compiler_params=_compiler_params(),
    )(h, ssum, ssq, gamma, beta, x1)


# ---------------------------------------------------------------------------
# public forward: x is (B, C, N) exactly like the PyTorch module
# ---------------------------------------------------------------------------
@jax.jit
def stacked_attention(x, params):
    """x: (B, C, N) float32 (PyTorch Conv1d layout) -> (B, 2C, N)."""
    (c1w, bn1g, bn1b, c2w, bn2g, bn2b,
     sa1_qkw, sa1_vw, sa1_vb, sa1_tw, sa1_tb, sa1_g, sa1_b,
     sa2_qkw, sa2_vw, sa2_vb, sa2_tw, sa2_tb, sa2_g, sa2_b) = params
    x = x.astype(jnp.float32)

    # conv1; then (bn1 -> relu -> conv2) fused
    h1, s1, q1 = _call_proj(x, c1w)
    h2, s2, q2 = _call_bn_proj(h1, s1, q1, bn1g, bn1b, c2w)
    # (bn2 -> relu) fused with SA1 attention + trans_conv
    a2, t1, st1, qt1 = _call_bn_sa(h2, s2, q2, bn2g, bn2b, None,
                                   sa1_qkw, sa1_vw, sa1_vb, sa1_tw, sa1_tb)
    # SA1 after_norm/relu/residual -> x1, fused with SA2 attention + trans_conv
    x1, t2, st2, qt2 = _call_bn_sa(t1, st1, qt1, sa1_g, sa1_b, a2,
                                   sa2_qkw, sa2_vw, sa2_vb, sa2_tw, sa2_tb)
    # SA2 after_norm/relu/residual -> x2, fused with the channel concat
    return _call_bn_res_concat(t2, st2, qt2, sa2_g, sa2_b, x1)


# ---------------------------------------------------------------------------
# deterministic parameters + pure-JAX reference for self-checking
# ---------------------------------------------------------------------------
def make_params(key, channels):
    c4 = channels // 4
    ks = jax.random.split(key, 12)

    def w(k, shape, scale=0.1):
        return (scale * jax.random.normal(k, shape)).astype(jnp.float32)

    ones = jnp.ones((channels, 1), jnp.float32)
    zeros = jnp.zeros((channels, 1), jnp.float32)

    return (
        # conv1 / bn1, conv2 / bn2
        w(ks[0], (channels, channels)), ones, zeros,
        w(ks[1], (channels, channels)), ones, zeros,
        # SA1: shared qk weight, v_conv (w, b), trans_conv (w, b), after_norm
        w(ks[2], (c4, channels)),
        w(ks[3], (channels, channels)), w(ks[4], (channels, 1)),
        w(ks[5], (channels, channels)), w(ks[6], (channels, 1)),
        ones, zeros,
        # SA2
        w(ks[7], (c4, channels)),
        w(ks[8], (channels, channels)), w(ks[9], (channels, 1)),
        w(ks[10], (channels, channels)), w(ks[11], (channels, 1)),
        ones, zeros,
    )


def reference_forward(x, params):
    """Pure-JAX reference (same bf16 matmul inputs as the kernel)."""
    (c1w, bn1g, bn1b, c2w, bn2g, bn2b,
     sa1_qkw, sa1_vw, sa1_vb, sa1_tw, sa1_tb, sa1_g, sa1_b,
     sa2_qkw, sa2_vw, sa2_vb, sa2_tw, sa2_tb, sa2_g, sa2_b) = params

    def bn_relu(h, g, b):
        mean = jnp.mean(h, axis=(0, 2), keepdims=True)
        var = jnp.mean(jnp.square(h - mean), axis=(0, 2), keepdims=True)
        return jnp.maximum((h - mean) * jax.lax.rsqrt(var + _EPS) * g + b, 0.0)

    def proj(w, x):
        return jnp.einsum('dc,bcn->bdn', w.astype(jnp.bfloat16),
                          x.astype(jnp.bfloat16),
                          preferred_element_type=jnp.float32)

    def sa(x, qkw, vw, vb, tw, tb, g, b):
        qk = proj(qkw, x)
        v = proj(vw, x) + vb
        energy = jnp.einsum('bdi,bdj->bij', qk.astype(jnp.bfloat16),
                            qk.astype(jnp.bfloat16),
                            preferred_element_type=jnp.float32)
        e = jnp.exp(energy - jnp.max(energy, axis=-1, keepdims=True))
        attn = e / jnp.sum(e, axis=-1, keepdims=True)
        attn = attn / (1e-9 + jnp.sum(attn, axis=1, keepdims=True))
        x_r = jnp.einsum('bcm,bmn->bcn', v.astype(jnp.bfloat16),
                         attn.astype(jnp.bfloat16),
                         preferred_element_type=jnp.float32)
        h = proj(tw, x - x_r) + tb
        return x + bn_relu(h, g, b)

    h = bn_relu(proj(c1w, x), bn1g, bn1b)
    h = bn_relu(proj(c2w, h), bn2g, bn2b)
    x1 = sa(h, sa1_qkw, sa1_vw, sa1_vb, sa1_tw, sa1_tb, sa1_g, sa1_b)
    x2 = sa(x1, sa2_qkw, sa2_vw, sa2_vb, sa2_tw, sa2_tb, sa2_g, sa2_b)
    return jnp.concatenate([x1, x2], axis=1)


if __name__ == "__main__":
    key = jax.random.PRNGKey(0)
    k_x, k_p = jax.random.split(key)

    B, C, N = 2, 64, 128          # channels=64 default; N multiple of 128 (lane-dense)
    x = jax.random.normal(k_x, (B, C, N), dtype=jnp.float32)
    params = make_params(k_p, C)

    out = stacked_attention(x, params)
    out = jax.block_until_ready(out)
    assert out.shape == (B, 2 * C, N), out.shape

    ref = jax.block_until_ready(jax.jit(reference_forward)(x, params))
    err = float(jnp.max(jnp.abs(out - ref)))
    assert err < 5e-2, err

    print("KERNEL_OK")
</pallas_src>

<mosaic_0001>
module attributes {stable_mosaic.version = 11 : i64} {
  func.func @bn_proj_kernel(%arg0: i32, %arg1: memref<1x64x128xf32, #tpu.memory_space<vmem>>, %arg2: memref<2x64x1xf32, #tpu.memory_space<vmem>>, %arg3: memref<2x64x1xf32, #tpu.memory_space<vmem>>, %arg4: memref<64x1xf32, #tpu.memory_space<vmem>>, %arg5: memref<64x1xf32, #tpu.memory_space<vmem>>, %arg6: memref<64x64xf32, #tpu.memory_space<vmem>>, %arg7: memref<1x64x128xf32, #tpu.memory_space<vmem>>, %arg8: memref<1x64x1xf32, #tpu.memory_space<vmem>>, %arg9: memref<1x64x1xf32, #tpu.memory_space<vmem>>) attributes {dimension_semantics = [#tpu.dimension_semantics<parallel>], iteration_bounds = array<i64: 2>, scalar_prefetch = 0 : i64, scratch_operands = 0 : i64, tpu.core_type = #tpu.core_type<tc>, window_params = [{transform_indices = @transform_0, window_bounds = array<i64: 1, 64, 128>}, {pipeline_mode = #tpu.pipeline_mode<synchronous>, transform_indices = @transform_1, window_bounds = array<i64: 2, 64, 1>}, {pipeline_mode = #tpu.pipeline_mode<synchronous>, transform_indices = @transform_2, window_bounds = array<i64: 2, 64, 1>}, {pipeline_mode = #tpu.pipeline_mode<synchronous>, transform_indices = @transform_3, window_bounds = array<i64: 64, 1>}, {pipeline_mode = #tpu.pipeline_mode<synchronous>, transform_indices = @transform_4, window_bounds = array<i64: 64, 1>}, {pipeline_mode = #tpu.pipeline_mode<synchronous>, transform_indices = @transform_5, window_bounds = array<i64: 64, 64>}, {transform_indices = @transform_6, window_bounds = array<i64: 1, 64, 128>}, {transform_indices = @transform_7, window_bounds = array<i64: 1, 64, 1>}, {transform_indices = @transform_8, window_bounds = array<i64: 1, 64, 1>}]} {
    %c0 = arith.constant 0 : index
    %c0_0 = arith.constant 0 : index
    %c0_1 = arith.constant 0 : index
    %0 = vector.load %arg1[%c0, %c0_0, %c0_1] : memref<1x64x128xf32, #tpu.memory_space<vmem>>, vector<1x64x128xf32>
    %1 = vector.shape_cast %0 : vector<1x64x128xf32> to vector<64x128xf32>
    %c0_2 = arith.constant 0 : index
    %c0_3 = arith.constant 0 : index
    %c0_4 = arith.constant 0 : index
    %2 = vector.load %arg2[%c0_2, %c0_3, %c0_4] : memref<2x64x1xf32, #tpu.memory_space<vmem>>, vector<2x64x1xf32>
    %c0_5 = arith.constant 0 : index
    %c0_6 = arith.constant 0 : index
    %c0_7 = arith.constant 0 : index
    %3 = vector.load %arg3[%c0_5, %c0_6, %c0_7] : memref<2x64x1xf32, #tpu.memory_space<vmem>>, vector<2x64x1xf32>
    %cst = arith.constant dense<0.000000e+00> : vector<64x1xf32>
    %4 = vector.multi_reduction <add>, %2, %cst [0] : vector<2x64x1xf32> to vector<64x1xf32>
    %cst_8 = arith.constant 2.560000e+02 : f32
    %5 = vector.broadcast %cst_8 : f32 to vector<64x1xf32>
    %6 = arith.divf %4, %5 : vector<64x1xf32>
    %cst_9 = arith.constant dense<0.000000e+00> : vector<64x1xf32>
    %7 = vector.multi_reduction <add>, %3, %cst_9 [0] : vector<2x64x1xf32> to vector<64x1xf32>
    %cst_10 = arith.constant 2.560000e+02 : f32
    %8 = vector.broadcast %cst_10 : f32 to vector<64x1xf32>
    %9 = arith.divf %7, %8 : vector<64x1xf32>
    %10 = arith.mulf %6, %6 : vector<64x1xf32>
    %11 = arith.subf %9, %10 : vector<64x1xf32>
    %cst_11 = arith.constant 9.99999974E-6 : f32
    %12 = vector.broadcast %cst_11 : f32 to vector<64x1xf32>
    %13 = arith.addf %11, %12 : vector<64x1xf32>
    %14 = math.rsqrt %13 : vector<64x1xf32>
    %15 = vector.broadcast %6 : vector<64x1xf32> to vector<64x128xf32>
    %16 = arith.subf %1, %15 : vector<64x128xf32>
    %17 = vector.broadcast %14 : vector<64x1xf32> to vector<64x128xf32>
    %18 = arith.mulf %16, %17 : vector<64x128xf32>
    %c0_12 = arith.constant 0 : index
    %c0_13 = arith.constant 0 : index
    %19 = vector.load %arg4[%c0_12, %c0_13] : memref<64x1xf32, #tpu.memory_space<vmem>>, vector<64x1xf32>
    %20 = vector.broadcast %19 : vector<64x1xf32> to vector<64x128xf32>
    %21 = arith.mulf %18, %20 : vector<64x128xf32>
    %c0_14 = arith.constant 0 : index
    %c0_15 = arith.constant 0 : index
    %22 = vector.load %arg5[%c0_14, %c0_15] : memref<64x1xf32, #tpu.memory_space<vmem>>, vector<64x1xf32>
    %23 = vector.broadcast %22 : vector<64x1xf32> to vector<64x128xf32>
    %24 = arith.addf %21, %23 : vector<64x128xf32>
    %cst_16 = arith.constant 0.000000e+00 : f32
    %25 = vector.broadcast %cst_16 : f32 to vector<64x128xf32>
    %26 = arith.maximumf %24, %25 : vector<64x128xf32>
    %c0_17 = arith.constant 0 : index
    %c0_18 = arith.constant 0 : index
    %27 = vector.load %arg6[%c0_17, %c0_18] : memref<64x64xf32, #tpu.memory_space<vmem>>, vector<64x64xf32>
    %28 = arith.truncf %27 : vector<64x64xf32> to vector<64x64xbf16>
    %29 = arith.truncf %26 : vector<64x128xf32> to vector<64x128xbf16>
    %cst_19 = arith.constant dense<0.000000e+00> : vector<64x128xf32>
    %30 = tpu.matmul %28, %29, %cst_19 {dimension_numbers = #tpu.dot_dimension_numbers<[1], [0], [0], [1], [0, 0, 1, 1], [], []>} : vector<64x64xbf16>, vector<64x128xbf16>, vector<64x128xf32> -> vector<64x128xf32>
    %c0_20 = arith.constant 0 : index
    %c0_21 = arith.constant 0 : index
    %c0_22 = arith.constant 0 : index
    %31 = vector.load %arg7[%c0_20, %c0_21, %c0_22] : memref<1x64x128xf32, #tpu.memory_space<vmem>>, vector<1x64x128xf32>
    %32 = vector.shape_cast %31 : vector<1x64x128xf32> to vector<64x128xf32>
    %33 = vector.shape_cast %30 : vector<64x128xf32> to vector<1x64x128xf32>
    tpu.vector_store %arg7[%c0_20, %c0_21, %c0_22], %33 {strides = array<i32>} : memref<1x64x128xf32, #tpu.memory_space<vmem>>, vector<1x64x128xf32>,
    %cst_23 = arith.constant dense<0.000000e+00> : vector<64xf32>
    %34 = vector.multi_reduction <add>, %30, %cst_23 [1] : vector<64x128xf32> to vector<64xf32>
    %35 = vector.shape_cast %34 : vector<64xf32> to vector<64x1xf32>
    %36 = arith.mulf %30, %30 : vector<64x128xf32>
    %cst_24 = arith.constant dense<0.000000e+00> : vector<64xf32>
    %37 = vector.multi_reduction <add>, %36, %cst_24 [1] : vector<64x128xf32> to vector<64xf32>
    %38 = vector.shape_cast %37 : vector<64xf32> to vector<64x1xf32>
    %c0_25 = arith.constant 0 : index
    %c0_26 = arith.constant 0 : index
    %c0_27 = arith.constant 0 : index
    %39 = vector.load %arg8[%c0_25, %c0_26, %c0_27] : memref<1x64x1xf32, #tpu.memory_space<vmem>>, vector<1x64x1xf32>
    %40 = vector.shape_cast %39 : vector<1x64x1xf32> to vector<64x1xf32>
    %41 = vector.shape_cast %35 : vector<64x1xf32> to vector<1x64x1xf32>
    tpu.vector_store %arg8[%c0_25, %c0_26, %c0_27], %41 {strides = array<i32>} : memref<1x64x1xf32, #tpu.memory_space<vmem>>, vector<1x64x1xf32>,
    %c0_28 = arith.constant 0 : index
    %c0_29 = arith.constant 0 : index
    %c0_30 = arith.constant 0 : index
    %42 = vector.load %arg9[%c0_28, %c0_29, %c0_30] : memref<1x64x1xf32, #tpu.memory_space<vmem>>, vector<1x64x1xf32>
    %43 = vector.shape_cast %42 : vector<1x64x1xf32> to vector<64x1xf32>
    %44 = vector.shape_cast %38 : vector<64x1xf32> to vector<1x64x1xf32>
    tpu.vector_store %arg9[%c0_28, %c0_29, %c0_30], %44 {strides = array<i32>} : memref<1x64x1xf32, #tpu.memory_space<vmem>>, vector<1x64x1xf32>,
    return
  }
  func.func @transform_0(%arg0: i32) -> (i32, i32, i32) {
    %c0_i32 = arith.constant 0 : i32
    %c0_i32_0 = arith.constant 0 : i32
    %c0_i32_1 = arith.constant 0 : i32
    return %arg0, %c0_i32, %c0_i32_0 : i32, i32, i32
  }
  func.func @transform_1(%arg0: i32) -> (i32, i32, i32) {
    %c0_i32 = arith.constant 0 : i32
    %c0_i32_0 = arith.constant 0 : i32
    %c0_i32_1 = arith.constant 0 : i32
    %c0_i32_2 = arith.constant 0 : i32
    return %c0_i32, %c0_i32_0, %c0_i32_1 : i32, i32, i32
  }
  func.func @transform_2(%arg0: i32) -> (i32, i32, i32) {
    %c0_i32 = arith.constant 0 : i32
    %c0_i32_0 = arith.constant 0 : i32
    %c0_i32_1 = arith.constant 0 : i32
    %c0_i32_2 = arith.constant 0 : i32
    return %c0_i32, %c0_i32_0, %c0_i32_1 : i32, i32, i32
  }
  func.func @transform_3(%arg0: i32) -> (i32, i32) {
    %c0_i32 = arith.constant 0 : i32
    %c0_i32_0 = arith.constant 0 : i32
    %c0_i32_1 = arith.constant 0 : i32
    return %c0_i32, %c0_i32_0 : i32, i32
  }
  func.func @transform_4(%arg0: i32) -> (i32, i32) {
    %c0_i32 = arith.constant 0 : i32
    %c0_i32_0 = arith.constant 0 : i32
    %c0_i32_1 = arith.constant 0 : i32
    return %c0_i32, %c0_i32_0 : i32, i32
  }
  func.func @transform_5(%arg0: i32) -> (i32, i32) {
    %c0_i32 = arith.constant 0 : i32
    %c0_i32_0 = arith.constant 0 : i32
    %c0_i32_1 = arith.constant 0 : i32
    return %c0_i32, %c0_i32_0 : i32, i32
  }
  func.func @transform_6(%arg0: i32) -> (i32, i32, i32) {
    %c0_i32 = arith.constant 0 : i32
    %c0_i32_0 = arith.constant 0 : i32
    %c0_i32_1 = arith.constant 0 : i32
    return %arg0, %c0_i32, %c0_i32_0 : i32, i32, i32
  }
  func.func @transform_7(%arg0: i32) -> (i32, i32, i32) {
    %c0_i32 = arith.constant 0 : i32
    %c0_i32_0 = arith.constant 0 : i32
    %c0_i32_1 = arith.constant 0 : i32
    return %arg0, %c0_i32, %c0_i32_0 : i32, i32, i32
  }
  func.func @transform_8(%arg0: i32) -> (i32, i32, i32) {
    %c0_i32 = arith.constant 0 : i32
    %c0_i32_0 = arith.constant 0 : i32
    %c0_i32_1 = arith.constant 0 : i32
    return %arg0, %c0_i32, %c0_i32_0 : i32, i32, i32
  }
}

module attributes {stable_mosaic.version = 11 : i64} {
  func.func @proj_kernel(%arg0: i32, %arg1: memref<1x64x128xf32, #tpu.memory_space<vmem>>, %arg2: memref<64x64xf32, #tpu.memory_space<vmem>>, %arg3: memref<1x64x128xf32, #tpu.memory_space<vmem>>, %arg4: memref<1x64x1xf32, #tpu.memory_space<vmem>>, %arg5: memref<1x64x1xf32, #tpu.memory_space<vmem>>) attributes {dimension_semantics = [#tpu.dimension_semantics<parallel>], iteration_bounds = array<i64: 2>, scalar_prefetch = 0 : i64, scratch_operands = 0 : i64, tpu.core_type = #tpu.core_type<tc>, window_params = [{transform_indices = @transform_0, window_bounds = array<i64: 1, 64, 128>}, {pipeline_mode = #tpu.pipeline_mode<synchronous>, transform_indices = @transform_1, window_bounds = array<i64: 64, 64>}, {transform_indices = @transform_2, window_bounds = array<i64: 1, 64, 128>}, {transform_indices = @transform_3, window_bounds = array<i64: 1, 64, 1>}, {transform_indices = @transform_4, window_bounds = array<i64: 1, 64, 1>}]} {
    %c0 = arith.constant 0 : index
    %c0_0 = arith.constant 0 : index
    %0 = vector.load %arg2[%c0, %c0_0] : memref<64x64xf32, #tpu.memory_space<vmem>>, vector<64x64xf32>
    %c0_1 = arith.constant 0 : index
    %c0_2 = arith.constant 0 : index
    %c0_3 = arith.constant 0 : index
    %1 = vector.load %arg1[%c0_1, %c0_2, %c0_3] : memref<1x64x128xf32, #tpu.memory_space<vmem>>, vector<1x64x128xf32>
    %2 = vector.shape_cast %1 : vector<1x64x128xf32> to vector<64x128xf32>
    %3 = arith.truncf %0 : vector<64x64xf32> to vector<64x64xbf16>
    %4 = arith.truncf %2 : vector<64x128xf32> to vector<64x128xbf16>
    %cst = arith.constant dense<0.000000e+00> : vector<64x128xf32>
    %5 = tpu.matmul %3, %4, %cst {dimension_numbers = #tpu.dot_dimension_numbers<[1], [0], [0], [1], [0, 0, 1, 1], [], []>} : vector<64x64xbf16>, vector<64x128xbf16>, vector<64x128xf32> -> vector<64x128xf32>
    %c0_4 = arith.constant 0 : index
    %c0_5 = arith.constant 0 : index
    %c0_6 = arith.constant 0 : index
    %6 = vector.load %arg3[%c0_4, %c0_5, %c0_6] : memref<1x64x128xf32, #tpu.memory_space<vmem>>, vector<1x64x128xf32>
    %7 = vector.shape_cast %6 : vector<1x64x128xf32> to vector<64x128xf32>
    %8 = vector.shape_cast %5 : vector<64x128xf32> to vector<1x64x128xf32>
    tpu.vector_store %arg3[%c0_4, %c0_5, %c0_6], %8 {strides = array<i32>} : memref<1x64x128xf32, #tpu.memory_space<vmem>>, vector<1x64x128xf32>,
    %cst_7 = arith.constant dense<0.000000e+00> : vector<64xf32>
    %9 = vector.multi_reduction <add>, %5, %cst_7 [1] : vector<64x128xf32> to vector<64xf32>
    %10 = vector.shape_cast %9 : vector<64xf32> to vector<64x1xf32>
    %11 = arith.mulf %5, %5 : vector<64x128xf32>
    %cst_8 = arith.constant dense<0.000000e+00> : vector<64xf32>
    %12 = vector.multi_reduction <add>, %11, %cst_8 [1] : vector<64x128xf32> to vector<64xf32>
    %13 = vector.shape_cast %12 : vector<64xf32> to vector<64x1xf32>
    %c0_9 = arith.constant 0 : index
    %c0_10 = arith.constant 0 : index
    %c0_11 = arith.constant 0 : index
    %14 = vector.load %arg4[%c0_9, %c0_10, %c0_11] : memref<1x64x1xf32, #tpu.memory_space<vmem>>, vector<1x64x1xf32>
    %15 = vector.shape_cast %14 : vector<1x64x1xf32> to vector<64x1xf32>
    %16 = vector.shape_cast %10 : vector<64x1xf32> to vector<1x64x1xf32>
    tpu.vector_store %arg4[%c0_9, %c0_10, %c0_11], %16 {strides = array<i32>} : memref<1x64x1xf32, #tpu.memory_space<vmem>>, vector<1x64x1xf32>,
    %c0_12 = arith.constant 0 : index
    %c0_13 = arith.constant 0 : index
    %c0_14 = arith.constant 0 : index
    %17 = vector.load %arg5[%c0_12, %c0_13, %c0_14] : memref<1x64x1xf32, #tpu.memory_space<vmem>>, vector<1x64x1xf32>
    %18 = vector.shape_cast %17 : vector<1x64x1xf32> to vector<64x1xf32>
    %19 = vector.shape_cast %13 : vector<64x1xf32> to vector<1x64x1xf32>
    tpu.vector_store %arg5[%c0_12, %c0_13, %c0_14], %19 {strides = array<i32>} : memref<1x64x1xf32, #tpu.memory_space<vmem>>, vector<1x64x1xf32>,
    return
  }
  func.func @transform_0(%arg0: i32) -> (i32, i32, i32) {
    %c0_i32 = arith.constant 0 : i32
    %c0_i32_0 = arith.constant 0 : i32
    %c0_i32_1 = arith.constant 0 : i32
    return %arg0, %c0_i32, %c0_i32_0 : i32, i32, i32
  }
  func.func @transform_1(%arg0: i32) -> (i32, i32) {
    %c0_i32 = arith.constant 0 : i32
    %c0_i32_0 = arith.constant 0 : i32
    %c0_i32_1 = arith.constant 0 : i32
    return %c0_i32, %c0_i32_0 : i32, i32
  }
  func.func @transform_2(%arg0: i32) -> (i32, i32, i32) {
    %c0_i32 = arith.constant 0 : i32
    %c0_i32_0 = arith.constant 0 : i32
    %c0_i32_1 = arith.constant 0 : i32
    return %arg0, %c0_i32, %c0_i32_0 : i32, i32, i32
  }
  func.func @transform_3(%arg0: i32) -> (i32, i32, i32) {
    %c0_i32 = arith.constant 0 : i32
    %c0_i32_0 = arith.constant 0 : i32
    %c0_i32_1 = arith.constant 0 : i32
    return %arg0, %c0_i32, %c0_i32_0 : i32, i32, i32
  }
  func.func @transform_4(%arg0: i32) -> (i32, i32, i32) {
    %c0_i32 = arith.constant 0 : i32
    %c0_i32_0 = arith.constant 0 : i32
    %c0_i32_1 = arith.constant 0 : i32
    return %arg0, %c0_i32, %c0_i32_0 : i32, i32, i32
  }
}

module attributes {stable_mosaic.version = 11 : i64} {
  func.func @bn_sa_kernel(%arg0: i32, %arg1: memref<1x64x128xf32, #tpu.memory_space<vmem>>, %arg2: memref<2x64x1xf32, #tpu.memory_space<vmem>>, %arg3: memref<2x64x1xf32, #tpu.memory_space<vmem>>, %arg4: memref<64x1xf32, #tpu.memory_space<vmem>>, %arg5: memref<64x1xf32, #tpu.memory_space<vmem>>, %arg6: memref<16x64xf32, #tpu.memory_space<vmem>>, %arg7: memref<64x64xf32, #tpu.memory_space<vmem>>, %arg8: memref<64x1xf32, #tpu.memory_space<vmem>>, %arg9: memref<64x64xf32, #tpu.memory_space<vmem>>, %arg10: memref<64x1xf32, #tpu.memory_space<vmem>>, %arg11: memref<1x64x128xf32, #tpu.memory_space<vmem>>, %arg12: memref<1x64x128xf32, #tpu.memory_space<vmem>>, %arg13: memref<1x64x1xf32, #tpu.memory_space<vmem>>, %arg14: memref<1x64x1xf32, #tpu.memory_space<vmem>>) attributes {dimension_semantics = [#tpu.dimension_semantics<parallel>], iteration_bounds = array<i64: 2>, scalar_prefetch = 0 : i64, scratch_operands = 0 : i64, tpu.core_type = #tpu.core_type<tc>, window_params = [{transform_indices = @transform_0, window_bounds = array<i64: 1, 64, 128>}, {pipeline_mode = #tpu.pipeline_mode<synchronous>, transform_indices = @transform_1, window_bounds = array<i64: 2, 64, 1>}, {pipeline_mode = #tpu.pipeline_mode<synchronous>, transform_indices = @transform_2, window_bounds = array<i64: 2, 64, 1>}, {pipeline_mode = #tpu.pipeline_mode<synchronous>, transform_indices = @transform_3, window_bounds = array<i64: 64, 1>}, {pipeline_mode = #tpu.pipeline_mode<synchronous>, transform_indices = @transform_4, window_bounds = array<i64: 64, 1>}, {pipeline_mode = #tpu.pipeline_mode<synchronous>, transform_indices = @transform_5, window_bounds = array<i64: 16, 64>}, {pipeline_mode = #tpu.pipeline_mode<synchronous>, transform_indices = @transform_6, window_bounds = array<i64: 64, 64>}, {pipeline_mode = #tpu.pipeline_mode<synchronous>, transform_indices = @transform_7, window_bounds = array<i64: 64, 1>}, {pipeline_mode = #tpu.pipeline_mode<synchronous>, transform_indices = @transform_8, window_bounds = array<i64: 64, 64>}, {pipeline_mode = #tpu.pipeline_mode<synchronous>, transform_indices = @transform_9, window_bounds = array<i64: 64, 1>}, {transform_indices = @transform_10, window_bounds = array<i64: 1, 64, 128>}, {transform_indices = @transform_11, window_bounds = array<i64: 1, 64, 128>}, {transform_indices = @transform_12, window_bounds = array<i64: 1, 64, 1>}, {transform_indices = @transform_13, window_bounds = array<i64: 1, 64, 1>}]} {
    %c0 = arith.constant 0 : index
    %c0_0 = arith.constant 0 : index
    %c0_1 = arith.constant 0 : index
    %0 = vector.load %arg1[%c0, %c0_0, %c0_1] : memref<1x64x128xf32, #tpu.memory_space<vmem>>, vector<1x64x128xf32>
    %1 = vector.shape_cast %0 : vector<1x64x128xf32> to vector<64x128xf32>
    %c0_2 = arith.constant 0 : index
    %c0_3 = arith.constant 0 : index
    %c0_4 = arith.constant 0 : index
    %2 = vector.load %arg2[%c0_2, %c0_3, %c0_4] : memref<2x64x1xf32, #tpu.memory_space<vmem>>, vector<2x64x1xf32>
    %c0_5 = arith.constant 0 : index
    %c0_6 = arith.constant 0 : index
    %c0_7 = arith.constant 0 : index
    %3 = vector.load %arg3[%c0_5, %c0_6, %c0_7] : memref<2x64x1xf32, #tpu.memory_space<vmem>>, vector<2x64x1xf32>
    %cst = arith.constant dense<0.000000e+00> : vector<64x1xf32>
    %4 = vector.multi_reduction <add>, %2, %cst [0] : vector<2x64x1xf32> to vector<64x1xf32>
    %cst_8 = arith.constant 2.560000e+02 : f32
    %5 = vector.broadcast %cst_8 : f32 to vector<64x1xf32>
    %6 = arith.divf %4, %5 : vector<64x1xf32>
    %cst_9 = arith.constant dense<0.000000e+00> : vector<64x1xf32>
    %7 = vector.multi_reduction <add>, %3, %cst_9 [0] : vector<2x64x1xf32> to vector<64x1xf32>
    %cst_10 = arith.constant 2.560000e+02 : f32
    %8 = vector.broadcast %cst_10 : f32 to vector<64x1xf32>
    %9 = arith.divf %7, %8 : vector<64x1xf32>
    %10 = arith.mulf %6, %6 : vector<64x1xf32>
    %11 = arith.subf %9, %10 : vector<64x1xf32>
    %cst_11 = arith.constant 9.99999974E-6 : f32
    %12 = vector.broadcast %cst_11 : f32 to vector<64x1xf32>
    %13 = arith.addf %11, %12 : vector<64x1xf32>
    %14 = math.rsqrt %13 : vector<64x1xf32>
    %15 = vector.broadcast %6 : vector<64x1xf32> to vector<64x128xf32>
    %16 = arith.subf %1, %15 : vector<64x128xf32>
    %17 = vector.broadcast %14 : vector<64x1xf32> to vector<64x128xf32>
    %18 = arith.mulf %16, %17 : vector<64x128xf32>
    %c0_12 = arith.constant 0 : index
    %c0_13 = arith.constant 0 : index
    %19 = vector.load %arg4[%c0_12, %c0_13] : memref<64x1xf32, #tpu.memory_space<vmem>>, vector<64x1xf32>
    %20 = vector.broadcast %19 : vector<64x1xf32> to vector<64x128xf32>
    %21 = arith.mulf %18, %20 : vector<64x128xf32>
    %c0_14 = arith.constant 0 : index
    %c0_15 = arith.constant 0 : index
    %22 = vector.load %arg5[%c0_14, %c0_15] : memref<64x1xf32, #tpu.memory_space<vmem>>, vector<64x1xf32>
    %23 = vector.broadcast %22 : vector<64x1xf32> to vector<64x128xf32>
    %24 = arith.addf %21, %23 : vector<64x128xf32>
    %cst_16 = arith.constant 0.000000e+00 : f32
    %25 = vector.broadcast %cst_16 : f32 to vector<64x128xf32>
    %26 = arith.maximumf %24, %25 : vector<64x128xf32>
    %c0_17 = arith.constant 0 : index
    %c0_18 = arith.constant 0 : index
    %c0_19 = arith.constant 0 : index
    %27 = vector.load %arg11[%c0_17, %c0_18, %c0_19] : memref<1x64x128xf32, #tpu.memory_space<vmem>>, vector<1x64x128xf32>
    %28 = vector.shape_cast %27 : vector<1x64x128xf32> to vector<64x128xf32>
    %29 = vector.shape_cast %26 : vector<64x128xf32> to vector<1x64x128xf32>
    tpu.vector_store %arg11[%c0_17, %c0_18, %c0_19], %29 {strides = array<i32>} : memref<1x64x128xf32, #tpu.memory_space<vmem>>, vector<1x64x128xf32>,
    %c0_20 = arith.constant 0 : index
    %c0_21 = arith.constant 0 : index
    %30 = vector.load %arg6[%c0_20, %c0_21] : memref<16x64xf32, #tpu.memory_space<vmem>>, vector<16x64xf32>
    %31 = arith.truncf %30 : vector<16x64xf32> to vector<16x64xbf16>
    %32 = arith.truncf %26 : vector<64x128xf32> to vector<64x128xbf16>
    %cst_22 = arith.constant dense<0.000000e+00> : vector<16x128xf32>
    %33 = tpu.matmul %31, %32, %cst_22 {dimension_numbers = #tpu.dot_dimension_numbers<[1], [0], [0], [1], [0, 0, 1, 1], [], []>} : vector<16x64xbf16>, vector<64x128xbf16>, vector<16x128xf32> -> vector<16x128xf32>
    %c0_23 = arith.constant 0 : index
    %c0_24 = arith.constant 0 : index
    %34 = vector.load %arg7[%c0_23, %c0_24] : memref<64x64xf32, #tpu.memory_space<vmem>>, vector<64x64xf32>
    %35 = arith.truncf %34 : vector<64x64xf32> to vector<64x64xbf16>
    %36 = arith.truncf %26 : vector<64x128xf32> to vector<64x128xbf16>
    %cst_25 = arith.constant dense<0.000000e+00> : vector<64x128xf32>
    %37 = tpu.matmul %35, %36, %cst_25 {dimension_numbers = #tpu.dot_dimension_numbers<[1], [0], [0], [1], [0, 0, 1, 1], [], []>} : vector<64x64xbf16>, vector<64x128xbf16>, vector<64x128xf32> -> vector<64x128xf32>
    %c0_26 = arith.constant 0 : index
    %c0_27 = arith.constant 0 : index
    %38 = vector.load %arg8[%c0_26, %c0_27] : memref<64x1xf32, #tpu.memory_space<vmem>>, vector<64x1xf32>
    %39 = vector.broadcast %38 : vector<64x1xf32> to vector<64x128xf32>
    %40 = arith.addf %37, %39 : vector<64x128xf32>
    %41 = tpu.transpose %33, [1, 0] : vector<16x128xf32> -> vector<128x16xf32>
    %42 = arith.truncf %41 : vector<128x16xf32> to vector<128x16xbf16>
    %43 = arith.truncf %33 : vector<16x128xf32> to vector<16x128xbf16>
    %cst_28 = arith.constant dense<0.000000e+00> : vector<128x128xf32>
    %44 = tpu.matmul %42, %43, %cst_28 {dimension_numbers = #tpu.dot_dimension_numbers<[1], [0], [0], [1], [0, 0, 1, 1], [], []>} : vector<128x16xbf16>, vector<16x128xbf16>, vector<128x128xf32> -> vector<128x128xf32>
    %cst_29 = arith.constant dense<0xFF800000> : vector<128xf32>
    %45 = vector.multi_reduction <maximumf>, %44, %cst_29 [1] : vector<128x128xf32> to vector<128xf32>
    %46 = vector.shape_cast %45 : vector<128xf32> to vector<128x1xf32>
    %47 = vector.broadcast %46 : vector<128x1xf32> to vector<128x128xf32>
    %48 = arith.subf %44, %47 : vector<128x128xf32>
    %49 = math.exp %48 : vector<128x128xf32>
    %cst_30 = arith.constant dense<0.000000e+00> : vector<128xf32>
    %50 = vector.multi_reduction <add>, %49, %cst_30 [1] : vector<128x128xf32> to vector<128xf32>
    %51 = vector.shape_cast %50 : vector<128xf32> to vector<128x1xf32>
    %52 = tpu.reciprocal %51 {approx = true} : vector<128x1xf32> -> vector<128x1xf32>
    %53 = vector.broadcast %52 : vector<128x1xf32> to vector<128x128xf32>
    %54 = arith.mulf %49, %53 : vector<128x128xf32>
    %cst_31 = arith.constant dense<0.000000e+00> : vector<128xf32>
    %55 = vector.multi_reduction <add>, %54, %cst_31 [0] : vector<128x128xf32> to vector<128xf32>
    %56 = vector.shape_cast %55 : vector<128xf32> to vector<1x128xf32>
    %cst_32 = arith.constant 9.99999971E-10 : f32
    %57 = vector.broadcast %cst_32 : f32 to vector<1x128xf32>
    %58 = arith.addf %57, %56 : vector<1x128xf32>
    %59 = tpu.reciprocal %58 {approx = true} : vector<1x128xf32> -> vector<1x128xf32>
    %60 = vector.broadcast %59 : vector<1x128xf32> to vector<128x128xf32>
    %61 = arith.mulf %54, %60 : vector<128x128xf32>
    %62 = arith.truncf %40 : vector<64x128xf32> to vector<64x128xbf16>
    %63 = arith.truncf %61 : vector<128x128xf32> to vector<128x128xbf16>
    %cst_33 = arith.constant dense<0.000000e+00> : vector<64x128xf32>
    %64 = tpu.matmul %62, %63, %cst_33 {dimension_numbers = #tpu.dot_dimension_numbers<[1], [0], [0], [1], [0, 0, 1, 1], [], []>} : vector<64x128xbf16>, vector<128x128xbf16>, vector<64x128xf32> -> vector<64x128xf32>
    %c0_34 = arith.constant 0 : index
    %c0_35 = arith.constant 0 : index
    %65 = vector.load %arg9[%c0_34, %c0_35] : memref<64x64xf32, #tpu.memory_space<vmem>>, vector<64x64xf32>
    %66 = arith.subf %26, %64 : vector<64x128xf32>
    %67 = arith.truncf %65 : vector<64x64xf32> to vector<64x64xbf16>
    %68 = arith.truncf %66 : vector<64x128xf32> to vector<64x128xbf16>
    %cst_36 = arith.constant dense<0.000000e+00> : vector<64x128xf32>
    %69 = tpu.matmul %67, %68, %cst_36 {dimension_numbers = #tpu.dot_dimension_numbers<[1], [0], [0], [1], [0, 0, 1, 1], [], []>} : vector<64x64xbf16>, vector<64x128xbf16>, vector<64x128xf32> -> vector<64x128xf32>
    %c0_37 = arith.constant 0 : index
    %c0_38 = arith.constant 0 : index
    %70 = vector.load %arg10[%c0_37, %c0_38] : memref<64x1xf32, #tpu.memory_space<vmem>>, vector<64x1xf32>
    %71 = vector.broadcast %70 : vector<64x1xf32> to vector<64x128xf32>
    %72 = arith.addf %69, %71 : vector<64x128xf32>
    %c0_39 = arith.constant 0 : index
    %c0_40 = arith.constant 0 : index
    %c0_41 = arith.constant 0 : index
    %73 = vector.load %arg12[%c0_39, %c0_40, %c0_41] : memref<1x64x128xf32, #tpu.memory_space<vmem>>, vector<1x64x128xf32>
    %74 = vector.shape_cast %73 : vector<1x64x128xf32> to vector<64x128xf32>
    %75 = vector.shape_cast %72 : vector<64x128xf32> to vector<1x64x128xf32>
    tpu.vector_store %arg12[%c0_39, %c0_40, %c0_41], %75 {strides = array<i32>} : memref<1x64x128xf32, #tpu.memory_space<vmem>>, vector<1x64x128xf32>,
    %cst_42 = arith.constant dense<0.000000e+00> : vector<64xf32>
    %76 = vector.multi_reduction <add>, %72, %cst_42 [1] : vector<64x128xf32> to vector<64xf32>
    %77 = vector.shape_cast %76 : vector<64xf32> to vector<64x1xf32>
    %78 = arith.mulf %72, %72 : vector<64x128xf32>
    %cst_43 = arith.constant dense<0.000000e+00> : vector<64xf32>
    %79 = vector.multi_reduction <add>, %78, %cst_43 [1] : vector<64x128xf32> to vector<64xf32>
    %80 = vector.shape_cast %79 : vector<64xf32> to vector<64x1xf32>
    %c0_44 = arith.constant 0 : index
    %c0_45 = arith.constant 0 : index
    %c0_46 = arith.constant 0 : index
    %81 = vector.load %arg13[%c0_44, %c0_45, %c0_46] : memref<1x64x1xf32, #tpu.memory_space<vmem>>, vector<1x64x1xf32>
    %82 = vector.shape_cast %81 : vector<1x64x1xf32> to vector<64x1xf32>
    %83 = vector.shape_cast %77 : vector<64x1xf32> to vector<1x64x1xf32>
    tpu.vector_store %arg13[%c0_44, %c0_45, %c0_46], %83 {strides = array<i32>} : memref<1x64x1xf32, #tpu.memory_space<vmem>>, vector<1x64x1xf32>,
    %c0_47 = arith.constant 0 : index
    %c0_48 = arith.constant 0 : index
    %c0_49 = arith.constant 0 : index
    %84 = vector.load %arg14[%c0_47, %c0_48, %c0_49] : memref<1x64x1xf32, #tpu.memory_space<vmem>>, vector<1x64x1xf32>
    %85 = vector.shape_cast %84 : vector<1x64x1xf32> to vector<64x1xf32>
    %86 = vector.shape_cast %80 : vector<64x1xf32> to vector<1x64x1xf32>
    tpu.vector_store %arg14[%c0_47, %c0_48, %c0_49], %86 {strides = array<i32>} : memref<1x64x1xf32, #tpu.memory_space<vmem>>, vector<1x64x1xf32>,
    return
  }
  func.func @transform_0(%arg0: i32) -> (i32, i32, i32) {
    %c0_i32 = arith.constant 0 : i32
    %c0_i32_0 = arith.constant 0 : i32
    %c0_i32_1 = arith.constant 0 : i32
    return %arg0, %c0_i32, %c0_i32_0 : i32, i32, i32
  }
  func.func @transform_1(%arg0: i32) -> (i32, i32, i32) {
    %c0_i32 = arith.constant 0 : i32
    %c0_i32_0 = arith.constant 0 : i32
    %c0_i32_1 = arith.constant 0 : i32
    %c0_i32_2 = arith.constant 0 : i32
    return %c0_i32, %c0_i32_0, %c0_i32_1 : i32, i32, i32
  }
  func.func @transform_2(%arg0: i32) -> (i32, i32, i32) {
    %c0_i32 = arith.constant 0 : i32
    %c0_i32_0 = arith.constant 0 : i32
    %c0_i32_1 = arith.constant 0 : i32
    %c0_i32_2 = arith.constant 0 : i32
    return %c0_i32, %c0_i32_0, %c0_i32_1 : i32, i32, i32
  }
  func.func @transform_3(%arg0: i32) -> (i32, i32) {
    %c0_i32 = arith.constant 0 : i32
    %c0_i32_0 = arith.constant 0 : i32
    %c0_i32_1 = arith.constant 0 : i32
    return %c0_i32, %c0_i32_0 : i32, i32
  }
  func.func @transform_4(%arg0: i32) -> (i32, i32) {
    %c0_i32 = arith.constant 0 : i32
    %c0_i32_0 = arith.constant 0 : i32
    %c0_i32_1 = arith.constant 0 : i32
    return %c0_i32, %c0_i32_0 : i32, i32
  }
  func.func @transform_5(%arg0: i32) -> (i32, i32) {
    %c0_i32 = arith.constant 0 : i32
    %c0_i32_0 = arith.constant 0 : i32
    %c0_i32_1 = arith.constant 0 : i32
    return %c0_i32, %c0_i32_0 : i32, i32
  }
  func.func @transform_6(%arg0: i32) -> (i32, i32) {
    %c0_i32 = arith.constant 0 : i32
    %c0_i32_0 = arith.constant 0 : i32
    %c0_i32_1 = arith.constant 0 : i32
    return %c0_i32, %c0_i32_0 : i32, i32
  }
  func.func @transform_7(%arg0: i32) -> (i32, i32) {
    %c0_i32 = arith.constant 0 : i32
    %c0_i32_0 = arith.constant 0 : i32
    %c0_i32_1 = arith.constant 0 : i32
    return %c0_i32, %c0_i32_0 : i32, i32
  }
  func.func @transform_8(%arg0: i32) -> (i32, i32) {
    %c0_i32 = arith.constant 0 : i32
    %c0_i32_0 = arith.constant 0 : i32
    %c0_i32_1 = arith.constant 0 : i32
    return %c0_i32, %c0_i32_0 : i32, i32
  }
  func.func @transform_9(%arg0: i32) -> (i32, i32) {
    %c0_i32 = arith.constant 0 : i32
    %c0_i32_0 = arith.constant 0 : i32
    %c0_i32_1 = arith.constant 0 : i32
    return %c0_i32, %c0_i32_0 : i32, i32
  }
  func.func @transform_10(%arg0: i32) -> (i32, i32, i32) {
    %c0_i32 = arith.constant 0 : i32
    %c0_i32_0 = arith.constant 0 : i32
    %c0_i32_1 = arith.constant 0 : i32
    return %arg0, %c0_i32, %c0_i32_0 : i32, i32, i32
  }
  func.func @transform_11(%arg0: i32) -> (i32, i32, i32) {
    %c0_i32 = arith.constant 0 : i32
    %c0_i32_0 = arith.constant 0 : i32
    %c0_i32_1 = arith.constant 0 : i32
    return %arg0, %c0_i32, %c0_i32_0 : i32, i32, i32
  }
  func.func @transform_12(%arg0: i32) -> (i32, i32, i32) {
    %c0_i32 = arith.constant 0 : i32
    %c0_i32_0 = arith.constant 0 : i32
    %c0_i32_1 = arith.constant 0 : i32
    return %arg0, %c0_i32, %c0_i32_0 : i32, i32, i32
  }
  func.func @transform_13(%arg0: i32) -> (i32, i32, i32) {
    %c0_i32 = arith.constant 0 : i32
    %c0_i32_0 = arith.constant 0 : i32
    %c0_i32_1 = arith.constant 0 : i32
    return %arg0, %c0_i32, %c0_i32_0 : i32, i32, i32
  }
}

module attributes {stable_mosaic.version = 11 : i64} {
  func.func @bn_sa_kernel(%arg0: i32, %arg1: memref<1x64x128xf32, #tpu.memory_space<vmem>>, %arg2: memref<2x64x1xf32, #tpu.memory_space<vmem>>, %arg3: memref<2x64x1xf32, #tpu.memory_space<vmem>>, %arg4: memref<64x1xf32, #tpu.memory_space<vmem>>, %arg5: memref<64x1xf32, #tpu.memory_space<vmem>>, %arg6: memref<1x64x128xf32, #tpu.memory_space<vmem>>, %arg7: memref<16x64xf32, #tpu.memory_space<vmem>>, %arg8: memref<64x64xf32, #tpu.memory_space<vmem>>, %arg9: memref<64x1xf32, #tpu.memory_space<vmem>>, %arg10: memref<64x64xf32, #tpu.memory_space<vmem>>, %arg11: memref<64x1xf32, #tpu.memory_space<vmem>>, %arg12: memref<1x64x128xf32, #tpu.memory_space<vmem>>, %arg13: memref<1x64x128xf32, #tpu.memory_space<vmem>>, %arg14: memref<1x64x1xf32, #tpu.memory_space<vmem>>, %arg15: memref<1x64x1xf32, #tpu.memory_space<vmem>>) attributes {dimension_semantics = [#tpu.dimension_semantics<parallel>], iteration_bounds = array<i64: 2>, scalar_prefetch = 0 : i64, scratch_operands = 0 : i64, tpu.core_type = #tpu.core_type<tc>, window_params = [{transform_indices = @transform_0, window_bounds = array<i64: 1, 64, 128>}, {pipeline_mode = #tpu.pipeline_mode<synchronous>, transform_indices = @transform_1, window_bounds = array<i64: 2, 64, 1>}, {pipeline_mode = #tpu.pipeline_mode<synchronous>, transform_indices = @transform_2, window_bounds = array<i64: 2, 64, 1>}, {pipeline_mode = #tpu.pipeline_mode<synchronous>, transform_indices = @transform_3, window_bounds = array<i64: 64, 1>}, {pipeline_mode = #tpu.pipeline_mode<synchronous>, transform_indices = @transform_4, window_bounds = array<i64: 64, 1>}, {transform_indices = @transform_5, window_bounds = array<i64: 1, 64, 128>}, {pipeline_mode = #tpu.pipeline_mode<synchronous>, transform_indices = @transform_6, window_bounds = array<i64: 16, 64>}, {pipeline_mode = #tpu.pipeline_mode<synchronous>, transform_indices = @transform_7, window_bounds = array<i64: 64, 64>}, {pipeline_mode = #tpu.pipeline_mode<synchronous>, transform_indices = @transform_8, window_bounds = array<i64: 64, 1>}, {pipeline_mode = #tpu.pipeline_mode<synchronous>, transform_indices = @transform_9, window_bounds = array<i64: 64, 64>}, {pipeline_mode = #tpu.pipeline_mode<synchronous>, transform_indices = @transform_10, window_bounds = array<i64: 64, 1>}, {transform_indices = @transform_11, window_bounds = array<i64: 1, 64, 128>}, {transform_indices = @transform_12, window_bounds = array<i64: 1, 64, 128>}, {transform_indices = @transform_13, window_bounds = array<i64: 1, 64, 1>}, {transform_indices = @transform_14, window_bounds = array<i64: 1, 64, 1>}]} {
    %c0 = arith.constant 0 : index
    %c0_0 = arith.constant 0 : index
    %c0_1 = arith.constant 0 : index
    %0 = vector.load %arg1[%c0, %c0_0, %c0_1] : memref<1x64x128xf32, #tpu.memory_space<vmem>>, vector<1x64x128xf32>
    %1 = vector.shape_cast %0 : vector<1x64x128xf32> to vector<64x128xf32>
    %c0_2 = arith.constant 0 : index
    %c0_3 = arith.constant 0 : index
    %c0_4 = arith.constant 0 : index
    %2 = vector.load %arg2[%c0_2, %c0_3, %c0_4] : memref<2x64x1xf32, #tpu.memory_space<vmem>>, vector<2x64x1xf32>
    %c0_5 = arith.constant 0 : index
    %c0_6 = arith.constant 0 : index
    %c0_7 = arith.constant 0 : index
    %3 = vector.load %arg3[%c0_5, %c0_6, %c0_7] : memref<2x64x1xf32, #tpu.memory_space<vmem>>, vector<2x64x1xf32>
    %cst = arith.constant dense<0.000000e+00> : vector<64x1xf32>
    %4 = vector.multi_reduction <add>, %2, %cst [0] : vector<2x64x1xf32> to vector<64x1xf32>
    %cst_8 = arith.constant 2.560000e+02 : f32
    %5 = vector.broadcast %cst_8 : f32 to vector<64x1xf32>
    %6 = arith.divf %4, %5 : vector<64x1xf32>
    %cst_9 = arith.constant dense<0.000000e+00> : vector<64x1xf32>
    %7 = vector.multi_reduction <add>, %3, %cst_9 [0] : vector<2x64x1xf32> to vector<64x1xf32>
    %cst_10 = arith.constant 2.560000e+02 : f32
    %8 = vector.broadcast %cst_10 : f32 to vector<64x1xf32>
    %9 = arith.divf %7, %8 : vector<64x1xf32>
    %10 = arith.mulf %6, %6 : vector<64x1xf32>
    %11 = arith.subf %9, %10 : vector<64x1xf32>
    %cst_11 = arith.constant 9.99999974E-6 : f32
    %12 = vector.broadcast %cst_11 : f32 to vector<64x1xf32>
    %13 = arith.addf %11, %12 : vector<64x1xf32>
    %14 = math.rsqrt %13 : vector<64x1xf32>
    %15 = vector.broadcast %6 : vector<64x1xf32> to vector<64x128xf32>
    %16 = arith.subf %1, %15 : vector<64x128xf32>
    %17 = vector.broadcast %14 : vector<64x1xf32> to vector<64x128xf32>
    %18 = arith.mulf %16, %17 : vector<64x128xf32>
    %c0_12 = arith.constant 0 : index
    %c0_13 = arith.constant 0 : index
    %19 = vector.load %arg4[%c0_12, %c0_13] : memref<64x1xf32, #tpu.memory_space<vmem>>, vector<64x1xf32>
    %20 = vector.broadcast %19 : vector<64x1xf32> to vector<64x128xf32>
    %21 = arith.mulf %18, %20 : vector<64x128xf32>
    %c0_14 = arith.constant 0 : index
    %c0_15 = arith.constant 0 : index
    %22 = vector.load %arg5[%c0_14, %c0_15] : memref<64x1xf32, #tpu.memory_space<vmem>>, vector<64x1xf32>
    %23 = vector.broadcast %22 : vector<64x1xf32> to vector<64x128xf32>
    %24 = arith.addf %21, %23 : vector<64x128xf32>
    %cst_16 = arith.constant 0.000000e+00 : f32
    %25 = vector.broadcast %cst_16 : f32 to vector<64x128xf32>
    %26 = arith.maximumf %24, %25 : vector<64x128xf32>
    %c0_17 = arith.constant 0 : index
    %c0_18 = arith.constant 0 : index
    %c0_19 = arith.constant 0 : index
    %27 = vector.load %arg6[%c0_17, %c0_18, %c0_19] : memref<1x64x128xf32, #tpu.memory_space<vmem>>, vector<1x64x128xf32>
    %28 = vector.shape_cast %27 : vector<1x64x128xf32> to vector<64x128xf32>
    %29 = arith.addf %28, %26 : vector<64x128xf32>
    %c0_20 = arith.constant 0 : index
    %c0_21 = arith.constant 0 : index
    %c0_22 = arith.constant 0 : index
    %30 = vector.load %arg12[%c0_20, %c0_21, %c0_22] : memref<1x64x128xf32, #tpu.memory_space<vmem>>, vector<1x64x128xf32>
    %31 = vector.shape_cast %30 : vector<1x64x128xf32> to vector<64x128xf32>
    %32 = vector.shape_cast %29 : vector<64x128xf32> to vector<1x64x128xf32>
    tpu.vector_store %arg12[%c0_20, %c0_21, %c0_22], %32 {strides = array<i32>} : memref<1x64x128xf32, #tpu.memory_space<vmem>>, vector<1x64x128xf32>,
    %c0_23 = arith.constant 0 : index
    %c0_24 = arith.constant 0 : index
    %33 = vector.load %arg7[%c0_23, %c0_24] : memref<16x64xf32, #tpu.memory_space<vmem>>, vector<16x64xf32>
    %34 = arith.truncf %33 : vector<16x64xf32> to vector<16x64xbf16>
    %35 = arith.truncf %29 : vector<64x128xf32> to vector<64x128xbf16>
    %cst_25 = arith.constant dense<0.000000e+00> : vector<16x128xf32>
    %36 = tpu.matmul %34, %35, %cst_25 {dimension_numbers = #tpu.dot_dimension_numbers<[1], [0], [0], [1], [0, 0, 1, 1], [], []>} : vector<16x64xbf16>, vector<64x128xbf16>, vector<16x128xf32> -> vector<16x128xf32>
    %c0_26 = arith.constant 0 : index
    %c0_27 = arith.constant 0 : index
    %37 = vector.load %arg8[%c0_26, %c0_27] : memref<64x64xf32, #tpu.memory_space<vmem>>, vector<64x64xf32>
    %38 = arith.truncf %37 : vector<64x64xf32> to vector<64x64xbf16>
    %39 = arith.truncf %29 : vector<64x128xf32> to vector<64x128xbf16>
    %cst_28 = arith.constant dense<0.000000e+00> : vector<64x128xf32>
    %40 = tpu.matmul %38, %39, %cst_28 {dimension_numbers = #tpu.dot_dimension_numbers<[1], [0], [0], [1], [0, 0, 1, 1], [], []>} : vector<64x64xbf16>, vector<64x128xbf16>, vector<64x128xf32> -> vector<64x128xf32>
    %c0_29 = arith.constant 0 : index
    %c0_30 = arith.constant 0 : index
    %41 = vector.load %arg9[%c0_29, %c0_30] : memref<64x1xf32, #tpu.memory_space<vmem>>, vector<64x1xf32>
    %42 = vector.broadcast %41 : vector<64x1xf32> to vector<64x128xf32>
    %43 = arith.addf %40, %42 : vector<64x128xf32>
    %44 = tpu.transpose %36, [1, 0] : vector<16x128xf32> -> vector<128x16xf32>
    %45 = arith.truncf %44 : vector<128x16xf32> to vector<128x16xbf16>
    %46 = arith.truncf %36 : vector<16x128xf32> to vector<16x128xbf16>
    %cst_31 = arith.constant dense<0.000000e+00> : vector<128x128xf32>
    %47 = tpu.matmul %45, %46, %cst_31 {dimension_numbers = #tpu.dot_dimension_numbers<[1], [0], [0], [1], [0, 0, 1, 1], [], []>} : vector<128x16xbf16>, vector<16x128xbf16>, vector<128x128xf32> -> vector<128x128xf32>
    %cst_32 = arith.constant dense<0xFF800000> : vector<128xf32>
    %48 = vector.multi_reduction <maximumf>, %47, %cst_32 [1] : vector<128x128xf32> to vector<128xf32>
    %49 = vector.shape_cast %48 : vector<128xf32> to vector<128x1xf32>
    %50 = vector.broadcast %49 : vector<128x1xf32> to vector<128x128xf32>
    %51 = arith.subf %47, %50 : vector<128x128xf32>
    %52 = math.exp %51 : vector<128x128xf32>
    %cst_33 = arith.constant dense<0.000000e+00> : vector<128xf32>
    %53 = vector.multi_reduction <add>, %52, %cst_33 [1] : vector<128x128xf32> to vector<128xf32>
    %54 = vector.shape_cast %53 : vector<128xf32> to vector<128x1xf32>
    %55 = tpu.reciprocal %54 {approx = true} : vector<128x1xf32> -> vector<128x1xf32>
    %56 = vector.broadcast %55 : vector<128x1xf32> to vector<128x128xf32>
    %57 = arith.mulf %52, %56 : vector<128x128xf32>
    %cst_34 = arith.constant dense<0.000000e+00> : vector<128xf32>
    %58 = vector.multi_reduction <add>, %57, %cst_34 [0] : vector<128x128xf32> to vector<128xf32>
    %59 = vector.shape_cast %58 : vector<128xf32> to vector<1x128xf32>
    %cst_35 = arith.constant 9.99999971E-10 : f32
    %60 = vector.broadcast %cst_35 : f32 to vector<1x128xf32>
    %61 = arith.addf %60, %59 : vector<1x128xf32>
    %62 = tpu.reciprocal %61 {approx = true} : vector<1x128xf32> -> vector<1x128xf32>
    %63 = vector.broadcast %62 : vector<1x128xf32> to vector<128x128xf32>
    %64 = arith.mulf %57, %63 : vector<128x128xf32>
    %65 = arith.truncf %43 : vector<64x128xf32> to vector<64x128xbf16>
    %66 = arith.truncf %64 : vector<128x128xf32> to vector<128x128xbf16>
    %cst_36 = arith.constant dense<0.000000e+00> : vector<64x128xf32>
    %67 = tpu.matmul %65, %66, %cst_36 {dimension_numbers = #tpu.dot_dimension_numbers<[1], [0], [0], [1], [0, 0, 1, 1], [], []>} : vector<64x128xbf16>, vector<128x128xbf16>, vector<64x128xf32> -> vector<64x128xf32>
    %c0_37 = arith.constant 0 : index
    %c0_38 = arith.constant 0 : index
    %68 = vector.load %arg10[%c0_37, %c0_38] : memref<64x64xf32, #tpu.memory_space<vmem>>, vector<64x64xf32>
    %69 = arith.subf %29, %67 : vector<64x128xf32>
    %70 = arith.truncf %68 : vector<64x64xf32> to vector<64x64xbf16>
    %71 = arith.truncf %69 : vector<64x128xf32> to vector<64x128xbf16>
    %cst_39 = arith.constant dense<0.000000e+00> : vector<64x128xf32>
    %72 = tpu.matmul %70, %71, %cst_39 {dimension_numbers = #tpu.dot_dimension_numbers<[1], [0], [0], [1], [0, 0, 1, 1], [], []>} : vector<64x64xbf16>, vector<64x128xbf16>, vector<64x128xf32> -> vector<64x128xf32>
    %c0_40 = arith.constant 0 : index
    %c0_41 = arith.constant 0 : index
    %73 = vector.load %arg11[%c0_40, %c0_41] : memref<64x1xf32, #tpu.memory_space<vmem>>, vector<64x1xf32>
    %74 = vector.broadcast %73 : vector<64x1xf32> to vector<64x128xf32>
    %75 = arith.addf %72, %74 : vector<64x128xf32>
    %c0_42 = arith.constant 0 : index
    %c0_43 = arith.constant 0 : index
    %c0_44 = arith.constant 0 : index
    %76 = vector.load %arg13[%c0_42, %c0_43, %c0_44] : memref<1x64x128xf32, #tpu.memory_space<vmem>>, vector<1x64x128xf32>
    %77 = vector.shape_cast %76 : vector<1x64x128xf32> to vector<64x128xf32>
    %78 = vector.shape_cast %75 : vector<64x128xf32> to vector<1x64x128xf32>
    tpu.vector_store %arg13[%c0_42, %c0_43, %c0_44], %78 {strides = array<i32>} : memref<1x64x128xf32, #tpu.memory_space<vmem>>, vector<1x64x128xf32>,
    %cst_45 = arith.constant dense<0.000000e+00> : vector<64xf32>
    %79 = vector.multi_reduction <add>, %75, %cst_45 [1] : vector<64x128xf32> to vector<64xf32>
    %80 = vector.shape_cast %79 : vector<64xf32> to vector<64x1xf32>
    %81 = arith.mulf %75, %75 : vector<64x128xf32>
    %cst_46 = arith.constant dense<0.000000e+00> : vector<64xf32>
    %82 = vector.multi_reduction <add>, %81, %cst_46 [1] : vector<64x128xf32> to vector<64xf32>
    %83 = vector.shape_cast %82 : vector<64xf32> to vector<64x1xf32>
    %c0_47 = arith.constant 0 : index
    %c0_48 = arith.constant 0 : index
    %c0_49 = arith.constant 0 : index
    %84 = vector.load %arg14[%c0_47, %c0_48, %c0_49] : memref<1x64x1xf32, #tpu.memory_space<vmem>>, vector<1x64x1xf32>
    %85 = vector.shape_cast %84 : vector<1x64x1xf32> to vector<64x1xf32>
    %86 = vector.shape_cast %80 : vector<64x1xf32> to vector<1x64x1xf32>
    tpu.vector_store %arg14[%c0_47, %c0_48, %c0_49], %86 {strides = array<i32>} : memref<1x64x1xf32, #tpu.memory_space<vmem>>, vector<1x64x1xf32>,
    %c0_50 = arith.constant 0 : index
    %c0_51 = arith.constant 0 : index
    %c0_52 = arith.constant 0 : index
    %87 = vector.load %arg15[%c0_50, %c0_51, %c0_52] : memref<1x64x1xf32, #tpu.memory_space<vmem>>, vector<1x64x1xf32>
    %88 = vector.shape_cast %87 : vector<1x64x1xf32> to vector<64x1xf32>
    %89 = vector.shape_cast %83 : vector<64x1xf32> to vector<1x64x1xf32>
    tpu.vector_store %arg15[%c0_50, %c0_51, %c0_52], %89 {strides = array<i32>} : memref<1x64x1xf32, #tpu.memory_space<vmem>>, vector<1x64x1xf32>,
    return
  }
  func.func @transform_0(%arg0: i32) -> (i32, i32, i32) {
    %c0_i32 = arith.constant 0 : i32
    %c0_i32_0 = arith.constant 0 : i32
    %c0_i32_1 = arith.constant 0 : i32
    return %arg0, %c0_i32, %c0_i32_0 : i32, i32, i32
  }
  func.func @transform_1(%arg0: i32) -> (i32, i32, i32) {
    %c0_i32 = arith.constant 0 : i32
    %c0_i32_0 = arith.constant 0 : i32
    %c0_i32_1 = arith.constant 0 : i32
    %c0_i32_2 = arith.constant 0 : i32
    return %c0_i32, %c0_i32_0, %c0_i32_1 : i32, i32, i32
  }
  func.func @transform_2(%arg0: i32) -> (i32, i32, i32) {
    %c0_i32 = arith.constant 0 : i32
    %c0_i32_0 = arith.constant 0 : i32
    %c0_i32_1 = arith.constant 0 : i32
    %c0_i32_2 = arith.constant 0 : i32
    return %c0_i32, %c0_i32_0, %c0_i32_1 : i32, i32, i32
  }
  func.func @transform_3(%arg0: i32) -> (i32, i32) {
    %c0_i32 = arith.constant 0 : i32
    %c0_i32_0 = arith.constant 0 : i32
    %c0_i32_1 = arith.constant 0 : i32
    return %c0_i32, %c0_i32_0 : i32, i32
  }
  func.func @transform_4(%arg0: i32) -> (i32, i32) {
    %c0_i32 = arith.constant 0 : i32
    %c0_i32_0 = arith.constant 0 : i32
    %c0_i32_1 = arith.constant 0 : i32
    return %c0_i32, %c0_i32_0 : i32, i32
  }
  func.func @transform_5(%arg0: i32) -> (i32, i32, i32) {
    %c0_i32 = arith.constant 0 : i32
    %c0_i32_0 = arith.constant 0 : i32
    %c0_i32_1 = arith.constant 0 : i32
    return %arg0, %c0_i32, %c0_i32_0 : i32, i32, i32
  }
  func.func @transform_6(%arg0: i32) -> (i32, i32) {
    %c0_i32 = arith.constant 0 : i32
    %c0_i32_0 = arith.constant 0 : i32
    %c0_i32_1 = arith.constant 0 : i32
    return %c0_i32, %c0_i32_0 : i32, i32
  }
  func.func @transform_7(%arg0: i32) -> (i32, i32) {
    %c0_i32 = arith.constant 0 : i32
    %c0_i32_0 = arith.constant 0 : i32
    %c0_i32_1 = arith.constant 0 : i32
    return %c0_i32, %c0_i32_0 : i32, i32
  }
  func.func @transform_8(%arg0: i32) -> (i32, i32) {
    %c0_i32 = arith.constant 0 : i32
    %c0_i32_0 = arith.constant 0 : i32
    %c0_i32_1 = arith.constant 0 : i32
    return %c0_i32, %c0_i32_0 : i32, i32
  }
  func.func @transform_9(%arg0: i32) -> (i32, i32) {
    %c0_i32 = arith.constant 0 : i32
    %c0_i32_0 = arith.constant 0 : i32
    %c0_i32_1 = arith.constant 0 : i32
    return %c0_i32, %c0_i32_0 : i32, i32
  }
  func.func @transform_10(%arg0: i32) -> (i32, i32) {
    %c0_i32 = arith.constant 0 : i32
    %c0_i32_0 = arith.constant 0 : i32
    %c0_i32_1 = arith.constant 0 : i32
    return %c0_i32, %c0_i32_0 : i32, i32
  }
  func.func @transform_11(%arg0: i32) -> (i32, i32, i32) {
    %c0_i32 = arith.constant 0 : i32
    %c0_i32_0 = arith.constant 0 : i32
    %c0_i32_1 = arith.constant 0 : i32
    return %arg0, %c0_i32, %c0_i32_0 : i32, i32, i32
  }
  func.func @transform_12(%arg0: i32) -> (i32, i32, i32) {
    %c0_i32 = arith.constant 0 : i32
    %c0_i32_0 = arith.constant 0 : i32
    %c0_i32_1 = arith.constant 0 : i32
    return %arg0, %c0_i32, %c0_i32_0 : i32, i32, i32
  }
  func.func @transform_13(%arg0: i32) -> (i32, i32, i32) {
    %c0_i32 = arith.constant 0 : i32
    %c0_i32_0 = arith.constant 0 : i32
    %c0_i32_1 = arith.constant 0 : i32
    return %arg0, %c0_i32, %c0_i32_0 : i32, i32, i32
  }
  func.func @transform_14(%arg0: i32) -> (i32, i32, i32) {
    %c0_i32 = arith.constant 0 : i32
    %c0_i32_0 = arith.constant 0 : i32
    %c0_i32_1 = arith.constant 0 : i32
    return %arg0, %c0_i32, %c0_i32_0 : i32, i32, i32
  }
}

module attributes {stable_mosaic.version = 11 : i64} {
  func.func @bn_res_concat_kernel(%arg0: i32, %arg1: memref<1x64x128xf32, #tpu.memory_space<vmem>>, %arg2: memref<2x64x1xf32, #tpu.memory_space<vmem>>, %arg3: memref<2x64x1xf32, #tpu.memory_space<vmem>>, %arg4: memref<64x1xf32, #tpu.memory_space<vmem>>, %arg5: memref<64x1xf32, #tpu.memory_space<vmem>>, %arg6: memref<1x64x128xf32, #tpu.memory_space<vmem>>, %arg7: memref<1x128x128xf32, #tpu.memory_space<vmem>>) attributes {dimension_semantics = [#tpu.dimension_semantics<parallel>], iteration_bounds = array<i64: 2>, scalar_prefetch = 0 : i64, scratch_operands = 0 : i64, tpu.core_type = #tpu.core_type<tc>, window_params = [{transform_indices = @transform_0, window_bounds = array<i64: 1, 64, 128>}, {pipeline_mode = #tpu.pipeline_mode<synchronous>, transform_indices = @transform_1, window_bounds = array<i64: 2, 64, 1>}, {pipeline_mode = #tpu.pipeline_mode<synchronous>, transform_indices = @transform_2, window_bounds = array<i64: 2, 64, 1>}, {pipeline_mode = #tpu.pipeline_mode<synchronous>, transform_indices = @transform_3, window_bounds = array<i64: 64, 1>}, {pipeline_mode = #tpu.pipeline_mode<synchronous>, transform_indices = @transform_4, window_bounds = array<i64: 64, 1>}, {transform_indices = @transform_5, window_bounds = array<i64: 1, 64, 128>}, {transform_indices = @transform_6, window_bounds = array<i64: 1, 128, 128>}]} {
    %c0 = arith.constant 0 : index
    %c0_0 = arith.constant 0 : index
    %c0_1 = arith.constant 0 : index
    %0 = vector.load %arg1[%c0, %c0_0, %c0_1] : memref<1x64x128xf32, #tpu.memory_space<vmem>>, vector<1x64x128xf32>
    %1 = vector.shape_cast %0 : vector<1x64x128xf32> to vector<64x128xf32>
    %c0_2 = arith.constant 0 : index
    %c0_3 = arith.constant 0 : index
    %c0_4 = arith.constant 0 : index
    %2 = vector.load %arg2[%c0_2, %c0_3, %c0_4] : memref<2x64x1xf32, #tpu.memory_space<vmem>>, vector<2x64x1xf32>
    %c0_5 = arith.constant 0 : index
    %c0_6 = arith.constant 0 : index
    %c0_7 = arith.constant 0 : index
    %3 = vector.load %arg3[%c0_5, %c0_6, %c0_7] : memref<2x64x1xf32, #tpu.memory_space<vmem>>, vector<2x64x1xf32>
    %cst = arith.constant dense<0.000000e+00> : vector<64x1xf32>
    %4 = vector.multi_reduction <add>, %2, %cst [0] : vector<2x64x1xf32> to vector<64x1xf32>
    %cst_8 = arith.constant 2.560000e+02 : f32
    %5 = vector.broadcast %cst_8 : f32 to vector<64x1xf32>
    %6 = arith.divf %4, %5 : vector<64x1xf32>
    %cst_9 = arith.constant dense<0.000000e+00> : vector<64x1xf32>
    %7 = vector.multi_reduction <add>, %3, %cst_9 [0] : vector<2x64x1xf32> to vector<64x1xf32>
    %cst_10 = arith.constant 2.560000e+02 : f32
    %8 = vector.broadcast %cst_10 : f32 to vector<64x1xf32>
    %9 = arith.divf %7, %8 : vector<64x1xf32>
    %10 = arith.mulf %6, %6 : vector<64x1xf32>
    %11 = arith.subf %9, %10 : vector<64x1xf32>
    %cst_11 = arith.constant 9.99999974E-6 : f32
    %12 = vector.broadcast %cst_11 : f32 to vector<64x1xf32>
    %13 = arith.addf %11, %12 : vector<64x1xf32>
    %14 = math.rsqrt %13 : vector<64x1xf32>
    %c0_12 = arith.constant 0 : index
    %c0_13 = arith.constant 0 : index
    %c0_14 = arith.constant 0 : index
    %15 = vector.load %arg6[%c0_12, %c0_13, %c0_14] : memref<1x64x128xf32, #tpu.memory_space<vmem>>, vector<1x64x128xf32>
    %16 = vector.shape_cast %15 : vector<1x64x128xf32> to vector<64x128xf32>
    %17 = vector.broadcast %6 : vector<64x1xf32> to vector<64x128xf32>
    %18 = arith.subf %1, %17 : vector<64x128xf32>
    %19 = vector.broadcast %14 : vector<64x1xf32> to vector<64x128xf32>
    %20 = arith.mulf %18, %19 : vector<64x128xf32>
    %c0_15 = arith.constant 0 : index
    %c0_16 = arith.constant 0 : index
    %21 = vector.load %arg4[%c0_15, %c0_16] : memref<64x1xf32, #tpu.memory_space<vmem>>, vector<64x1xf32>
    %22 = vector.broadcast %21 : vector<64x1xf32> to vector<64x128xf32>
    %23 = arith.mulf %20, %22 : vector<64x128xf32>
    %c0_17 = arith.constant 0 : index
    %c0_18 = arith.constant 0 : index
    %24 = vector.load %arg5[%c0_17, %c0_18] : memref<64x1xf32, #tpu.memory_space<vmem>>, vector<64x1xf32>
    %25 = vector.broadcast %24 : vector<64x1xf32> to vector<64x128xf32>
    %26 = arith.addf %23, %25 : vector<64x128xf32>
    %cst_19 = arith.constant 0.000000e+00 : f32
    %27 = vector.broadcast %cst_19 : f32 to vector<64x128xf32>
    %28 = arith.maximumf %26, %27 : vector<64x128xf32>
    %29 = arith.addf %16, %28 : vector<64x128xf32>
    %30 = tpu.concatenate %16, %29 in 0 : vector<64x128xf32>, vector<64x128xf32> -> vector<128x128xf32>
    %c0_20 = arith.constant 0 : index
    %c0_21 = arith.constant 0 : index
    %c0_22 = arith.constant 0 : index
    %31 = vector.load %arg7[%c0_20, %c0_21, %c0_22] : memref<1x128x128xf32, #tpu.memory_space<vmem>>, vector<1x128x128xf32>
    %32 = vector.shape_cast %31 : vector<1x128x128xf32> to vector<128x128xf32>
    %33 = vector.shape_cast %30 : vector<128x128xf32> to vector<1x128x128xf32>
    tpu.vector_store %arg7[%c0_20, %c0_21, %c0_22], %33 {strides = array<i32>} : memref<1x128x128xf32, #tpu.memory_space<vmem>>, vector<1x128x128xf32>,
    return
  }
  func.func @transform_0(%arg0: i32) -> (i32, i32, i32) {
    %c0_i32 = arith.constant 0 : i32
    %c0_i32_0 = arith.constant 0 : i32
    %c0_i32_1 = arith.constant 0 : i32
    return %arg0, %c0_i32, %c0_i32_0 : i32, i32, i32
  }
  func.func @transform_1(%arg0: i32) -> (i32, i32, i32) {
    %c0_i32 = arith.constant 0 : i32
    %c0_i32_0 = arith.constant 0 : i32
    %c0_i32_1 = arith.constant 0 : i32
    %c0_i32_2 = arith.constant 0 : i32
    return %c0_i32, %c0_i32_0, %c0_i32_1 : i32, i32, i32
  }
  func.func @transform_2(%arg0: i32) -> (i32, i32, i32) {
    %c0_i32 = arith.constant 0 : i32
    %c0_i32_0 = arith.constant 0 : i32
    %c0_i32_1 = arith.constant 0 : i32
    %c0_i32_2 = arith.constant 0 : i32
    return %c0_i32, %c0_i32_0, %c0_i32_1 : i32, i32, i32
  }
  func.func @transform_3(%arg0: i32) -> (i32, i32) {
    %c0_i32 = arith.constant 0 : i32
    %c0_i32_0 = arith.constant 0 : i32
    %c0_i32_1 = arith.constant 0 : i32
    return %c0_i32, %c0_i32_0 : i32, i32
  }
  func.func @transform_4(%arg0: i32) -> (i32, i32) {
    %c0_i32 = arith.constant 0 : i32
    %c0_i32_0 = arith.constant 0 : i32
    %c0_i32_1 = arith.constant 0 : i32
    return %c0_i32, %c0_i32_0 : i32, i32
  }
  func.func @transform_5(%arg0: i32) -> (i32, i32, i32) {
    %c0_i32 = arith.constant 0 : i32
    %c0_i32_0 = arith.constant 0 : i32
    %c0_i32_1 = arith.constant 0 : i32
    return %arg0, %c0_i32, %c0_i32_0 : i32, i32, i32
  }
  func.func @transform_6(%arg0: i32) -> (i32, i32, i32) {
    %c0_i32 = arith.constant 0 : i32
    %c0_i32_0 = arith.constant 0 : i32
    %c0_i32_1 = arith.constant 0 : i32
    return %arg0, %c0_i32, %c0_i32_0 : i32, i32, i32
  }
}

</mosaic_0001>

<bundles_post_ra>
// kernel: stacked_attention.5
= control target key start
LH: loop header
LB: loop body
LE: loop exit
PB: predicated region body
PF: predicated region fallthrough
CT: control target
= control target key end

     0   :  { %10 = vsyncpa [#allocation3], 0  ;;  %s891_s0 = inlined_call_operand.hbm [shape: f32[2,64,128], index: 0, kind: input, shape index: {}]   ;;  %s892_s1 = inlined_call_operand.hbm [shape: f32[64,64], index: 1, kind: input, shape index: {}]   ;;  %s893_s2 = inlined_call_operand.vmem [shape: f32[2,64,128], index: 2, kind: output, shape index: {0}]   ;;  %s894_s3 = inlined_call_operand.vmem [shape: f32[2,64,1], index: 3, kind: output, shape index: {1}]   ;;  %s895_s4 = inlined_call_operand.vmem [shape: f32[2,64,1], index: 4, kind: output, shape index: {2}]  }
   0x1   :  { %12 = vsyncpa [#allocation3 + $0x1], 0 }
   0x2   :  { %13 = vsyncpa [#allocation5], 0  ;;  %s755_s15 = smov 0   ;;  %s757_s16 = smov 0  }
   0x3   :  { %s759_s17 = smov 0   ;;  %s761_s18 = smov 0  }
   0x4 LB: > { %s774_s19 = sadd.s32 4294967295, %s725_s18   ;;  %p39_p0 = scmp.ne.s32.totalorder %s717_s16, %s713_s15  ;;  %s725_s18 = sphi %s761_s18, %s902_s18   ;;  %s721_s17 = sphi %s759_s17, %s901_s17   ;;  %s717_s16 = sphi %s757_s16, %s900_s16   ;;  %s713_s15 = sphi %s755_s15, %s899_s15  }
   0x5   : > { %p40_p1 = scmp.eq.s32.totalorder %s774_s19, 0  ;;  %p538_p2 = scmp.ge.s32.totalorder %s725_s18, 1 }
   0x6   : > { %p149_p3 = scmp.lt.s32.totalorder %s725_s18, 3  ;;  %s160_s23 = sshll.u32 %s892_s1, 4  ;;  %s161_s23 = int_to_ptr.hbm [resolvable:$true] %s160_s23 }
   0x7   : > { %p782_p4 = por %p40_p1, %p39_p0  ;;  %s727_s25 = smov [#allocation4]  }
   0x8   : > { %p789_p5 = pnand %p538_p2, %p149_p3  ;;  %s162_s26 = sshll.u32 %s727_s25, 4  ;;  %s163_s26 = int_to_ptr.vmem [resolvable:$true] %s162_s26 }
   0x9   : > { %s798_s27 = sadd.s32 1, %s725_s18   ;;  %s728_s28 = smov 128  }
   0xa   : > { %p581_p6 = pneg %p789_p5  ;;  %s729_s29 = smov 8  }
   0xb   : > { %s23_s30 = ssub.s32 %s725_s18, %s798_s27  ;;  %s26_s5 = sadd.s32 1, %s721_s17 }
   0xc   : > { %p582_p7 = pnand %p581_p6, %p40_p1  ;;  %p24_p8 = scmp.eq.s32.totalorder %s23_s30, 0 }
   0xd   : > { %p33_p9 = scmp.ne.s32.totalorder %s721_s17, %s717_s16  ;;  %p34_p10 = scmp.eq.s32.totalorder %s725_s18, 0 }
   0xe   : > { %584 = dma.hbm_to_vmem [thread:$0]  (!%p582_p7), %s161_s23, 1024, %s163_s26, [#allocation5], %s728_s28, %s728_s28, %s729_s29  }
   0xf   : > { %p590_p11 = scmp.lt.s32.totalorder %s725_s18, 2  ;;  %p35_p12 = por %p34_p10, %p33_p9 }
  0x10   : > { %s811_s6 = scalar_select %p24_p8, %s721_s17, %s26_s5  }
  0x11   : > { %s176_s7 = sand.u32 1, %s721_s17   ;;  %s559_s9 = sshll.u32 %s725_s18, 6 }
  0x12   : > { %s541_s8 = sshll.u32 %s176_s7, 6  ;;  %s185_s12 = scalar_lea.hbm %s891_s0, %s559_s9 }
  0x13   : > { %s180_s13 = scalar_lea.vmem [#allocation2], %s541_s8  ;;  %s186_s15 = sshll.u32 %s185_s12, 4  ;;  %s187_s15 = int_to_ptr.hbm [resolvable:$true] %s186_s15 }
  0x14   : > { %s188_s14 = sshll.u32 %s180_s13, 4  ;;  %p818_p13 = pnand %p590_p11, %p35_p12  ;;  %s189_s14 = int_to_ptr.vmem [resolvable:$true] %s188_s14 }
  0x15   : > { %s177_s22 = scalar_lea.sflag [#allocation3], %s176_s7  ;;  %s657_s23 = sshra.s32 %s187_s15, 4  ;;  %s658_s23 = int_to_ptr.hbm [resolvable:$true] %s657_s23 }
  0x16   : > { %s659_s25 = scalar_lea.hbm %s658_s23, 64  ;;  %p661_p2 = pneg %p818_p13 }
  0x17   : > { %p660_p0 = scmp.ne.s32.totalorder %s658_s23, %s659_s25  ;;  %s664_s30 = scalar_lea.hbm %s891_s0, 128 }
  0x18   : > { %p665_p7 = scmp.lt.s32.totalorder %s658_s23, %s891_s0  ;;  %p666_p8 = scmp.lt.s32.totalorder %s664_s30, %s659_s25 }
  0x19   : > { %p662_p3 = pnand %p661_p2, %p660_p0 }
  0x1a   : > { %p667_p9 = por %p666_p8, %p665_p7 }
  0x1b   : > { %p663_p6 = pneg %p662_p3 }
  0x1d   : > { %p668_p10 = pnand %p667_p9, %p663_p6 }
  0x1f   : > { %671 = shalt.err (!%p668_p10)
}
  0x20   : > { %588 = dma.hbm_to_vmem [thread:$0]  (!%p818_p13), %s187_s15, 1024, %s189_s14, %s177_s22, %s728_s28, %s728_s28, %s729_s29  }
  0x21   : > { %200 = sbr.rel (%p789_p5) target bundleno = 342 (0x156), region = 28  ;;  %s202_s7 = sand.u32 (!%p789_p5), 1, %s717_s16  }
  0x22   : > { %s545_s9 = sshll.u32 (!%p789_p5), %s202_s7, 6  ;;  %s203_s10 = scalar_lea.sflag (!%p789_p5), [#allocation3], %s202_s7 }
  0x23   : > { %s206_s11 = scalar_lea.vmem (!%p789_p5), [#allocation2], %s545_s9 }
  0x26   : > { %704 = dma.done.wait (%p782_p4), %s203_s10, 1024  }
  0x27   : > { %706 = vsyncadd (%p782_p4), %s203_s10, 4294966272 }
  0x28   : > { %708 = dma.done.wait (%p40_p1), [#allocation5], 1024  }
  0x29   : > { %710 = vsyncadd (%p40_p1), [#allocation5], 4294966272  ;;  %v277_v0 = vld [vmem:[%s206_s11 + $0x30] sm:$0xff]  ;;  %v278_v1 = vld [vmem:[%s206_s11 + $0x38] sm:$0xff]  ;;  %vm287_vm0 = vcmask 523264   ;;  %p247_p1 = scmp.lt.s32.totalorder %s774_s19, 1 }
  0x2a   : > { %v275_v2 = vld [vmem:[%s206_s11 + $0x20] sm:$0xff]  ;;  %v286_v3 = vpack.c.bf16 %v278_v1, %v277_v0  ;;  %v276_v4 = vld [vmem:[%s206_s11 + $0x28] sm:$0xff]  ;;  %v273_v6 = vld [vmem:[%s206_s11 + $0x10] sm:$0xff]  ;;  %vm377_vm1 = vcmask 7168  }
  0x2b   : > { %v285_v5 = vpack.c.bf16 %v276_v4, %v275_v2  ;;  %v274_v7 = vld [vmem:[%s206_s11 + $0x18] sm:$0xff]  ;;  %v271_v9 = vld [vmem:[%s206_s11] sm:$0xff]  ;;  %v272_v10 = vld [vmem:[%s206_s11 + $0x8] sm:$0xff]  ;;  %s904_s19 = smov (!%p247_p1, %s774_s19), 1 }
  0x2c   : > { %304 = vmatpush.bf16.msra.mxu0 %v286_v3  ;;  %563 = vmatpush.bf16.msra.mxu1 %v286_v3  ;;  %v284_v8 = vpack.c.bf16 %v274_v7, %v273_v6  ;;  %v263_v11 = vld [vmem:[#allocation4] sm:$0xff]  ;;  %v264_v12 = vld [vmem:[#allocation4 + $0x8] sm:$0xff]  ;;  %v283_v13 = vpack.c.bf16 %v272_v10, %v271_v9  ;;  %v265_v14 = vld [vmem:[#allocation4 + $0x10] sm:$0xff]  ;;  %s848_s20 = sshll.u32 %s904_s19, 6 }
  0x2d   : > { %565 = vmatpush.bf16.msra.mxu3 %v286_v3  ;;  %564 = vmatpush.bf16.msra.mxu2 %v286_v3  ;;  %v266_v15 = vld [vmem:[#allocation4 + $0x18] sm:$0xff]  ;;  %v269_v16 = vld [vmem:[#allocation4 + $0x30] sm:$0xff]  ;;  %v267_v18 = vld [vmem:[#allocation4 + $0x20] sm:$0xff]  ;;  %v279_v20 = vpack.c.bf16 %v264_v12, %v263_v11  ;;  %s251_s29 = scalar_lea.vmem %s893_s2, %s848_s20  ;;  %s256_s13 = scalar_lea.vmem %s894_s3, %s848_s20 }
  0x2e   : > { %v270_v17 = vld [vmem:[#allocation4 + $0x38] sm:$0xff]  ;;  %v268_v19 = vld [vmem:[#allocation4 + $0x28] sm:$0xff]  ;;  %v280_v21 = vpack.c.bf16 %v266_v15, %v265_v14  ;;  %s261_s21 = scalar_lea.vmem %s895_s4, %s848_s20 }
  0x2f   : > { %v282_v22 = vpack.c.bf16 %v270_v17, %v269_v16  ;;  %v281_v23 = vpack.c.bf16 %v268_v19, %v267_v18 }
  0x30   : > { %305 = vmatpush.bf16.msra.mxu0 %v285_v5  ;;  %566 = vmatpush.bf16.msra.mxu1 %v285_v5 }
  0x31   : > { %568 = vmatpush.bf16.msra.mxu3 %v285_v5  ;;  %567 = vmatpush.bf16.msra.mxu2 %v285_v5 }
  0x34   : > { %306 = vmatpush.bf16.msra.mxu0 %v284_v8  ;;  %569 = vmatpush.bf16.msra.mxu1 %v284_v8 }
  0x35   : > { %571 = vmatpush.bf16.msra.mxu3 %v284_v8  ;;  %570 = vmatpush.bf16.msra.mxu2 %v284_v8 }
  0x38   : > { %307 = vmatpush.bf16.msra.mxu0 %v283_v13  ;;  %572 = vmatpush.bf16.msra.mxu1 %v283_v13 }
  0x39   : > { %574 = vmatpush.bf16.msra.mxu3 %v283_v13  ;;  %573 = vmatpush.bf16.msra.mxu2 %v283_v13 }
  0x3b   : > { %553 = vmatmul.msk.bf16.vlgmr.msra.gmra.mxu0 %vm287_vm0, %v279_v20  ;;  %554 = vmatmul.msk.bf16.vlgmr.msra.gmra.mxu1 %vm287_vm0, %v280_v21 }
  0x3c   : > { %556 = vmatmul.msk.bf16.vlgmr.msra.gmra.mxu3 %vm287_vm0, %v282_v22  ;;  %555 = vmatmul.msk.bf16.vlgmr.msra.gmra.mxu2 %vm287_vm0, %v281_v23 }
  0xb8   : > { %v309_v24 = vpop.f32.mrf.mxu0  ;;  %v314_v25 = vpop.f32.mrf.mxu1 }
  0xb9   : > { %329 = vst [vmem:[%s251_s29] sm:$0xff] %v309_v24  ;;  %341 = vadd.xlane.f32.xlu1 %v314_v25  ;;  %337 = vadd.xlane.f32.xlu0 %v309_v24  ;;  %v353_v26 = vmul.f32 %v309_v24, %v309_v24  ;;  %v355_v27 = vmul.f32 %v314_v25, %v314_v25 }
  0xba   : > { %331 = vst [vmem:[%s251_s29 + $0x10] sm:$0xff] %v314_v25 }
  0xbb   : > { %361 = vadd.xlane.f32.xlu2 %v353_v26 }
  0xbf   : > { %v324_v28 = vpop.f32.mrf.mxu3  ;;  %v319_v29 = vpop.f32.mrf.mxu2 }
  0xc0   : > { %335 = vst [vmem:[%s251_s29 + $0x30] sm:$0xff] %v324_v28  ;;  %v311_v30 = vpop.f32.mrf.mxu0  ;;  %v316_v31 = vpop.f32.mrf.mxu1  ;;  %v357_v35 = vmul.f32 %v319_v29, %v319_v29  ;;  %v359_v38 = vmul.f32 %v324_v28, %v324_v28 }
  0xc1   : > { %330 = vst [vmem:[%s251_s29 + $0x8] sm:$0xff] %v311_v30  ;;  %365 = vadd.xlane.f32.xlu1 %v355_v27  ;;  %349 = vadd.xlane.f32.xlu0 %v324_v28  ;;  %v356_v34 = vmul.f32 %v316_v31, %v316_v31  ;;  %v354_v37 = vmul.f32 %v311_v30, %v311_v30 }
  0xc2   : > { %332 = vst [vmem:[%s251_s29 + $0x18] sm:$0xff] %v316_v31 }
  0xc3   : > { %333 = vst [vmem:[%s251_s29 + $0x20] sm:$0xff] %v319_v29  ;;  %345 = vadd.xlane.f32.xlu2 %v319_v29 }
  0xc7   : > { %v326_v32 = vpop.f32.mrf.mxu3  ;;  %v321_v33 = vpop.f32.mrf.mxu2 }
  0xc8   : > { %336 = vst [vmem:[%s251_s29 + $0x38] sm:$0xff] %v326_v32  ;;  %v358_v36 = vmul.f32 %v321_v33, %v321_v33  ;;  %v360_v39 = vmul.f32 %v326_v32, %v326_v32 }
  0xc9   : > { %334 = vst [vmem:[%s251_s29 + $0x28] sm:$0xff] %v321_v33  ;;  %343 = vadd.xlane.f32.xlu1 %v316_v31  ;;  %339 = vadd.xlane.f32.xlu0 %v311_v30 }
  0xcb   : > { %367 = vadd.xlane.f32.xlu2 %v356_v34 }
  0xd1   : > { %351 = vadd.xlane.f32.xlu1 %v326_v32  ;;  %369 = vadd.xlane.f32.xlu0 %v357_v35 }
  0xd3   : > { %347 = vadd.xlane.f32.xlu2 %v321_v33 }
  0xd9   : > { %371 = vadd.xlane.f32.xlu1 %v358_v36  ;;  %363 = vadd.xlane.f32.xlu0 %v354_v37 }
  0xdb   : > { %373 = vadd.xlane.f32.xlu2 %v359_v38 }
  0xe1   : > { %375 = vadd.xlane.f32.xlu0 %v360_v39 }
 0x12c   : > { %v342_v40 = vpop.xlane.xlu1 %341  ;;  %v338_v41 = vpop.xlane.xlu0 %337 }
 0x12d   : > { %380 = vst.msk [vmem:[%s256_s13 + $0x10] sm:$0xff] %vm377_vm1, %v342_v40 }
 0x12e   : > { %378 = vst.msk [vmem:[%s256_s13] sm:$0xff] %vm377_vm1, %v338_v41  ;;  %v362_v42 = vpop.xlane.xlu2 %361 }
 0x12f   : > { %386 = vst.msk [vmem:[%s261_s21] sm:$0xff] %vm377_vm1, %v362_v42 }
 0x134   : > { %v366_v43 = vpop.xlane.xlu1 %365  ;;  %v350_v44 = vpop.xlane.xlu0 %349 }
 0x135   : > { %388 = vst.msk [vmem:[%s261_s21 + $0x10] sm:$0xff] %vm377_vm1, %v366_v43 }
 0x136   : > { %384 = vst.msk [vmem:[%s256_s13 + $0x30] sm:$0xff] %vm377_vm1, %v350_v44  ;;  %v346_v45 = vpop.xlane.xlu2 %345 }
 0x137   : > { %382 = vst.msk [vmem:[%s256_s13 + $0x20] sm:$0xff] %vm377_vm1, %v346_v45 }
 0x13c   : > { %v344_v46 = vpop.xlane.xlu1 %343  ;;  %v340_v47 = vpop.xlane.xlu0 %339 }
 0x13d   : > { %381 = vst.msk [vmem:[%s256_s13 + $0x18] sm:$0xff] %vm377_vm1, %v344_v46 }
 0x13e   : > { %379 = vst.msk [vmem:[%s256_s13 + $0x8] sm:$0xff] %vm377_vm1, %v340_v47  ;;  %v368_v48 = vpop.xlane.xlu2 %367 }
 0x13f   : > { %389 = vst.msk [vmem:[%s261_s21 + $0x18] sm:$0xff] %vm377_vm1, %v368_v48 }
 0x144   : > { %v352_v49 = vpop.xlane.xlu1 %351  ;;  %v370_v50 = vpop.xlane.xlu0 %369 }
 0x145   : > { %385 = vst.msk [vmem:[%s256_s13 + $0x38] sm:$0xff] %vm377_vm1, %v352_v49 }
 0x146   : > { %390 = vst.msk [vmem:[%s261_s21 + $0x20] sm:$0xff] %vm377_vm1, %v370_v50  ;;  %v348_v51 = vpop.xlane.xlu2 %347 }
 0x147   : > { %383 = vst.msk [vmem:[%s256_s13 + $0x28] sm:$0xff] %vm377_vm1, %v348_v51 }
 0x14c   : > { %v372_v52 = vpop.xlane.xlu1 %371  ;;  %v364_v53 = vpop.xlane.xlu0 %363 }
 0x14d   : > { %391 = vst.msk [vmem:[%s261_s21 + $0x28] sm:$0xff] %vm377_vm1, %v372_v52 }
 0x14e   : > { %387 = vst.msk [vmem:[%s261_s21 + $0x8] sm:$0xff] %vm377_vm1, %v364_v53  ;;  %v374_v54 = vpop.xlane.xlu2 %373 }
 0x14f   : > { %392 = vst.msk [vmem:[%s261_s21 + $0x30] sm:$0xff] %vm377_vm1, %v374_v54 }
 0x154   : > { %v376_v55 = vpop.xlane.xlu0 %375 }
 0x155   : > { %393 = vst.msk [vmem:[%s261_s21 + $0x38] sm:$0xff] %vm377_vm1, %v376_v55 }
 0x156 PF: > { %p16_p4 = scmp.ge.s32.totalorder %s798_s27, 4   ;;  %s899_s15 = smov %s717_s16 }
 0x157   : > { %s900_s16 = smov %s721_s17  ;;  %s901_s17 = smov %s811_s6 }
 0x158   : > { %s902_s18 = smov %s798_s27  ;;  %18 = sbr.rel (!%p16_p4) target bundleno = 4 (0x4), region = 96 }
 0x15d   :  { %447 = vsyncpa [#allocation3], 1 }
 0x15e   :  { %449 = vsyncpa [#allocation3 + $0x1], 1 }
 0x15f   :  { %450 = vsyncpa [#allocation5], 1 }

// kernel: stacked_attention.6
= control target key start
LH: loop header
LB: loop body
LE: loop exit
PB: predicated region body
PF: predicated region fallthrough
CT: control target
= control target key end

     0   :  { %s1128_s27 = smov 0   ;;  %s1492_s0 = inlined_call_operand.vmem [shape: f32[2,64,128], index: 0, kind: input, shape index: {}]   ;;  %s1493_s1 = inlined_call_operand.vmem [shape: f32[2,64,1], index: 1, kind: input, shape index: {}]   ;;  %s1494_s2 = inlined_call_operand.vmem [shape: f32[2,64,1], index: 2, kind: input, shape index: {}]   ;;  %s1495_s3 = inlined_call_operand.vmem [shape: f32[64,1], index: 3, kind: input, shape index: {}]   ;;  %s1496_s4 = inlined_call_operand.vmem [shape: f32[64,1], index: 4, kind: input, shape index: {}]   ;;  %s1497_s5 = inlined_call_operand.vmem [shape: f32[64,64], index: 5, kind: input, shape index: {}]   ;;  %s1498_s6 = inlined_call_operand.vmem [shape: f32[2,64,128], index: 6, kind: output, shape index: {0}]   ;;  %s1499_s7 = inlined_call_operand.vmem [shape: f32[2,64,1], index: 7, kind: output, shape index: {1}]   ;;  %s1500_s8 = inlined_call_operand.vmem [shape: f32[2,64,1], index: 8, kind: output, shape index: {2}]  }
   0x1 LB: > { %s1007_s28 = sadd.s32 4294967295, %s1079_s27   ;;  %p1011_p0 = scmp.ge.s32.totalorder %s1079_s27, 1  ;;  %s1079_s27 = sphi %s1128_s27, %s19_s27  }
   0x2   : > { %p267_p1 = scmp.lt.s32.totalorder %s1079_s27, 3 }
   0x4   : > { %p268_p2 = pnand %p1011_p0, %p267_p1 }
   0x5   : > { %p311_p3 = scmp.lt.s32.totalorder (!%p268_p2), %s1007_s28, 1 }
   0x6   : > { %271 = sbr.rel (%p268_p2) target bundleno = 517 (0x205), region = 44 }
   0xb   : > { %v651_v0 = vld [vmem:[%s1495_s3 + $0x38] sm:$0xff]  ;;  %v1081_v2 = vmov 0   ;;  %v650_v3 = vld [vmem:[%s1495_s3 + $0x30] sm:$0xff]  ;;  %v1082_v6 = vmov 256.0   ;;  %vm372_vm0 = vcmask 7168   ;;  %v344_v9 = vld [vmem:[%s1493_s1 + $0x20] sm:$0xff] }
   0xc   : > { %v707_v1 = vld [vmem:[%s1496_s4 + $0x38] sm:$0xff]  ;;  %1053 = vset.pattern.permute.xlu1 %v1081_v2  ;;  %1054 = vset.pattern.permute.xlu2 %v1081_v2  ;;  %v346_v4 = vld [vmem:[%s1493_s1 + $0x30] sm:$0xff]  ;;  %1055 = vrcp.f32 %v1082_v6  ;;  %v352_v10 = vld [vmem:[%s1493_s1 + $0x60] sm:$0xff]  ;;  %v385_v20 = vsel %vm372_vm0, %v344_v9, 0.0  ;;  %s1506_s28 = smov (!%p311_p3, %s1007_s28), 1 }
   0xd   : > { %v354_v5 = vld [vmem:[%s1493_s1 + $0x70] sm:$0xff]  ;;  %689 = vperm.xlu1 %1053, %v651_v0   ;;  %1052 = vset.pattern.permute.xlu0 %v1081_v2  ;;  %v360_v11 = vld [vmem:[%s1494_s2 + $0x20] sm:$0xff]  ;;  %v343_v13 = vld [vmem:[%s1493_s1 + $0x18] sm:$0xff]  ;;  %v391_v16 = vsel %vm372_vm0, %v346_v4, 0.0  ;;  %v386_v21 = vsel %vm372_vm0, %v352_v10, 0.0  ;;  %s1421_s23 = sshll.u32 %s1506_s28, 6 }
   0xe   : > { %v362_v7 = vld [vmem:[%s1494_s2 + $0x30] sm:$0xff]  ;;  %745 = vperm.xlu2 %1054, %v707_v1   ;;  %684 = vperm.xlu0 %1052, %v650_v3   ;;  %v368_v12 = vld [vmem:[%s1494_s2 + $0x60] sm:$0xff]  ;;  %v351_v14 = vld [vmem:[%s1493_s1 + $0x58] sm:$0xff]  ;;  %v392_v17 = vsel %vm372_vm0, %v354_v5, 0.0  ;;  %v424_v22 = vsel %vm372_vm0, %v360_v11, 0.0  ;;  %v382_v27 = vsel %vm372_vm0, %v343_v13, 0.0  ;;  %v387_v38 = vadd.f32 %v386_v21, %v385_v20  ;;  %s1427_s26 = scalar_lea.vmem %s1492_s0, %s1421_s23  ;;  %s320_s25 = scalar_lea.vmem %s1498_s6, %s1421_s23 }
   0xf   : > { %v370_v8 = vld [vmem:[%s1494_s2 + $0x70] sm:$0xff]  ;;  %v430_v18 = vsel %vm372_vm0, %v362_v7, 0.0  ;;  %v425_v23 = vsel %vm372_vm0, %v368_v12, 0.0  ;;  %v359_v24 = vld [vmem:[%s1494_s2 + $0x18] sm:$0xff]  ;;  %v383_v28 = vsel %vm372_vm0, %v351_v14, 0.0  ;;  %v393_v32 = vadd.f32 %v392_v17, %v391_v16  ;;  %v345_v36 = vld [vmem:[%s1493_s1 + $0x28] sm:$0xff]  ;;  %s325_s29 = scalar_lea.vmem %s1499_s7, %s1421_s23  ;;  %s330_s10 = scalar_lea.vmem %s1500_s8, %s1421_s23 }
  0x10   : > { %v706_v15 = vld [vmem:[%s1496_s4 + $0x30] sm:$0xff]  ;;  %v431_v19 = vsel %vm372_vm0, %v370_v8, 0.0  ;;  %v367_v25 = vld [vmem:[%s1494_s2 + $0x58] sm:$0xff]  ;;  %v353_v37 = vld [vmem:[%s1493_s1 + $0x68] sm:$0xff]  ;;  %v426_v39 = vadd.f32 %v425_v23, %v424_v22  ;;  %v421_v40 = vsel %vm372_vm0, %v359_v24, 0.0  ;;  %v384_v46 = vadd.f32 %v383_v28, %v382_v27 }
  0x11   : > { %v347_v29 = vld [vmem:[%s1493_s1 + $0x38] sm:$0xff]  ;;  %v432_v34 = vadd.f32 %v431_v19, %v430_v18  ;;  %v422_v41 = vsel %vm372_vm0, %v367_v25, 0.0  ;;  %v361_v42 = vld [vmem:[%s1494_s2 + $0x28] sm:$0xff]  ;;  %v342_v44 = vld [vmem:[%s1493_s1 + $0x10] sm:$0xff]  ;;  %v388_v54 = vsel %vm372_vm0, %v345_v36, 0.0  ;;  %v389_v56 = vsel %vm372_vm0, %v353_v37, 0.0 }
  0x12   : > { %v1056_v26 = vpop.eup %1055  ;;  %v355_v30 = vld [vmem:[%s1493_s1 + $0x78] sm:$0xff]  ;;  %v369_v43 = vld [vmem:[%s1494_s2 + $0x68] sm:$0xff]  ;;  %v394_v47 = vsel %vm372_vm0, %v347_v29, 0.0  ;;  %v350_v49 = vld [vmem:[%s1493_s1 + $0x50] sm:$0xff]  ;;  %v427_v57 = vsel %vm372_vm0, %v361_v42, 0.0  ;;  %v379_v59 = vsel %vm372_vm0, %v342_v44, 0.0  ;;  %v423_v0 = vadd.f32 %v422_v41, %v421_v40 }
  0x13   : > { %v363_v31 = vld [vmem:[%s1494_s2 + $0x38] sm:$0xff]  ;;  %v398_v33 = vmul.f32 256.0, %v1056_v26  ;;  %v395_v48 = vsel %vm372_vm0, %v355_v30, 0.0  ;;  %v358_v50 = vld [vmem:[%s1494_s2 + $0x10] sm:$0xff]  ;;  %vm402_vm1 = vweird.f32 %v1056_v26  ;;  %v428_v58 = vsel %vm372_vm0, %v369_v43, 0.0  ;;  %v340_v3 = vld [vmem:[%s1493_s1] sm:$0xff] }
  0x14   : > { %v371_v35 = vld [vmem:[%s1494_s2 + $0x78] sm:$0xff]  ;;  %v366_v51 = vld [vmem:[%s1494_s2 + $0x50] sm:$0xff]  ;;  %v433_v52 = vsel %vm372_vm0, %v363_v31, 0.0  ;;  %v380_v60 = vsel %vm372_vm0, %v350_v49, 0.0  ;;  %v418_v61 = vsel %vm372_vm0, %v358_v50, 0.0  ;;  %v396_v1 = vadd.f32 %v395_v48, %v394_v47  ;;  %v348_v4 = vld [vmem:[%s1493_s1 + $0x40] sm:$0xff] }
  0x15   : > { %740 = vperm.xlu1 %1053, %v706_v15   ;;  %v399_v45 = vsub.f32 1.0, %v398_v33  ;;  %v434_v53 = vsel %vm372_vm0, %v371_v35, 0.0  ;;  %v419_v62 = vsel %vm372_vm0, %v366_v51, 0.0  ;;  %v390_v5 = vadd.f32 %v389_v56, %v388_v54  ;;  %v356_v24 = vld [vmem:[%s1494_s2] sm:$0xff]  ;;  %v349_v47 = vld [vmem:[%s1493_s1 + $0x48] sm:$0xff] }
  0x16   : > { %v435_v2 = vadd.f32 %v434_v53, %v433_v52  ;;  %v429_v6 = vadd.f32 %v428_v58, %v427_v57  ;;  %v373_v7 = vsel %vm372_vm0, %v340_v3, 0.0  ;;  %v374_v8 = vsel %vm372_vm0, %v348_v4, 0.0  ;;  %v364_v29 = vld [vmem:[%s1494_s2 + $0x40] sm:$0xff]  ;;  %v357_v53 = vld [vmem:[%s1494_s2 + $0x8] sm:$0xff] }
  0x17   : > { %v400_v55 = vmul.f32 %v1056_v26, %v399_v45  ;;  %v381_v10 = vadd.f32 %v380_v60, %v379_v59  ;;  %v420_v11 = vadd.f32 %v419_v62, %v418_v61  ;;  %v375_v12 = vadd.f32 %v374_v8, %v373_v7  ;;  %v365_v54 = vld [vmem:[%s1494_s2 + $0x48] sm:$0xff]  ;;  %v648_v60 = vld [vmem:[%s1495_s3 + $0x20] sm:$0xff] }
  0x18   : > { %v412_v37 = vsel %vm372_vm0, %v356_v24, 0.0  ;;  %v413_v41 = vsel %vm372_vm0, %v364_v29, 0.0  ;;  %v377_v52 = vsel %vm372_vm0, %v349_v47, 0.0  ;;  %v415_v62 = vsel %vm372_vm0, %v357_v53, 0.0  ;;  %v704_v53 = vld [vmem:[%s1496_s4 + $0x20] sm:$0xff] }
  0x19   : > { %v401_v63 = vadd.f32 %v1056_v26, %v400_v55  ;;  %v414_v50 = vadd.f32 %v413_v41, %v412_v37 }
  0x1b   : > { %v1253_v9 = vsel %vm402_vm1, %v1056_v26, %v401_v63  ;;  %v416_v63 = vsel %vm372_vm0, %v365_v54, 0.0 }
  0x1c   : > { %v410_v13 = vmul.f32 %v1253_v9, %v393_v32  ;;  %v442_v14 = vmul.f32 %v432_v34, %v1253_v9  ;;  %v408_v15 = vmul.f32 %v1253_v9, %v387_v38  ;;  %v440_v16 = vmul.f32 %v426_v39, %v1253_v9 }
  0x1d   : > { %v407_v17 = vmul.f32 %v1253_v9, %v384_v46  ;;  %v439_v18 = vmul.f32 %v423_v0, %v1253_v9  ;;  %v411_v19 = vmul.f32 %v1253_v9, %v396_v1  ;;  %v443_v20 = vmul.f32 %v435_v2, %v1253_v9  ;;  %v341_v46 = vld [vmem:[%s1493_s1 + $0x8] sm:$0xff] }
  0x1e   : > { %580 = vperm.xlu0 %1052, %v410_v13   ;;  %v450_v21 = vmul.f32 %v410_v13, %v410_v13  ;;  %570 = vperm.xlu2 %1054, %v408_v15   ;;  %v448_v22 = vmul.f32 %v408_v15, %v408_v15  ;;  %v409_v23 = vmul.f32 %v1253_v9, %v390_v5  ;;  %v376_v51 = vsel %vm372_vm0, %v341_v46, 0.0 }
  0x1f   : > { %565 = vperm.xlu1 %1053, %v407_v17   ;;  %v447_v25 = vmul.f32 %v407_v17, %v407_v17  ;;  %v451_v26 = vmul.f32 %v411_v19, %v411_v19  ;;  %v441_v27 = vmul.f32 %v429_v6, %v1253_v9  ;;  %v406_v28 = vmul.f32 %v1253_v9, %v381_v10 }
  0x20   : > { %v458_v30 = vsub.f32 %v442_v14, %v450_v21  ;;  %v456_v31 = vsub.f32 %v440_v16, %v448_v22  ;;  %v449_v32 = vmul.f32 %v409_v23, %v409_v23  ;;  %v438_v33 = vmul.f32 %v420_v11, %v1253_v9 }
  0x21   : > { %v455_v34 = vsub.f32 %v439_v18, %v447_v25  ;;  %v459_v35 = vsub.f32 %v443_v20, %v451_v26  ;;  %v446_v36 = vmul.f32 %v406_v28, %v406_v28  ;;  %v1296_v49 = vmul.f32 %v1253_v9, %v375_v12 }
  0x22   : > { %v1274_v38 = vadd.f32 1e-05, %v458_v30  ;;  %v1276_v39 = vadd.f32 1e-05, %v456_v31  ;;  %v457_v40 = vsub.f32 %v441_v27, %v449_v32  ;;  %v436_v55 = vmul.f32 %v414_v50, %v1253_v9  ;;  %v649_v30 = vld [vmem:[%s1495_s3 + $0x28] sm:$0xff] }
  0x23   : > { %v1279_v42 = vadd.f32 1e-05, %v455_v34  ;;  %v1281_v43 = vadd.f32 1e-05, %v459_v35  ;;  %v454_v44 = vsub.f32 %v438_v33, %v446_v36  ;;  %v444_v56 = vmul.f32 %v1296_v49, %v1296_v49 }
  0x24   : > { %1057 = vrsqrt.f32 %v1274_v38  ;;  %v1284_v45 = vadd.f32 1e-05, %v457_v40  ;;  %v378_v57 = vadd.f32 %v377_v52, %v376_v51  ;;  %vm514_vm2 = vweird.f32 %v1276_v39 }
  0x25   : > { %1059 = vrsqrt.f32 %v1276_v39  ;;  %v1293_v48 = vadd.f32 1e-05, %v454_v44  ;;  %vm534_vm3 = vweird.f32 %v1274_v38  ;;  %v452_v5 = vsub.f32 %v436_v55, %v444_v56 }
  0x26   : > { %1061 = vrsqrt.f32 %v1279_v42  ;;  %585 = vperm.xlu0 %1052, %v411_v19   ;;  %575 = vperm.xlu2 %1054, %v409_v23   ;;  %v1329_v6 = vmul.f32 %v1253_v9, %v378_v57  ;;  %vm544_vm4 = vweird.f32 %v1281_v43  ;;  %v417_v11 = vadd.f32 %v416_v63, %v415_v62  ;;  %v646_v63 = vld [vmem:[%s1495_s3 + $0x10] sm:$0xff] }
  0x27   : > { %1063 = vrsqrt.f32 %v1281_v43  ;;  %v1341_v22 = vadd.f32 1e-05, %v452_v5  ;;  %vm504_vm9 = vweird.f32 %v1279_v42  ;;  %vm524_vm11 = vweird.f32 %v1284_v45  ;;  %v703_v5 = vld [vmem:[%s1496_s4 + $0x18] sm:$0xff] }
  0x28   : > { %1065 = vrsqrt.f32 %v1284_v45  ;;  %v437_v26 = vmul.f32 %v417_v11, %v1253_v9  ;;  %v445_v27 = vmul.f32 %v1329_v6, %v1329_v6 }
  0x29   : > { %1067 = vrsqrt.f32 %v1293_v48 }
  0x2a   : > { %v1058_v58 = vpop.eup %1057  ;;  %1069 = vrsqrt.f32 %v1341_v22 }
  0x2b   : > { %v1060_v59 = vpop.eup %1059  ;;  %v529_v61 = vmul.f32 %v1058_v58, %v1274_v38  ;;  %vm535_vm5 = vweird.f32 %v1058_v58  ;;  %v453_v38 = vsub.f32 %v437_v26, %v445_v27 }
  0x2c   : > { %v1319_v0 = vpop.eup %1061  ;;  %v509_v1 = vmul.f32 %v1060_v59, %v1276_v39  ;;  %vm515_vm6 = vweird.f32 %v1060_v59  ;;  %vm1345_vm7 = vmor %vm534_vm3, %vm535_vm5  ;;  %vm474_vm5 = vweird.f32 %v1341_v22 }
  0x2d   : > { %v1324_v2 = vpop.eup %1063  ;;  %v530_v3 = vmul.f32 %v1058_v58, %v529_v61  ;;  %v499_v4 = vmul.f32 %v1319_v0, %v1279_v42  ;;  %vm1354_vm8 = vmor %vm514_vm2, %vm515_vm6  ;;  %vm505_vm13 = vweird.f32 %v1319_v0  ;;  %vm494_vm2 = vweird.f32 %v1293_v48  ;;  %v647_v61 = vld [vmem:[%s1495_s3 + $0x18] sm:$0xff] }
  0x2e   : > { %v1066_v7 = vpop.eup %1065  ;;  %674 = vperm.xlu2 %1054, %v648_v60   ;;  %560 = vperm.xlu0 %1052, %v406_v28   ;;  %v510_v8 = vmul.f32 %v1060_v59, %v509_v1  ;;  %v539_v10 = vmul.f32 %v1324_v2, %v1281_v43  ;;  %vm545_vm10 = vweird.f32 %v1324_v2  ;;  %vm506_vm1 = vmor %vm504_vm9, %vm505_vm13  ;;  %v339_v28 = vld [vmem:[%s1427_s26 + $0x38] sm:$0xff] }
  0x2f   : > { %v1334_v12 = vpop.eup %1067  ;;  %v531_v13 = vmul.f32 0.5, %v530_v3  ;;  %v500_v14 = vmul.f32 %v1319_v0, %v499_v4  ;;  %v519_v15 = vmul.f32 %v1066_v7, %v1284_v45  ;;  %vm525_vm12 = vweird.f32 %v1066_v7  ;;  %vm546_vm14 = vmor %vm544_vm4, %vm545_vm10 }
  0x30   : > { %v511_v16 = vmul.f32 0.5, %v510_v8  ;;  %v540_v17 = vmul.f32 %v1324_v2, %v539_v10  ;;  %v489_v18 = vmul.f32 %v1334_v12, %v1293_v48  ;;  %vm526_vm15 = vmor %vm524_vm11, %vm525_vm12  ;;  %v461_v45 = vadd.f32 1e-05, %v453_v38  ;;  %v1070_v51 = vpop.eup %1069  ;;  %v700_v8 = vld [vmem:[%s1496_s4] sm:$0xff]  ;;  %v701_v10 = vld [vmem:[%s1496_s4 + $0x8] sm:$0xff] }
  0x31   : > { %v532_v19 = vsub.f32 1.5, %v531_v13  ;;  %v501_v20 = vmul.f32 0.5, %v500_v14  ;;  %v520_v21 = vmul.f32 %v1066_v7, %v519_v15  ;;  %vm495_vm3 = vweird.f32 %v1334_v12 }
  0x32   : > { %v512_v23 = vsub.f32 1.5, %v511_v16  ;;  %v541_v25 = vmul.f32 0.5, %v540_v17  ;;  %v490_v32 = vmul.f32 %v1334_v12, %v489_v18  ;;  %1071 = vrsqrt.f32 %v461_v45  ;;  %vm496_vm4 = vmor %vm494_vm2, %vm495_vm3 }
  0x33   : > { %v533_v29 = vmul.f32 %v1058_v58, %v532_v19  ;;  %v521_v31 = vmul.f32 0.5, %v520_v21  ;;  %v502_v34 = vsub.f32 1.5, %v501_v20  ;;  %v469_v42 = vmul.f32 %v1070_v51, %v1341_v22 }
  0x34   : > { %v513_v9 = vmul.f32 %v1060_v59, %v512_v23  ;;  %v542_v33 = vsub.f32 1.5, %v541_v25  ;;  %v491_v41 = vmul.f32 0.5, %v490_v32  ;;  %vm475_vm6 = vweird.f32 %v1070_v51  ;;  %v338_v23 = vld [vmem:[%s1427_s26 + $0x30] sm:$0xff] }
  0x35   : > { %v537_v35 = vsel %vm1345_vm7, %v1058_v58, %v533_v29  ;;  %v522_v36 = vsub.f32 1.5, %v521_v31  ;;  %v503_v44 = vmul.f32 %v1319_v0, %v502_v34  ;;  %v470_v55 = vmul.f32 %v1070_v51, %v469_v42  ;;  %v705_v58 = vld [vmem:[%s1496_s4 + $0x28] sm:$0xff]  ;;  %vm476_vm7 = vmor %vm474_vm5, %vm475_vm6  ;;  %v336_v34 = vld [vmem:[%s1427_s26 + $0x20] sm:$0xff] }
  0x36   : > { %v517_v37 = vsel %vm1354_vm8, %v1060_v59, %v513_v9  ;;  %628 = vperm.xlu1 %1053, %v537_v35   ;;  %679 = vperm.xlu0 %1052, %v649_v30   ;;  %v543_v39 = vmul.f32 %v1324_v2, %v542_v33  ;;  %v492_v50 = vsub.f32 1.5, %v491_v41  ;;  %vm484_vm8 = vweird.f32 %v461_v45 }
  0x37   : > { %618 = vperm.xlu2 %1054, %v517_v37   ;;  %v523_v40 = vmul.f32 %v1066_v7, %v522_v36  ;;  %v507_v52 = vsel %vm506_vm1, %v1319_v0, %v503_v44  ;;  %v471_v48 = vmul.f32 0.5, %v470_v55  ;;  %vm780_vm11 = vcmask 523264  }
  0x38   : > { %v547_v46 = vsel %vm546_vm14, %v1324_v2, %v543_v39  ;;  %v493_v43 = vmul.f32 %v1334_v12, %v492_v50  ;;  %v1072_v56 = vpop.eup %1071  ;;  %v702_v2 = vld [vmem:[%s1496_s4 + $0x10] sm:$0xff]  ;;  %v337_v39 = vld [vmem:[%s1427_s26 + $0x28] sm:$0xff] }
  0x39   : > { %v527_v47 = vsel %vm526_vm15, %v1066_v7, %v523_v40  ;;  %v479_v57 = vmul.f32 %v1072_v56, %v461_v45  ;;  %v472_v59 = vsub.f32 1.5, %v471_v48  ;;  %vm485_vm9 = vweird.f32 %v1072_v56  ;;  %v644_v7 = vld [vmem:[%s1495_s3] sm:$0xff] }
  0x3a   : > { %v497_v54 = vsel %vm496_vm4, %v1334_v12, %v493_v43  ;;  %vm486_vm10 = vmor %vm484_vm8, %vm485_vm9 }
  0x3b   : > { %v480_v60 = vmul.f32 %v1072_v56, %v479_v57 }
  0x3d   : > { %v481_v62 = vmul.f32 0.5, %v480_v60 }
  0x3e   : > { %633 = vperm.xlu1 %1053, %v547_v46   ;;  %623 = vperm.xlu0 %1052, %v527_v47  }
  0x3f   : > { %613 = vperm.xlu2 %1054, %v507_v52   ;;  %v482_v1 = vsub.f32 1.5, %v481_v62 }
  0x41   : > { %v483_v3 = vmul.f32 %v1072_v56, %v482_v1 }
  0x43   : > { %v487_v4 = vsel %vm486_vm10, %v1072_v56, %v483_v3 }
  0x46   : > { %730 = vperm.xlu0 %1052, %v704_v53   ;;  %608 = vperm.xlu1 %1053, %v497_v54  }
  0x47   : > { %550 = vperm.xlu2 %1054, %v1296_v49   ;;  %v473_v49 = vmul.f32 %v1070_v51, %v472_v59 }
  0x49   : > { %v477_v0 = vsel %vm476_vm7, %v1070_v51, %v473_v49  ;;  %v335_v49 = vld [vmem:[%s1427_s26 + $0x18] sm:$0xff] }
  0x4e   : > { %735 = vperm.xlu1 %1053, %v705_v58   ;;  %555 = vperm.xlu0 %1052, %v1329_v6   ;;  %v645_v6 = vld [vmem:[%s1495_s3 + $0x8] sm:$0xff]  ;;  %v334_v58 = vld [vmem:[%s1427_s26 + $0x10] sm:$0xff] }
  0x4f   : > { %669 = vperm.xlu2 %1054, %v647_v61  }
  0x56   : > { %664 = vperm.xlu1 %1053, %v646_v63   ;;  %598 = vperm.xlu0 %1052, %v477_v0  }
  0x57   : > { %720 = vperm.xlu2 %1054, %v702_v2  }
  0x5e   : > { %603 = vperm.xlu1 %1053, %v487_v4   ;;  %725 = vperm.xlu0 %1052, %v703_v5  }
  0x5f   : > { %659 = vperm.xlu2 %1054, %v645_v6  }
  0x66   : > { %654 = vperm.xlu1 %1053, %v644_v7   ;;  %710 = vperm.xlu0 %1052, %v700_v8  }
  0x68   : > { %v746_v11 = vpop.permute.xlu2 %745 }
  0x6e   : > { %715 = vperm.xlu1 %1053, %v701_v10  }
  0x78   : > { %v571_v13 = vpop.permute.xlu2 %570 }
  0x79   : > { %v592_v37 = vsub.f32 %v336_v34, %v571_v13  ;;  %v332_v13 = vld [vmem:[%s1427_s26] sm:$0xff]  ;;  %v769_v34 = vld [vmem:[%s1497_s5 + $0x28] sm:$0xff] }
  0x7f   : > { %v690_v14 = vpop.permute.xlu1 %689 }
  0x80   : > { %v685_v12 = vpop.permute.xlu0 %684  ;;  %v576_v16 = vpop.permute.xlu2 %575 }
  0x81   : > { %v593_v46 = vsub.f32 %v337_v39, %v576_v16 }
  0x87   : > { %v741_v17 = vpop.permute.xlu1 %740 }
  0x88   : > { %v675_v19 = vpop.permute.xlu2 %674 }
  0x90   : > { %v581_v15 = vpop.permute.xlu0 %580 }
  0x91   : > { %v566_v20 = vpop.permute.xlu1 %565  ;;  %v619_v22 = vpop.permute.xlu2 %618  ;;  %v594_v26 = vsub.f32 %v338_v23, %v581_v15  ;;  %v333_v15 = vld [vmem:[%s1427_s26 + $0x8] sm:$0xff] }
  0x92   : > { %v640_v47 = vmul.f32 %v619_v22, %v592_v37  ;;  %v591_v1 = vsub.f32 %v335_v49, %v566_v20 }
  0x94   : > { %v696_v43 = vmul.f32 %v675_v19, %v640_v47 }
  0x98   : > { %v586_v18 = vpop.permute.xlu0 %585 }
  0x99   : > { %v595_v29 = vsub.f32 %v339_v28, %v586_v18  ;;  %v614_v30 = vpop.permute.xlu2 %613  ;;  %v764_v28 = vld [vmem:[%s1497_s5] sm:$0xff] }
  0x9a   : > { %v639_v3 = vmul.f32 %v614_v30, %v591_v1 }
  0xa0   : > { %v561_v21 = vpop.permute.xlu0 %560 }
  0xa1   : > { %v551_v51 = vpop.permute.xlu2 %550  ;;  %v590_v61 = vsub.f32 %v334_v58, %v561_v21 }
  0xa2   : > { %v588_v16 = vsub.f32 %v332_v13, %v551_v51 }
  0xa8   : > { %v629_v24 = vpop.permute.xlu1 %628  ;;  %v680_v25 = vpop.permute.xlu0 %679 }
  0xa9   : > { %v642_v27 = vmul.f32 %v629_v24, %v594_v26  ;;  %v670_v59 = vpop.permute.xlu2 %669 }
  0xaa   : > { %v695_v5 = vmul.f32 %v670_v59, %v639_v3 }
  0xab   : > { %v698_v31 = vmul.f32 %v685_v12, %v642_v27 }
  0xad   : > { %v754_v35 = vadd.f32 %v741_v17, %v698_v31 }
  0xaf   : > { %v762_v40 = vmax.f32 %v754_v35, 0.0  ;;  %v770_v35 = vld [vmem:[%s1497_s5 + $0x30] sm:$0xff] }
  0xb0   : > { %v634_v32 = vpop.permute.xlu1 %633  ;;  %v624_v9 = vpop.permute.xlu0 %623 }
  0xb1   : > { %v643_v33 = vmul.f32 %v634_v32, %v595_v29  ;;  %v641_v52 = vmul.f32 %v624_v9, %v593_v46  ;;  %v721_v4 = vpop.permute.xlu2 %720  ;;  %v765_v29 = vld [vmem:[%s1497_s5 + $0x8] sm:$0xff]  ;;  %v766_v32 = vld [vmem:[%s1497_s5 + $0x10] sm:$0xff]  ;;  %v767_v9 = vld [vmem:[%s1497_s5 + $0x18] sm:$0xff] }
  0xb2   : > { %v773_v39 = vpack.c.bf16 %v767_v9, %v766_v32 }
  0xb3   : > { %v699_v36 = vmul.f32 %v690_v14, %v643_v33  ;;  %v697_v53 = vmul.f32 %v680_v25, %v641_v52  ;;  %v768_v33 = vld [vmem:[%s1497_s5 + $0x20] sm:$0xff] }
  0xb5   : > { %v755_v38 = vadd.f32 %v746_v11, %v699_v36  ;;  %v771_v36 = vld [vmem:[%s1497_s5 + $0x38] sm:$0xff] }
  0xb7   : > { %v763_v41 = vmax.f32 %v755_v38, 0.0  ;;  %v772_v38 = vpack.c.bf16 %v765_v29, %v764_v28 }
  0xb8   : > { %v731_v44 = vpop.permute.xlu0 %730  ;;  %v609_v45 = vpop.permute.xlu1 %608 }
  0xb9   : > { %v779_v50 = vpack.c.bf16 %v763_v41, %v762_v40  ;;  %v752_v42 = vadd.f32 %v731_v44, %v696_v43  ;;  %v638_v0 = vmul.f32 %v609_v45, %v590_v61  ;;  %v660_v22 = vpop.permute.xlu2 %659  ;;  %v774_v40 = vpack.c.bf16 %v769_v34, %v768_v33 }
  0xba   : > { %v775_v41 = vpack.c.bf16 %v771_v36, %v770_v35 }
  0xbb   : > { %797 = vmatpush.bf16.msra.mxu0 %v779_v50  ;;  %1030 = vmatpush.bf16.msra.mxu1 %v779_v50  ;;  %v760_v48 = vmax.f32 %v752_v42, 0.0 }
  0xbc   : > { %1031 = vmatpush.bf16.msra.mxu2 %v779_v50  ;;  %1032 = vmatpush.bf16.msra.mxu3 %v779_v50 }
  0xc0   : > { %v736_v54 = vpop.permute.xlu1 %735  ;;  %v556_v55 = vpop.permute.xlu0 %555 }
  0xc1   : > { %v753_v56 = vadd.f32 %v736_v54, %v697_v53  ;;  %v589_v18 = vsub.f32 %v333_v15, %v556_v55 }
  0xc3   : > { %v761_v57 = vmax.f32 %v753_v56, 0.0 }
  0xc5   : > { %v778_v60 = vpack.c.bf16 %v761_v57, %v760_v48 }
  0xc7   : > { %798 = vmatpush.bf16.msra.mxu0 %v778_v60  ;;  %1033 = vmatpush.bf16.msra.mxu1 %v778_v60 }
  0xc8   : > { %1034 = vmatpush.bf16.msra.mxu2 %v778_v60  ;;  %1035 = vmatpush.bf16.msra.mxu3 %v778_v60  ;;  %v665_v62 = vpop.permute.xlu1 %664  ;;  %v599_v63 = vpop.permute.xlu0 %598 }
  0xc9   : > { %v694_v2 = vmul.f32 %v665_v62, %v638_v0  ;;  %v636_v19 = vmul.f32 %v599_v63, %v588_v16 }
  0xcb   : > { %v750_v6 = vadd.f32 %v721_v4, %v694_v2 }
  0xcd   : > { %v758_v11 = vmax.f32 %v750_v6, 0.0 }
  0xd0   : > { %v604_v7 = vpop.permute.xlu1 %603  ;;  %v726_v8 = vpop.permute.xlu0 %725 }
  0xd1   : > { %v751_v10 = vadd.f32 %v726_v8, %v695_v5  ;;  %v637_v20 = vmul.f32 %v604_v7, %v589_v18 }
  0xd3   : > { %v759_v12 = vmax.f32 %v751_v10, 0.0  ;;  %v693_v25 = vmul.f32 %v660_v22, %v637_v20 }
  0xd5   : > { %v777_v14 = vpack.c.bf16 %v759_v12, %v758_v11 }
  0xd7   : > { %799 = vmatpush.bf16.msra.mxu0 %v777_v14  ;;  %1036 = vmatpush.bf16.msra.mxu1 %v777_v14 }
  0xd8   : > { %1037 = vmatpush.bf16.msra.mxu2 %v777_v14  ;;  %1038 = vmatpush.bf16.msra.mxu3 %v777_v14  ;;  %v655_v17 = vpop.permute.xlu1 %654  ;;  %v711_v23 = vpop.permute.xlu0 %710 }
  0xd9   : > { %v692_v21 = vmul.f32 %v655_v17, %v636_v19 }
  0xdb   : > { %v748_v24 = vadd.f32 %v711_v23, %v692_v21 }
  0xdd   : > { %v756_v30 = vmax.f32 %v748_v24, 0.0 }
  0xe0   : > { %v716_v26 = vpop.permute.xlu1 %715 }
  0xe1   : > { %v749_v27 = vadd.f32 %v716_v26, %v693_v25 }
  0xe3   : > { %v757_v31 = vmax.f32 %v749_v27, 0.0 }
  0xe5   : > { %v776_v37 = vpack.c.bf16 %v757_v31, %v756_v30 }
  0xe7   : > { %800 = vmatpush.bf16.msra.mxu0 %v776_v37  ;;  %1039 = vmatpush.bf16.msra.mxu1 %v776_v37 }
  0xe8   : > { %1040 = vmatpush.bf16.msra.mxu2 %v776_v37  ;;  %1041 = vmatpush.bf16.msra.mxu3 %v776_v37 }
  0xea   : > { %1020 = vmatmul.msk.bf16.vlgmr.msra.gmra.mxu0 %vm780_vm11, %v772_v38  ;;  %1021 = vmatmul.msk.bf16.vlgmr.msra.gmra.mxu1 %vm780_vm11, %v773_v39 }
  0xeb   : > { %1022 = vmatmul.msk.bf16.vlgmr.msra.gmra.mxu2 %vm780_vm11, %v774_v40  ;;  %1023 = vmatmul.msk.bf16.vlgmr.msra.gmra.mxu3 %vm780_vm11, %v775_v41 }
 0x167   : > { %v802_v44 = vpop.f32.mrf.mxu0  ;;  %v807_v45 = vpop.f32.mrf.mxu1 }
 0x168   : > { %822 = vst [vmem:[%s320_s25] sm:$0xff] %v802_v44  ;;  %834 = vadd.xlane.f32.xlu1 %v807_v45  ;;  %830 = vadd.xlane.f32.xlu2 %v802_v44  ;;  %v846_v46 = vmul.f32 %v802_v44, %v802_v44  ;;  %v848_v47 = vmul.f32 %v807_v45, %v807_v45 }
 0x169   : > { %824 = vst [vmem:[%s320_s25 + $0x10] sm:$0xff] %v807_v45 }
 0x16a   : > { %854 = vadd.xlane.f32.xlu0 %v846_v46 }
 0x16e   : > { %v812_v50 = vpop.f32.mrf.mxu2  ;;  %v817_v51 = vpop.f32.mrf.mxu3 }
 0x16f   : > { %v804_v52 = vpop.f32.mrf.mxu0  ;;  %v809_v43 = vpop.f32.mrf.mxu1  ;;  %826 = vst [vmem:[%s320_s25 + $0x20] sm:$0xff] %v812_v50  ;;  %v850_v42 = vmul.f32 %v812_v50, %v812_v50  ;;  %v852_v57 = vmul.f32 %v817_v51, %v817_v51 }
 0x170   : > { %823 = vst [vmem:[%s320_s25 + $0x8] sm:$0xff] %v804_v52  ;;  %842 = vadd.xlane.f32.xlu1 %v817_v51  ;;  %858 = vadd.xlane.f32.xlu2 %v848_v47  ;;  %v849_v55 = vmul.f32 %v809_v43, %v809_v43  ;;  %v847_v56 = vmul.f32 %v804_v52, %v804_v52 }
 0x171   : > { %825 = vst [vmem:[%s320_s25 + $0x18] sm:$0xff] %v809_v43 }
 0x172   : > { %828 = vst [vmem:[%s320_s25 + $0x30] sm:$0xff] %v817_v51  ;;  %832 = vadd.xlane.f32.xlu0 %v804_v52 }
 0x176   : > { %v814_v53 = vpop.f32.mrf.mxu2  ;;  %v819_v54 = vpop.f32.mrf.mxu3 }
 0x177   : > { %827 = vst [vmem:[%s320_s25 + $0x28] sm:$0xff] %v814_v53  ;;  %v853_v48 = vmul.f32 %v819_v54, %v819_v54  ;;  %v851_v58 = vmul.f32 %v814_v53, %v814_v53 }
 0x178   : > { %829 = vst [vmem:[%s320_s25 + $0x38] sm:$0xff] %v819_v54  ;;  %862 = vadd.xlane.f32.xlu1 %v850_v42  ;;  %838 = vadd.xlane.f32.xlu2 %v812_v50 }
 0x17a   : > { %860 = vadd.xlane.f32.xlu0 %v849_v55 }
 0x180   : > { %836 = vadd.xlane.f32.xlu2 %v809_v43  ;;  %856 = vadd.xlane.f32.xlu1 %v847_v56 }
 0x182   : > { %840 = vadd.xlane.f32.xlu0 %v814_v53 }
 0x188   : > { %844 = vadd.xlane.f32.xlu2 %v819_v54  ;;  %868 = vadd.xlane.f32.xlu1 %v853_v48 }
 0x18a   : > { %866 = vadd.xlane.f32.xlu0 %v852_v57 }
 0x190   : > { %864 = vadd.xlane.f32.xlu2 %v851_v58 }
 0x1db   : > { %v835_v59 = vpop.xlane.xlu1 %834  ;;  %v831_v60 = vpop.xlane.xlu2 %830 }
 0x1dc   : > { %872 = vst.msk [vmem:[%s325_s29 + $0x10] sm:$0xff] %vm372_vm0, %v835_v59 }
 0x1dd   : > { %870 = vst.msk [vmem:[%s325_s29] sm:$0xff] %vm372_vm0, %v831_v60  ;;  %v855_v61 = vpop.xlane.xlu0 %854 }
 0x1de   : > { %878 = vst.msk [vmem:[%s330_s10] sm:$0xff] %vm372_vm0, %v855_v61 }
 0x1e3   : > { %v843_v49 = vpop.xlane.xlu1 %842  ;;  %v859_v62 = vpop.xlane.xlu2 %858 }
 0x1e4   : > { %876 = vst.msk [vmem:[%s325_s29 + $0x30] sm:$0xff] %vm372_vm0, %v843_v49 }
 0x1e5   : > { %880 = vst.msk [vmem:[%s330_s10 + $0x10] sm:$0xff] %vm372_vm0, %v859_v62  ;;  %v833_v63 = vpop.xlane.xlu0 %832 }
 0x1e6   : > { %871 = vst.msk [vmem:[%s325_s29 + $0x8] sm:$0xff] %vm372_vm0, %v833_v63 }
 0x1eb   : > { %v863_v0 = vpop.xlane.xlu1 %862  ;;  %v839_v1 = vpop.xlane.xlu2 %838 }
 0x1ec   : > { %882 = vst.msk [vmem:[%s330_s10 + $0x20] sm:$0xff] %vm372_vm0, %v863_v0 }
 0x1ed   : > { %874 = vst.msk [vmem:[%s325_s29 + $0x20] sm:$0xff] %vm372_vm0, %v839_v1  ;;  %v861_v2 = vpop.xlane.xlu0 %860 }
 0x1ee   : > { %881 = vst.msk [vmem:[%s330_s10 + $0x18] sm:$0xff] %vm372_vm0, %v861_v2 }
 0x1f3   : > { %v837_v3 = vpop.xlane.xlu2 %836  ;;  %v857_v4 = vpop.xlane.xlu1 %856 }
 0x1f4   : > { %873 = vst.msk [vmem:[%s325_s29 + $0x18] sm:$0xff] %vm372_vm0, %v837_v3 }
 0x1f5   : > { %879 = vst.msk [vmem:[%s330_s10 + $0x8] sm:$0xff] %vm372_vm0, %v857_v4  ;;  %v841_v5 = vpop.xlane.xlu0 %840 }
 0x1f6   : > { %875 = vst.msk [vmem:[%s325_s29 + $0x28] sm:$0xff] %vm372_vm0, %v841_v5 }
 0x1fb   : > { %v845_v6 = vpop.xlane.xlu2 %844  ;;  %v869_v7 = vpop.xlane.xlu1 %868 }
 0x1fc   : > { %877 = vst.msk [vmem:[%s325_s29 + $0x38] sm:$0xff] %vm372_vm0, %v845_v6 }
 0x1fd   : > { %885 = vst.msk [vmem:[%s330_s10 + $0x38] sm:$0xff] %vm372_vm0, %v869_v7  ;;  %v867_v8 = vpop.xlane.xlu0 %866 }
 0x1fe   : > { %884 = vst.msk [vmem:[%s330_s10 + $0x30] sm:$0xff] %vm372_vm0, %v867_v8 }
 0x203   : > { %v865_v10 = vpop.xlane.xlu2 %864 }
 0x204   : > { %883 = vst.msk [vmem:[%s330_s10 + $0x28] sm:$0xff] %vm372_vm0, %v865_v10 }
 0x205 PF: > { %s19_s27 = sadd.s32 1, %s1079_s27  }
 0x206   : > { %p16_p4 = scmp.ge.s32.totalorder %s19_s27, 4  }
 0x208   :  { %18 = sbr.rel (!%p16_p4) target bundleno = 1 (0x1), region = 98 }

// kernel: stacked_attention.8
= control target key start
LH: loop header
LB: loop body
LE: loop exit
PB: predicated region body
PF: predicated region fallthrough
CT: control target
= control target key end

     0   :  { %s2016_s29 = smov 0   ;;  %s2710_s0 = inlined_call_operand.vmem [shape: f32[2,64,128], index: 0, kind: input, shape index: {}]   ;;  %s2711_s1 = inlined_call_operand.vmem [shape: f32[2,64,1], index: 1, kind: input, shape index: {}]   ;;  %s2712_s2 = inlined_call_operand.vmem [shape: f32[2,64,1], index: 2, kind: input, shape index: {}]   ;;  %s2713_s3 = inlined_call_operand.vmem [shape: f32[64,1], index: 3, kind: input, shape index: {}]   ;;  %s2714_s4 = inlined_call_operand.vmem [shape: f32[64,1], index: 4, kind: input, shape index: {}]   ;;  %s2715_s5 = inlined_call_operand.vmem [shape: f32[2,64,128], index: 5, kind: input, shape index: {}]   ;;  %s2716_s6 = inlined_call_operand.vmem [shape: f32[16,64], index: 6, kind: input, shape index: {}]   ;;  %s2717_s7 = inlined_call_operand.vmem [shape: f32[64,64], index: 7, kind: input, shape index: {}]   ;;  %s2718_s8 = inlined_call_operand.vmem [shape: f32[64,1], index: 8, kind: input, shape index: {}]   ;;  %s2719_s9 = inlined_call_operand.vmem [shape: f32[64,64], index: 9, kind: input, shape index: {}]   ;;  %s2720_s10 = inlined_call_operand.vmem [shape: f32[64,1], index: 10, kind: input, shape index: {}]   ;;  %s2721_s11 = inlined_call_operand.vmem [shape: f32[2,64,128], index: 11, kind: output, shape index: {0}]   ;;  %s2722_s12 = inlined_call_operand.vmem [shape: f32[2,64,128], index: 12, kind: output, shape index: {1}]   ;;  %s2723_s13 = inlined_call_operand.vmem [shape: f32[2,64,1], index: 13, kind: output, shape index: {2}]   ;;  %s2724_s14 = inlined_call_operand.vmem [shape: f32[2,64,1], index: 14, kind: output, shape index: {3}]  }
   0x1 LB: > { %s1790_s30 = sadd.s32 4294967295, %s1937_s29   ;;  %p1794_p0 = scmp.ge.s32.totalorder %s1937_s29, 1  ;;  %s1937_s29 = sphi %s2016_s29, %s25_s29  }
   0x2   : > { %p429_p1 = scmp.lt.s32.totalorder %s1937_s29, 3 }
   0x4   : > { %p430_p2 = pnand %p1794_p0, %p429_p1 }
   0x5   : > { %p495_p3 = scmp.lt.s32.totalorder (!%p430_p2), %s1790_s30, 1 }
   0x6   : > { %433 = sbr.rel (%p430_p2) target bundleno = 1604 (0x644), region = 64 }
   0xb   : > { %v845_v0 = vld [vmem:[%s2713_s3 + $0x38] sm:$0xff]  ;;  %v1939_v2 = vmov 0   ;;  %v844_v3 = vld [vmem:[%s2713_s3 + $0x30] sm:$0xff]  ;;  %v1940_v6 = vmov 256.0   ;;  %vm566_vm0 = vcmask 7168   ;;  %v538_v9 = vld [vmem:[%s2711_s1 + $0x20] sm:$0xff] }
   0xc   : > { %v901_v1 = vld [vmem:[%s2714_s4 + $0x38] sm:$0xff]  ;;  %1845 = vset.pattern.permute.xlu1 %v1939_v2  ;;  %1846 = vset.pattern.permute.xlu2 %v1939_v2  ;;  %v540_v4 = vld [vmem:[%s2711_s1 + $0x30] sm:$0xff]  ;;  %1847 = vrcp.f32 %v1940_v6  ;;  %v546_v10 = vld [vmem:[%s2711_s1 + $0x60] sm:$0xff]  ;;  %v579_v20 = vsel %vm566_vm0, %v538_v9, 0.0  ;;  %s2730_s30 = smov (!%p495_p3, %s1790_s30), 1 }
   0xd   : > { %v548_v5 = vld [vmem:[%s2711_s1 + $0x70] sm:$0xff]  ;;  %883 = vperm.xlu1 %1845, %v845_v0   ;;  %1844 = vset.pattern.permute.xlu0 %v1939_v2  ;;  %v554_v11 = vld [vmem:[%s2712_s2 + $0x20] sm:$0xff]  ;;  %v537_v13 = vld [vmem:[%s2711_s1 + $0x18] sm:$0xff]  ;;  %v585_v16 = vsel %vm566_vm0, %v540_v4, 0.0  ;;  %v580_v21 = vsel %vm566_vm0, %v546_v10, 0.0  ;;  %s2309_s27 = sshll.u32 %s2730_s30, 6 }
   0xe   : > { %v556_v7 = vld [vmem:[%s2712_s2 + $0x30] sm:$0xff]  ;;  %939 = vperm.xlu2 %1846, %v901_v1   ;;  %878 = vperm.xlu0 %1844, %v844_v3   ;;  %v562_v12 = vld [vmem:[%s2712_s2 + $0x60] sm:$0xff]  ;;  %v545_v14 = vld [vmem:[%s2711_s1 + $0x58] sm:$0xff]  ;;  %v586_v17 = vsel %vm566_vm0, %v548_v5, 0.0  ;;  %v618_v22 = vsel %vm566_vm0, %v554_v11, 0.0  ;;  %v576_v27 = vsel %vm566_vm0, %v537_v13, 0.0  ;;  %v581_v38 = vadd.f32 %v580_v21, %v579_v20  ;;  %s2317_s16 = scalar_lea.vmem %s2710_s0, %s2309_s27  ;;  %s2324_s18 = scalar_lea.vmem %s2715_s5, %s2309_s27 }
   0xf   : > { %v564_v8 = vld [vmem:[%s2712_s2 + $0x70] sm:$0xff]  ;;  %v624_v18 = vsel %vm566_vm0, %v556_v7, 0.0  ;;  %v619_v23 = vsel %vm566_vm0, %v562_v12, 0.0  ;;  %v553_v24 = vld [vmem:[%s2712_s2 + $0x18] sm:$0xff]  ;;  %v577_v28 = vsel %vm566_vm0, %v545_v14, 0.0  ;;  %v587_v32 = vadd.f32 %v586_v17, %v585_v16  ;;  %v539_v36 = vld [vmem:[%s2711_s1 + $0x28] sm:$0xff]  ;;  %s2333_s21 = scalar_lea.vmem %s2721_s11, %s2309_s27  ;;  %s2663_s22 = scalar_lea.vmem %s2722_s12, %s2309_s27 }
  0x10   : > { %v900_v15 = vld [vmem:[%s2714_s4 + $0x30] sm:$0xff]  ;;  %v625_v19 = vsel %vm566_vm0, %v564_v8, 0.0  ;;  %v561_v25 = vld [vmem:[%s2712_s2 + $0x58] sm:$0xff]  ;;  %v547_v37 = vld [vmem:[%s2711_s1 + $0x68] sm:$0xff]  ;;  %v620_v39 = vadd.f32 %v619_v23, %v618_v22  ;;  %v615_v40 = vsel %vm566_vm0, %v553_v24, 0.0  ;;  %v578_v46 = vadd.f32 %v577_v28, %v576_v27  ;;  %s519_s25 = scalar_lea.vmem %s2723_s13, %s2309_s27  ;;  %s2681_s15 = scalar_lea.vmem %s2724_s14, %s2309_s27 }
  0x11   : > { %v541_v29 = vld [vmem:[%s2711_s1 + $0x38] sm:$0xff]  ;;  %v626_v34 = vadd.f32 %v625_v19, %v624_v18  ;;  %v616_v41 = vsel %vm566_vm0, %v561_v25, 0.0  ;;  %v555_v42 = vld [vmem:[%s2712_s2 + $0x28] sm:$0xff]  ;;  %v536_v44 = vld [vmem:[%s2711_s1 + $0x10] sm:$0xff]  ;;  %v582_v54 = vsel %vm566_vm0, %v539_v36, 0.0  ;;  %v583_v56 = vsel %vm566_vm0, %v547_v37, 0.0 }
  0x12   : > { %v1848_v26 = vpop.eup %1847  ;;  %v549_v30 = vld [vmem:[%s2711_s1 + $0x78] sm:$0xff]  ;;  %v563_v43 = vld [vmem:[%s2712_s2 + $0x68] sm:$0xff]  ;;  %v588_v47 = vsel %vm566_vm0, %v541_v29, 0.0  ;;  %v544_v49 = vld [vmem:[%s2711_s1 + $0x50] sm:$0xff]  ;;  %v621_v57 = vsel %vm566_vm0, %v555_v42, 0.0  ;;  %v573_v59 = vsel %vm566_vm0, %v536_v44, 0.0  ;;  %v617_v0 = vadd.f32 %v616_v41, %v615_v40 }
  0x13   : > { %v557_v31 = vld [vmem:[%s2712_s2 + $0x38] sm:$0xff]  ;;  %v592_v33 = vmul.f32 256.0, %v1848_v26  ;;  %v589_v48 = vsel %vm566_vm0, %v549_v30, 0.0  ;;  %v552_v50 = vld [vmem:[%s2712_s2 + $0x10] sm:$0xff]  ;;  %vm596_vm1 = vweird.f32 %v1848_v26  ;;  %v622_v58 = vsel %vm566_vm0, %v563_v43, 0.0  ;;  %v534_v3 = vld [vmem:[%s2711_s1] sm:$0xff] }
  0x14   : > { %v565_v35 = vld [vmem:[%s2712_s2 + $0x78] sm:$0xff]  ;;  %v560_v51 = vld [vmem:[%s2712_s2 + $0x50] sm:$0xff]  ;;  %v627_v52 = vsel %vm566_vm0, %v557_v31, 0.0  ;;  %v574_v60 = vsel %vm566_vm0, %v544_v49, 0.0  ;;  %v612_v61 = vsel %vm566_vm0, %v552_v50, 0.0  ;;  %v590_v1 = vadd.f32 %v589_v48, %v588_v47  ;;  %v542_v4 = vld [vmem:[%s2711_s1 + $0x40] sm:$0xff] }
  0x15   : > { %934 = vperm.xlu1 %1845, %v900_v15   ;;  %v593_v45 = vsub.f32 1.0, %v592_v33  ;;  %v628_v53 = vsel %vm566_vm0, %v565_v35, 0.0  ;;  %v613_v62 = vsel %vm566_vm0, %v560_v51, 0.0  ;;  %v584_v5 = vadd.f32 %v583_v56, %v582_v54  ;;  %v550_v24 = vld [vmem:[%s2712_s2] sm:$0xff]  ;;  %v543_v47 = vld [vmem:[%s2711_s1 + $0x48] sm:$0xff] }
  0x16   : > { %v629_v2 = vadd.f32 %v628_v53, %v627_v52  ;;  %v623_v6 = vadd.f32 %v622_v58, %v621_v57  ;;  %v567_v7 = vsel %vm566_vm0, %v534_v3, 0.0  ;;  %v568_v8 = vsel %vm566_vm0, %v542_v4, 0.0  ;;  %v558_v29 = vld [vmem:[%s2712_s2 + $0x40] sm:$0xff]  ;;  %v551_v53 = vld [vmem:[%s2712_s2 + $0x8] sm:$0xff] }
  0x17   : > { %v594_v55 = vmul.f32 %v1848_v26, %v593_v45  ;;  %v575_v10 = vadd.f32 %v574_v60, %v573_v59  ;;  %v614_v11 = vadd.f32 %v613_v62, %v612_v61  ;;  %v569_v12 = vadd.f32 %v568_v8, %v567_v7  ;;  %v559_v54 = vld [vmem:[%s2712_s2 + $0x48] sm:$0xff]  ;;  %v842_v60 = vld [vmem:[%s2713_s3 + $0x20] sm:$0xff] }
  0x18   : > { %v606_v37 = vsel %vm566_vm0, %v550_v24, 0.0  ;;  %v607_v41 = vsel %vm566_vm0, %v558_v29, 0.0  ;;  %v571_v52 = vsel %vm566_vm0, %v543_v47, 0.0  ;;  %v609_v62 = vsel %vm566_vm0, %v551_v53, 0.0  ;;  %v898_v53 = vld [vmem:[%s2714_s4 + $0x20] sm:$0xff] }
  0x19   : > { %v595_v63 = vadd.f32 %v1848_v26, %v594_v55  ;;  %v608_v50 = vadd.f32 %v607_v41, %v606_v37 }
  0x1b   : > { %v2141_v9 = vsel %vm596_vm1, %v1848_v26, %v595_v63  ;;  %v610_v63 = vsel %vm566_vm0, %v559_v54, 0.0 }
  0x1c   : > { %v604_v13 = vmul.f32 %v2141_v9, %v587_v32  ;;  %v636_v14 = vmul.f32 %v626_v34, %v2141_v9  ;;  %v602_v15 = vmul.f32 %v2141_v9, %v581_v38  ;;  %v634_v16 = vmul.f32 %v620_v39, %v2141_v9 }
  0x1d   : > { %v601_v17 = vmul.f32 %v2141_v9, %v578_v46  ;;  %v633_v18 = vmul.f32 %v617_v0, %v2141_v9  ;;  %v605_v19 = vmul.f32 %v2141_v9, %v590_v1  ;;  %v637_v20 = vmul.f32 %v629_v2, %v2141_v9  ;;  %v535_v46 = vld [vmem:[%s2711_s1 + $0x8] sm:$0xff] }
  0x1e   : > { %774 = vperm.xlu0 %1844, %v604_v13   ;;  %v644_v21 = vmul.f32 %v604_v13, %v604_v13  ;;  %764 = vperm.xlu2 %1846, %v602_v15   ;;  %v642_v22 = vmul.f32 %v602_v15, %v602_v15  ;;  %v603_v23 = vmul.f32 %v2141_v9, %v584_v5  ;;  %v570_v51 = vsel %vm566_vm0, %v535_v46, 0.0 }
  0x1f   : > { %759 = vperm.xlu1 %1845, %v601_v17   ;;  %v641_v25 = vmul.f32 %v601_v17, %v601_v17  ;;  %v645_v26 = vmul.f32 %v605_v19, %v605_v19  ;;  %v635_v27 = vmul.f32 %v623_v6, %v2141_v9  ;;  %v600_v28 = vmul.f32 %v2141_v9, %v575_v10 }
  0x20   : > { %v652_v30 = vsub.f32 %v636_v14, %v644_v21  ;;  %v650_v31 = vsub.f32 %v634_v16, %v642_v22  ;;  %v643_v32 = vmul.f32 %v603_v23, %v603_v23  ;;  %v632_v33 = vmul.f32 %v614_v11, %v2141_v9 }
  0x21   : > { %v649_v34 = vsub.f32 %v633_v18, %v641_v25  ;;  %v653_v35 = vsub.f32 %v637_v20, %v645_v26  ;;  %v640_v36 = vmul.f32 %v600_v28, %v600_v28  ;;  %v2184_v49 = vmul.f32 %v2141_v9, %v569_v12 }
  0x22   : > { %v2162_v38 = vadd.f32 1e-05, %v652_v30  ;;  %v2164_v39 = vadd.f32 1e-05, %v650_v31  ;;  %v651_v40 = vsub.f32 %v635_v27, %v643_v32  ;;  %v630_v55 = vmul.f32 %v608_v50, %v2141_v9  ;;  %v843_v30 = vld [vmem:[%s2713_s3 + $0x28] sm:$0xff] }
  0x23   : > { %v2167_v42 = vadd.f32 1e-05, %v649_v34  ;;  %v2169_v43 = vadd.f32 1e-05, %v653_v35  ;;  %v648_v44 = vsub.f32 %v632_v33, %v640_v36  ;;  %v638_v56 = vmul.f32 %v2184_v49, %v2184_v49 }
  0x24   : > { %1849 = vrsqrt.f32 %v2162_v38  ;;  %v2172_v45 = vadd.f32 1e-05, %v651_v40  ;;  %v572_v57 = vadd.f32 %v571_v52, %v570_v51  ;;  %vm708_vm2 = vweird.f32 %v2164_v39 }
  0x25   : > { %1851 = vrsqrt.f32 %v2164_v39  ;;  %v2181_v48 = vadd.f32 1e-05, %v648_v44  ;;  %vm728_vm3 = vweird.f32 %v2162_v38  ;;  %v646_v5 = vsub.f32 %v630_v55, %v638_v56 }
  0x26   : > { %1853 = vrsqrt.f32 %v2167_v42  ;;  %779 = vperm.xlu0 %1844, %v605_v19   ;;  %769 = vperm.xlu2 %1846, %v603_v23   ;;  %v2217_v6 = vmul.f32 %v2141_v9, %v572_v57  ;;  %vm738_vm4 = vweird.f32 %v2169_v43  ;;  %v611_v11 = vadd.f32 %v610_v63, %v609_v62  ;;  %v840_v63 = vld [vmem:[%s2713_s3 + $0x10] sm:$0xff] }
  0x27   : > { %1855 = vrsqrt.f32 %v2169_v43  ;;  %v2229_v22 = vadd.f32 1e-05, %v646_v5  ;;  %vm698_vm9 = vweird.f32 %v2167_v42  ;;  %vm718_vm11 = vweird.f32 %v2172_v45  ;;  %v897_v5 = vld [vmem:[%s2714_s4 + $0x18] sm:$0xff] }
  0x28   : > { %1857 = vrsqrt.f32 %v2172_v45  ;;  %v631_v26 = vmul.f32 %v611_v11, %v2141_v9  ;;  %v639_v27 = vmul.f32 %v2217_v6, %v2217_v6 }
  0x29   : > { %1859 = vrsqrt.f32 %v2181_v48 }
  0x2a   : > { %v1850_v58 = vpop.eup %1849  ;;  %1861 = vrsqrt.f32 %v2229_v22 }
  0x2b   : > { %v1852_v59 = vpop.eup %1851  ;;  %v723_v61 = vmul.f32 %v1850_v58, %v2162_v38  ;;  %vm729_vm5 = vweird.f32 %v1850_v58  ;;  %v647_v38 = vsub.f32 %v631_v26, %v639_v27 }
  0x2c   : > { %v2207_v0 = vpop.eup %1853  ;;  %v703_v1 = vmul.f32 %v1852_v59, %v2164_v39  ;;  %vm709_vm6 = vweird.f32 %v1852_v59  ;;  %vm2233_vm7 = vmor %vm728_vm3, %vm729_vm5  ;;  %vm668_vm5 = vweird.f32 %v2229_v22 }
  0x2d   : > { %v2212_v2 = vpop.eup %1855  ;;  %v724_v3 = vmul.f32 %v1850_v58, %v723_v61  ;;  %v693_v4 = vmul.f32 %v2207_v0, %v2167_v42  ;;  %vm2242_vm8 = vmor %vm708_vm2, %vm709_vm6  ;;  %vm699_vm13 = vweird.f32 %v2207_v0  ;;  %vm688_vm2 = vweird.f32 %v2181_v48  ;;  %v841_v61 = vld [vmem:[%s2713_s3 + $0x18] sm:$0xff] }
  0x2e   : > { %v1858_v7 = vpop.eup %1857  ;;  %868 = vperm.xlu2 %1846, %v842_v60   ;;  %754 = vperm.xlu0 %1844, %v600_v28   ;;  %v704_v8 = vmul.f32 %v1852_v59, %v703_v1  ;;  %v733_v10 = vmul.f32 %v2212_v2, %v2169_v43  ;;  %vm739_vm10 = vweird.f32 %v2212_v2  ;;  %vm700_vm1 = vmor %vm698_vm9, %vm699_vm13 }
  0x2f   : > { %v2222_v12 = vpop.eup %1859  ;;  %v725_v13 = vmul.f32 0.5, %v724_v3  ;;  %v694_v14 = vmul.f32 %v2207_v0, %v693_v4  ;;  %v713_v15 = vmul.f32 %v1858_v7, %v2172_v45  ;;  %vm719_vm12 = vweird.f32 %v1858_v7  ;;  %vm740_vm14 = vmor %vm738_vm4, %vm739_vm10 }
  0x30   : > { %v705_v16 = vmul.f32 0.5, %v704_v8  ;;  %v734_v17 = vmul.f32 %v2212_v2, %v733_v10  ;;  %v683_v18 = vmul.f32 %v2222_v12, %v2181_v48  ;;  %vm720_vm15 = vmor %vm718_vm11, %vm719_vm12  ;;  %v655_v45 = vadd.f32 1e-05, %v647_v38  ;;  %v1862_v51 = vpop.eup %1861  ;;  %v894_v8 = vld [vmem:[%s2714_s4] sm:$0xff]  ;;  %v895_v10 = vld [vmem:[%s2714_s4 + $0x8] sm:$0xff] }
  0x31   : > { %v726_v19 = vsub.f32 1.5, %v725_v13  ;;  %v695_v20 = vmul.f32 0.5, %v694_v14  ;;  %v714_v21 = vmul.f32 %v1858_v7, %v713_v15  ;;  %vm689_vm3 = vweird.f32 %v2222_v12 }
  0x32   : > { %v706_v23 = vsub.f32 1.5, %v705_v16  ;;  %v735_v25 = vmul.f32 0.5, %v734_v17  ;;  %v684_v32 = vmul.f32 %v2222_v12, %v683_v18  ;;  %1863 = vrsqrt.f32 %v655_v45  ;;  %vm690_vm4 = vmor %vm688_vm2, %vm689_vm3 }
  0x33   : > { %v727_v29 = vmul.f32 %v1850_v58, %v726_v19  ;;  %v715_v31 = vmul.f32 0.5, %v714_v21  ;;  %v696_v34 = vsub.f32 1.5, %v695_v20  ;;  %v663_v42 = vmul.f32 %v1862_v51, %v2229_v22 }
  0x34   : > { %v707_v9 = vmul.f32 %v1852_v59, %v706_v23  ;;  %v736_v33 = vsub.f32 1.5, %v735_v25  ;;  %v685_v41 = vmul.f32 0.5, %v684_v32  ;;  %vm669_vm6 = vweird.f32 %v1862_v51  ;;  %v532_v23 = vld [vmem:[%s2317_s16 + $0x30] sm:$0xff] }
  0x35   : > { %v731_v35 = vsel %vm2233_vm7, %v1850_v58, %v727_v29  ;;  %v716_v36 = vsub.f32 1.5, %v715_v31  ;;  %v697_v44 = vmul.f32 %v2207_v0, %v696_v34  ;;  %v664_v55 = vmul.f32 %v1862_v51, %v663_v42  ;;  %v899_v58 = vld [vmem:[%s2714_s4 + $0x28] sm:$0xff]  ;;  %vm670_vm7 = vmor %vm668_vm5, %vm669_vm6  ;;  %v533_v31 = vld [vmem:[%s2317_s16 + $0x38] sm:$0xff] }
  0x36   : > { %v711_v37 = vsel %vm2242_vm8, %v1852_v59, %v707_v9  ;;  %822 = vperm.xlu1 %1845, %v731_v35   ;;  %873 = vperm.xlu0 %1844, %v843_v30   ;;  %v737_v39 = vmul.f32 %v2212_v2, %v736_v33  ;;  %v686_v50 = vsub.f32 1.5, %v685_v41  ;;  %vm678_vm8 = vweird.f32 %v655_v45  ;;  %v530_v30 = vld [vmem:[%s2317_s16 + $0x20] sm:$0xff]  ;;  %v964_v9 = vld [vmem:[%s2324_s18 + $0x30] sm:$0xff] }
  0x37   : > { %812 = vperm.xlu2 %1846, %v711_v37   ;;  %v717_v40 = vmul.f32 %v1858_v7, %v716_v36  ;;  %v701_v52 = vsel %vm700_vm1, %v2207_v0, %v697_v44  ;;  %v665_v48 = vmul.f32 0.5, %v664_v55  ;;  %v962_v55 = vld [vmem:[%s2324_s18 + $0x20] sm:$0xff]  ;;  %vm989_vm11 = vcmask 523264  }
  0x38   : > { %v741_v46 = vsel %vm740_vm14, %v2212_v2, %v737_v39  ;;  %v687_v43 = vmul.f32 %v2222_v12, %v686_v50  ;;  %v1864_v56 = vpop.eup %1863  ;;  %v896_v2 = vld [vmem:[%s2714_s4 + $0x10] sm:$0xff]  ;;  %vm1149_vm12 = vcmask 130048  }
  0x39   : > { %v721_v47 = vsel %vm720_vm15, %v1858_v7, %v717_v40  ;;  %v673_v57 = vmul.f32 %v1864_v56, %v655_v45  ;;  %v666_v59 = vsub.f32 1.5, %v665_v48  ;;  %vm679_vm9 = vweird.f32 %v1864_v56  ;;  %v838_v7 = vld [vmem:[%s2713_s3] sm:$0xff] }
  0x3a   : > { %v691_v54 = vsel %vm690_vm4, %v2222_v12, %v687_v43  ;;  %vm680_vm10 = vmor %vm678_vm8, %vm679_vm9 }
  0x3b   : > { %v674_v60 = vmul.f32 %v1864_v56, %v673_v57 }
  0x3d   : > { %v675_v62 = vmul.f32 0.5, %v674_v60 }
  0x3e   : > { %827 = vperm.xlu1 %1845, %v741_v46   ;;  %817 = vperm.xlu0 %1844, %v721_v47   ;;  %v531_v46 = vld [vmem:[%s2317_s16 + $0x28] sm:$0xff]  ;;  %v965_v47 = vld [vmem:[%s2324_s18 + $0x38] sm:$0xff] }
  0x3f   : > { %807 = vperm.xlu2 %1846, %v701_v52   ;;  %v676_v1 = vsub.f32 1.5, %v675_v62 }
  0x41   : > { %v677_v3 = vmul.f32 %v1864_v56, %v676_v1 }
  0x43   : > { %v681_v4 = vsel %vm680_vm10, %v1864_v56, %v677_v3 }
  0x46   : > { %924 = vperm.xlu0 %1844, %v898_v53   ;;  %802 = vperm.xlu1 %1845, %v691_v54  }
  0x47   : > { %744 = vperm.xlu2 %1846, %v2184_v49   ;;  %v667_v49 = vmul.f32 %v1862_v51, %v666_v59 }
  0x49   : > { %v671_v0 = vsel %vm670_vm7, %v1862_v51, %v667_v49 }
  0x4e   : > { %929 = vperm.xlu1 %1845, %v899_v58   ;;  %749 = vperm.xlu0 %1844, %v2217_v6   ;;  %v839_v6 = vld [vmem:[%s2713_s3 + $0x8] sm:$0xff] }
  0x4f   : > { %863 = vperm.xlu2 %1846, %v841_v61  }
  0x56   : > { %858 = vperm.xlu1 %1845, %v840_v63   ;;  %792 = vperm.xlu0 %1844, %v671_v0   ;;  %v528_v63 = vld [vmem:[%s2317_s16 + $0x10] sm:$0xff]  ;;  %v963_v0 = vld [vmem:[%s2324_s18 + $0x28] sm:$0xff] }
  0x57   : > { %914 = vperm.xlu2 %1846, %v896_v2  }
  0x5e   : > { %797 = vperm.xlu1 %1845, %v681_v4   ;;  %919 = vperm.xlu0 %1844, %v897_v5  }
  0x5f   : > { %853 = vperm.xlu2 %1846, %v839_v6   ;;  %v529_v6 = vld [vmem:[%s2317_s16 + $0x18] sm:$0xff] }
  0x66   : > { %848 = vperm.xlu1 %1845, %v838_v7   ;;  %904 = vperm.xlu0 %1844, %v894_v8  }
  0x68   : > { %v940_v11 = vpop.permute.xlu2 %939 }
  0x6e   : > { %909 = vperm.xlu1 %1845, %v895_v10  }
  0x78   : > { %v765_v12 = vpop.permute.xlu2 %764 }
  0x79   : > { %v786_v33 = vsub.f32 %v530_v30, %v765_v12 }
  0x7f   : > { %v884_v14 = vpop.permute.xlu1 %883 }
  0x80   : > { %v879_v13 = vpop.permute.xlu0 %878  ;;  %v770_v15 = vpop.permute.xlu2 %769 }
  0x81   : > { %v787_v42 = vsub.f32 %v531_v46, %v770_v15 }
  0x87   : > { %v935_v17 = vpop.permute.xlu1 %934 }
  0x88   : > { %v869_v18 = vpop.permute.xlu2 %868 }
  0x90   : > { %v775_v16 = vpop.permute.xlu0 %774 }
  0x91   : > { %v2311_v20 = vpop.permute.xlu1 %759  ;;  %v813_v22 = vpop.permute.xlu2 %812  ;;  %v788_v24 = vsub.f32 %v532_v23, %v775_v16  ;;  %v526_v23 = vld [vmem:[%s2317_s16] sm:$0xff] }
  0x92   : > { %v834_v40 = vmul.f32 %v813_v22, %v786_v33  ;;  %v785_v12 = vsub.f32 %v529_v6, %v2311_v20 }
  0x94   : > { %v890_v51 = vmul.f32 %v869_v18, %v834_v40 }
  0x98   : > { %v780_v19 = vpop.permute.xlu0 %779 }
  0x99   : > { %v808_v28 = vpop.permute.xlu2 %807  ;;  %v789_v34 = vsub.f32 %v533_v31, %v780_v19 }
  0x9a   : > { %v833_v15 = vmul.f32 %v808_v28, %v785_v12 }
  0xa0   : > { %v755_v21 = vpop.permute.xlu0 %754 }
  0xa1   : > { %v745_v44 = vpop.permute.xlu2 %744  ;;  %v784_v2 = vsub.f32 %v528_v63, %v755_v21 }
  0xa8   : > { %v823_v25 = vpop.permute.xlu1 %822  ;;  %v874_v26 = vpop.permute.xlu0 %873 }
  0xa9   : > { %v836_v27 = vmul.f32 %v823_v25, %v788_v24  ;;  %v864_v59 = vpop.permute.xlu2 %863  ;;  %v961_v24 = vld [vmem:[%s2324_s18 + $0x18] sm:$0xff] }
  0xab   : > { %v892_v29 = vmul.f32 %v879_v13, %v836_v27  ;;  %v527_v27 = vld [vmem:[%s2317_s16 + $0x8] sm:$0xff] }
  0xad   : > { %v948_v32 = vadd.f32 %v935_v17, %v892_v29  ;;  %v889_v17 = vmul.f32 %v864_v59, %v833_v15 }
  0xaf   : > { %v956_v35 = vmax.f32 %v948_v32, 0.0 }
  0xb0   : > { %v828_v36 = vpop.permute.xlu1 %827  ;;  %v818_v37 = vpop.permute.xlu0 %817 }
  0xb1   : > { %v837_v38 = vmul.f32 %v828_v36, %v789_v34  ;;  %v2335_v39 = vadd.f32 %v964_v9, %v956_v35  ;;  %v835_v56 = vmul.f32 %v818_v37, %v787_v42  ;;  %v958_v35 = vld [vmem:[%s2324_s18] sm:$0xff] }
  0xb2   : > { %v1007_v42 = vld [vmem:[%s2717_s7] sm:$0xff] }
  0xb3   : > { %v893_v41 = vmul.f32 %v884_v14, %v837_v38  ;;  %980 = vst [vmem:[%s2333_s21 + $0x30] sm:$0xff] %v2335_v39  ;;  %v891_v60 = vmul.f32 %v874_v26, %v835_v56  ;;  %v960_v14 = vld [vmem:[%s2324_s18 + $0x10] sm:$0xff]  ;;  %v782_v26 = vsub.f32 %v526_v23, %v745_v44 }
  0xb4   : > { %v1009_v56 = vld [vmem:[%s2717_s7 + $0x10] sm:$0xff] }
  0xb5   : > { %v949_v45 = vadd.f32 %v940_v11, %v893_v41  ;;  %v915_v11 = vpop.permute.xlu2 %914 }
  0xb7   : > { %v957_v50 = vmax.f32 %v949_v45, 0.0  ;;  %v959_v45 = vld [vmem:[%s2324_s18 + $0x8] sm:$0xff] }
  0xb8   : > { %v925_v52 = vpop.permute.xlu0 %924  ;;  %v803_v43 = vpop.permute.xlu1 %802 }
  0xb9   : > { %v946_v53 = vadd.f32 %v925_v52, %v890_v51  ;;  %v2341_v54 = vadd.f32 %v965_v47, %v957_v50  ;;  %v832_v4 = vmul.f32 %v803_v43, %v784_v2  ;;  %v982_v50 = vld [vmem:[%s2716_s6] sm:$0xff]  ;;  %v983_v51 = vld [vmem:[%s2716_s6 + $0x8] sm:$0xff] }
  0xba   : > { %v984_v43 = vpack.c.bf16 %v983_v51, %v982_v50 }
  0xbb   : > { %v954_v48 = vmax.f32 %v946_v53, 0.0  ;;  %981 = vst [vmem:[%s2333_s21 + $0x38] sm:$0xff] %v2341_v54  ;;  %v988_v57 = vpack.c.bf16 %v2341_v54, %v2335_v39  ;;  %v1008_v53 = vld [vmem:[%s2717_s7 + $0x8] sm:$0xff] }
  0xbd   : > { %v2348_v58 = vadd.f32 %v962_v55, %v954_v48  ;;  %997 = vmatpush.bf16.msra.mxu0 %v988_v57  ;;  %1083 = vmatpush.bf16.msra.mxu1 %v988_v57  ;;  %v854_v37 = vpop.permute.xlu2 %853  ;;  %v1015_v55 = vpack.c.bf16 %v1008_v53, %v1007_v42  ;;  %v1010_v48 = vld [vmem:[%s2717_s7 + $0x18] sm:$0xff] }
  0xbe   : > { %v1016_v57 = vpack.c.bf16 %v1010_v48, %v1009_v56 }
  0xbf   : > { %978 = vst [vmem:[%s2333_s21 + $0x20] sm:$0xff] %v2348_v58 }
  0xc0   : > { %v930_v61 = vpop.permute.xlu1 %929  ;;  %v750_v49 = vpop.permute.xlu0 %749 }
  0xc1   : > { %v947_v62 = vadd.f32 %v930_v61, %v891_v60  ;;  %v783_v31 = vsub.f32 %v527_v27, %v750_v49  ;;  %v1011_v60 = vld [vmem:[%s2717_s7 + $0x20] sm:$0xff]  ;;  %v1012_v61 = vld [vmem:[%s2717_s7 + $0x28] sm:$0xff] }
  0xc2   : > { %v1017_v63 = vpack.c.bf16 %v1012_v61, %v1011_v60 }
  0xc3   : > { %v955_v1 = vmax.f32 %v947_v62, 0.0 }
  0xc5   : > { %v2354_v3 = vadd.f32 %v963_v0, %v955_v1  ;;  %v1013_v0 = vld [vmem:[%s2717_s7 + $0x30] sm:$0xff]  ;;  %v1014_v1 = vld [vmem:[%s2717_s7 + $0x38] sm:$0xff] }
  0xc6   : > { %v1018_v2 = vpack.c.bf16 %v1014_v1, %v1013_v0 }
  0xc7   : > { %979 = vst [vmem:[%s2333_s21 + $0x28] sm:$0xff] %v2354_v3  ;;  %v987_v5 = vpack.c.bf16 %v2354_v3, %v2348_v58 }
  0xc8   : > { %v859_v7 = vpop.permute.xlu1 %858  ;;  %v793_v8 = vpop.permute.xlu0 %792 }
  0xc9   : > { %v888_v10 = vmul.f32 %v859_v7, %v832_v4  ;;  %998 = vmatpush.bf16.msra.mxu0 %v987_v5  ;;  %1084 = vmatpush.bf16.msra.mxu1 %v987_v5  ;;  %v830_v29 = vmul.f32 %v793_v8, %v782_v26 }
  0xcb   : > { %v944_v13 = vadd.f32 %v915_v11, %v888_v10 }
  0xcd   : > { %v952_v16 = vmax.f32 %v944_v13, 0.0 }
  0xcf   : > { %v2363_v18 = vadd.f32 %v960_v14, %v952_v16 }
  0xd0   : > { %v798_v19 = vpop.permute.xlu1 %797  ;;  %v920_v21 = vpop.permute.xlu0 %919 }
  0xd1   : > { %976 = vst [vmem:[%s2333_s21 + $0x10] sm:$0xff] %v2363_v18  ;;  %v945_v22 = vadd.f32 %v920_v21, %v889_v17  ;;  %v831_v33 = vmul.f32 %v798_v19, %v783_v31 }
  0xd3   : > { %v953_v25 = vmax.f32 %v945_v22, 0.0  ;;  %v887_v40 = vmul.f32 %v854_v37, %v831_v33 }
  0xd5   : > { %v2369_v20 = vadd.f32 %v961_v24, %v953_v25 }
  0xd7   : > { %977 = vst [vmem:[%s2333_s21 + $0x18] sm:$0xff] %v2369_v20  ;;  %v986_v28 = vpack.c.bf16 %v2369_v20, %v2363_v18 }
  0xd8   : > { %v849_v30 = vpop.permute.xlu1 %848  ;;  %v905_v9 = vpop.permute.xlu0 %904 }
  0xd9   : > { %v886_v32 = vmul.f32 %v849_v30, %v830_v29  ;;  %999 = vmatpush.bf16.msra.mxu0 %v986_v28  ;;  %1085 = vmatpush.bf16.msra.mxu1 %v986_v28 }
  0xdb   : > { %v942_v34 = vadd.f32 %v905_v9, %v886_v32 }
  0xdd   : > { %v950_v36 = vmax.f32 %v942_v34, 0.0 }
  0xdf   : > { %v2377_v38 = vadd.f32 %v958_v35, %v950_v36 }
  0xe0   : > { %v910_v41 = vpop.permute.xlu1 %909 }
  0xe1   : > { %974 = vst [vmem:[%s2333_s21] sm:$0xff] %v2377_v38  ;;  %v943_v44 = vadd.f32 %v910_v41, %v887_v40 }
  0xe3   : > { %v951_v46 = vmax.f32 %v943_v44, 0.0 }
  0xe5   : > { %v2382_v47 = vadd.f32 %v959_v45, %v951_v46 }
  0xe7   : > { %975 = vst [vmem:[%s2333_s21 + $0x8] sm:$0xff] %v2382_v47  ;;  %v985_v52 = vpack.c.bf16 %v2382_v47, %v2377_v38 }
  0xe9   : > { %1000 = vmatpush.bf16.msra.mxu0 %v985_v52  ;;  %1086 = vmatpush.bf16.msra.mxu1 %v985_v52 }
  0xec   : > { %1807 = vmatmul.msk.bf16.vlgmr.msra.gmra.mxu0 %vm989_vm11, %v984_v43  ;;  %1808 = vmatmul.msk.bf16.vlgmr.msra.gmra.mxu1 %vm989_vm11, %v1015_v55 }
  0xfc   : > { %1809 = vmatmul.msk.bf16.gmra.mxu1 %vm989_vm11, %v1016_v57 }
 0x10c   : > { %1810 = vmatmul.msk.bf16.gmra.mxu1 %vm989_vm11, %v1017_v63 }
 0x11c   : > { %1811 = vmatmul.msk.bf16.gmra.mxu1 %vm989_vm11, %v1018_v2 }
 0x169   : > { %v1002_v59 = vpop.f32.mrf.mxu0  ;;  %v2426_v16 = vpop.f32.mrf.mxu1 }
 0x16a   : > { %1108 = vxpose.xlu2.b32.start [1/2] (short) %v1002_v59, 128 }
 0x171   : > { %v1004_v49 = vpop.f32.mrf.mxu0  ;;  %v2429_v21 = vpop.f32.mrf.mxu1 }
 0x172   : > { %1109 = vxpose.xlu2.b32.end [2/2] (short) %v1004_v49, 128  ;;  %v1148_v62 = vpack.c.bf16 %v1004_v49, %v1002_v59 }
 0x174   : > { %1181 = vmatpush.bf16.msrb.mxu1 %v1148_v62  ;;  %1832 = vmatpush.bf16.msra.mxu2 %v1148_v62 }
 0x179   : > { %v2432_v24 = vpop.f32.mrf.mxu1 }
 0x181   : > { %v2434_v26 = vpop.f32.mrf.mxu1 }
 0x189   : > { %v2437_v30 = vpop.f32.mrf.mxu1 }
 0x191   : > { %v2439_v9 = vpop.f32.mrf.mxu1 }
 0x199   : > { %v2442_v34 = vpop.f32.mrf.mxu1 }
 0x1a1   : > { %v2445_v37 = vpop.f32.mrf.mxu1 }
 0x203   : > { %v1124_v4 = vpop.trf.xlu2 }
 0x20b   : > { %v1125_v5 = vpop.trf.xlu2 }
 0x20c   : > { %v1140_v6 = vpack.c.bf16 %v1125_v5, %v1124_v4 }
 0x20e   : > { %1812 = vmatmul.msk.bf16.vlgmr.msrb.gmra.mxu1 %vm1149_vm12, %v1140_v6 }
 0x213   : > { %v1126_v7 = vpop.trf.xlu2 }
 0x21b   : > { %v1127_v8 = vpop.trf.xlu2 }
 0x21c   : > { %v1141_v10 = vpack.c.bf16 %v1127_v8, %v1126_v7 }
 0x21e   : > { %1813 = vmatmul.msk.bf16.vlgmr.msra.gmra.mxu2 %vm1149_vm12, %v1141_v10 }
 0x223   : > { %v1128_v11 = vpop.trf.xlu2 }
 0x22b   : > { %v1129_v12 = vpop.trf.xlu2 }
 0x22c   : > { %v1142_v13 = vpack.c.bf16 %v1129_v12, %v1128_v11 }
 0x22e   : > { %1814 = vmatmul.msk.bf16.gmra.mxu2 %vm1149_vm12, %v1142_v13 }
 0x233   : > { %v1130_v14 = vpop.trf.xlu2 }
 0x23b   : > { %v1131_v15 = vpop.trf.xlu2 }
 0x23c   : > { %v1143_v17 = vpack.c.bf16 %v1131_v15, %v1130_v14 }
 0x23e   : > { %1815 = vmatmul.msk.bf16.gmra.mxu2 %vm1149_vm12, %v1143_v17 }
 0x243   : > { %v1132_v19 = vpop.trf.xlu2 }
 0x24b   : > { %v1133_v22 = vpop.trf.xlu2 }
 0x24c   : > { %v1144_v23 = vpack.c.bf16 %v1133_v22, %v1132_v19 }
 0x24e   : > { %1816 = vmatmul.msk.bf16.gmra.mxu2 %vm1149_vm12, %v1144_v23 }
 0x253   : > { %v1134_v25 = vpop.trf.xlu2 }
 0x25b   : > { %v1135_v27 = vpop.trf.xlu2 }
 0x25c   : > { %v1145_v29 = vpack.c.bf16 %v1135_v27, %v1134_v25 }
 0x25e   : > { %1817 = vmatmul.msk.bf16.gmra.mxu2 %vm1149_vm12, %v1145_v29 }
 0x263   : > { %v1136_v28 = vpop.trf.xlu2 }
 0x26b   : > { %v1137_v31 = vpop.trf.xlu2 }
 0x26c   : > { %v1146_v32 = vpack.c.bf16 %v1137_v31, %v1136_v28 }
 0x26e   : > { %1818 = vmatmul.msk.bf16.gmra.mxu2 %vm1149_vm12, %v1146_v32 }
 0x273   : > { %v1138_v33 = vpop.trf.xlu2 }
 0x27b   : > { %v1139_v35 = vpop.trf.xlu2 }
 0x27c   : > { %v1147_v36 = vpack.c.bf16 %v1139_v35, %v1138_v33 }
 0x27e   : > { %1819 = vmatmul.msk.bf16.gmra.mxu2 %vm1149_vm12, %v1147_v36 }
 0x28b   : > { %v1183_v40 = vpop.f32.mrf.mxu1 }
 0x28c   : > { %1223 = vmax.xlane.f32.xlu0 %v1183_v40 }
 0x293   : > { %v1185_v41 = vpop.f32.mrf.mxu1 }
 0x294   : > { %1225 = vmax.xlane.f32.xlu1 %v1185_v41 }
 0x2a1   : > { %v1188_v44 = vpop.f32.mrf.mxu2 }
 0x2a2   : > { %1227 = vmax.xlane.f32.xlu2 %v1188_v44 }
 0x2a9   : > { %v1190_v45 = vpop.f32.mrf.mxu2 }
 0x2aa   : > { %1229 = vmax.xlane.f32.xlu0 %v1190_v45 }
 0x2b1   : > { %v1193_v46 = vpop.f32.mrf.mxu2 }
 0x2b2   : > { %1231 = vmax.xlane.f32.xlu1 %v1193_v46 }
 0x2b9   : > { %v1195_v50 = vpop.f32.mrf.mxu2 }
 0x2ba   : > { %1233 = vmax.xlane.f32.xlu0 %v1195_v50 }
 0x2c1   : > { %v1198_v51 = vpop.f32.mrf.mxu2 }
 0x2c2   : > { %1235 = vmax.xlane.f32.xlu1 %v1198_v51 }
 0x2c9   : > { %v1200_v52 = vpop.f32.mrf.mxu2 }
 0x2ca   : > { %1237 = vmax.xlane.f32.xlu0 %v1200_v52 }
 0x2d1   : > { %v2447_v43 = vpop.f32.mrf.mxu2 }
 0x2d2   : > { %1239 = vmax.xlane.f32.xlu1 %v2447_v43 }
 0x2d9   : > { %v2450_v42 = vpop.f32.mrf.mxu2 }
 0x2da   : > { %1241 = vmax.xlane.f32.xlu0 %v2450_v42 }
 0x2e1   : > { %v2453_v53 = vpop.f32.mrf.mxu2 }
 0x2e2   : > { %1243 = vmax.xlane.f32.xlu1 %v2453_v53 }
 0x2e9   : > { %v2456_v55 = vpop.f32.mrf.mxu2 }
 0x2ea   : > { %1245 = vmax.xlane.f32.xlu0 %v2456_v55 }
 0x2f1   : > { %v2459_v56 = vpop.f32.mrf.mxu2 }
 0x2f2   : > { %1247 = vmax.xlane.f32.xlu1 %v2459_v56 }
 0x2f9   : > { %v2462_v48 = vpop.f32.mrf.mxu2 }
 0x2fa   : > { %1249 = vmax.xlane.f32.xlu0 %v2462_v48 }
 0x2ff   : > { %v1224_v57 = vpop.xlane.xlu0 %1223 }
 0x300   : > { %v1255_v59 = vsub.f32 %v1183_v40, %v1224_v57 }
 0x301   : > { %v2465_v60 = vpop.f32.mrf.mxu2 }
 0x302   : > { %v1271_v61 = vmul.f32 1.442695, %v1255_v59  ;;  %1251 = vmax.xlane.f32.xlu1 %v2465_v60 }
 0x304   : > { %1865 = vpow2.f32 %v1271_v61 }
 0x307   : > { %v1226_v49 = vpop.xlane.xlu1 %1225 }
 0x308   : > { %v1256_v62 = vsub.f32 %v1185_v41, %v1226_v49 }
 0x309   : > { %v2468_v63 = vpop.f32.mrf.mxu2 }
 0x30a   : > { %v2470_v0 = vpop.eup %1865  ;;  %v1273_v1 = vmul.f32 1.442695, %v1256_v62  ;;  %1253 = vmax.xlane.f32.xlu0 %v2468_v63 }
 0x30b   : > { %1303 = vadd.xlane.f32.xlu1 %v2470_v0 }
 0x30c   : > { %1867 = vpow2.f32 %v1273_v1 }
 0x312   : > { %v2474_v2 = vpop.eup %1867 }
 0x313   : > { %1305 = vadd.xlane.f32.xlu0 %v2474_v2 }
 0x315   : > { %v1228_v4 = vpop.xlane.xlu2 %1227 }
 0x316   : > { %v1257_v5 = vsub.f32 %v1188_v44, %v1228_v4 }
 0x318   : > { %v1275_v6 = vmul.f32 1.442695, %v1257_v5 }
 0x31a   : > { %1869 = vpow2.f32 %v1275_v6 }
 0x31d   : > { %v1230_v7 = vpop.xlane.xlu0 %1229 }
 0x31e   : > { %v1258_v8 = vsub.f32 %v1190_v45, %v1230_v7 }
 0x320   : > { %v2477_v10 = vpop.eup %1869  ;;  %v1277_v11 = vmul.f32 1.442695, %v1258_v8 }
 0x321   : > { %1307 = vadd.xlane.f32.xlu1 %v2477_v10 }
 0x322   : > { %1871 = vpow2.f32 %v1277_v11 }
 0x325   : > { %v1232_v12 = vpop.xlane.xlu1 %1231 }
 0x326   : > { %v1259_v13 = vsub.f32 %v1193_v46, %v1232_v12 }
 0x328   : > { %v2480_v14 = vpop.eup %1871  ;;  %v1279_v15 = vmul.f32 1.442695, %v1259_v13 }
 0x329   : > { %1309 = vadd.xlane.f32.xlu0 %v2480_v14 }
 0x32a   : > { %1873 = vpow2.f32 %v1279_v15 }
 0x32d   : > { %v1234_v17 = vpop.xlane.xlu0 %1233 }
 0x32e   : > { %v1260_v19 = vsub.f32 %v1195_v50, %v1234_v17 }
 0x330   : > { %v2483_v22 = vpop.eup %1873  ;;  %v1281_v23 = vmul.f32 1.442695, %v1260_v19 }
 0x331   : > { %1311 = vadd.xlane.f32.xlu1 %v2483_v22 }
 0x332   : > { %1875 = vpow2.f32 %v1281_v23 }
 0x335   : > { %v1236_v25 = vpop.xlane.xlu1 %1235 }
 0x336   : > { %v1261_v27 = vsub.f32 %v1198_v51, %v1236_v25  ;;  %v1020_v25 = vld [vmem:[%s2718_s8 + $0x8] sm:$0xff] }
 0x338   : > { %v2486_v29 = vpop.eup %1875  ;;  %v1283_v28 = vmul.f32 1.442695, %v1261_v27  ;;  %v1022_v27 = vld [vmem:[%s2718_s8 + $0x18] sm:$0xff] }
 0x339   : > { %1313 = vadd.xlane.f32.xlu0 %v2486_v29 }
 0x33a   : > { %1877 = vpow2.f32 %v1283_v28  ;;  %v1023_v28 = vld [vmem:[%s2718_s8 + $0x20] sm:$0xff] }
 0x33d   : > { %v1238_v31 = vpop.xlane.xlu0 %1237 }
 0x33e   : > { %v1262_v32 = vsub.f32 %v1200_v52, %v1238_v31  ;;  %v1024_v31 = vld [vmem:[%s2718_s8 + $0x28] sm:$0xff] }
 0x340   : > { %v2489_v33 = vpop.eup %1877  ;;  %v1285_v35 = vmul.f32 1.442695, %v1262_v32  ;;  %v1025_v32 = vld [vmem:[%s2718_s8 + $0x30] sm:$0xff] }
 0x341   : > { %1315 = vadd.xlane.f32.xlu1 %v2489_v33 }
 0x342   : > { %1879 = vpow2.f32 %v1285_v35  ;;  %v1026_v35 = vld [vmem:[%s2718_s8 + $0x38] sm:$0xff] }
 0x345   : > { %v1240_v36 = vpop.xlane.xlu1 %1239 }
 0x346   : > { %v1263_v40 = vsub.f32 %v2447_v43, %v1240_v36  ;;  %v1471_v36 = vld [vmem:[%s2720_s10] sm:$0xff] }
 0x348   : > { %v2493_v41 = vpop.eup %1879  ;;  %v1287_v44 = vmul.f32 1.442695, %v1263_v40  ;;  %v1472_v40 = vld [vmem:[%s2720_s10 + $0x8] sm:$0xff] }
 0x349   : > { %1317 = vadd.xlane.f32.xlu0 %v2493_v41 }
 0x34a   : > { %1881 = vpow2.f32 %v1287_v44 }
 0x34d   : > { %v1242_v45 = vpop.xlane.xlu0 %1241 }
 0x34e   : > { %v1264_v46 = vsub.f32 %v2450_v42, %v1242_v45  ;;  %v1473_v45 = vld [vmem:[%s2720_s10 + $0x10] sm:$0xff] }
 0x350   : > { %v2497_v50 = vpop.eup %1881  ;;  %v1289_v51 = vmul.f32 1.442695, %v1264_v46 }
 0x351   : > { %1319 = vadd.xlane.f32.xlu1 %v2497_v50 }
 0x352   : > { %1883 = vpow2.f32 %v1289_v51  ;;  %v1474_v51 = vld [vmem:[%s2720_s10 + $0x18] sm:$0xff] }
 0x355   : > { %v1244_v52 = vpop.xlane.xlu1 %1243 }
 0x356   : > { %v1265_v57 = vsub.f32 %v2453_v53, %v1244_v52 }
 0x358   : > { %v2501_v59 = vpop.eup %1883  ;;  %v1291_v43 = vmul.f32 1.442695, %v1265_v57  ;;  %v1475_v57 = vld [vmem:[%s2720_s10 + $0x20] sm:$0xff] }
 0x359   : > { %1321 = vadd.xlane.f32.xlu0 %v2501_v59 }
 0x35a   : > { %1885 = vpow2.f32 %v1291_v43 }
 0x35d   : > { %v1246_v61 = vpop.xlane.xlu0 %1245 }
 0x35e   : > { %v1266_v49 = vsub.f32 %v2456_v55, %v1246_v61  ;;  %v1476_v61 = vld [vmem:[%s2720_s10 + $0x28] sm:$0xff] }
 0x360   : > { %v2505_v62 = vpop.eup %1885  ;;  %v1293_v42 = vmul.f32 1.442695, %v1266_v49 }
 0x361   : > { %1323 = vadd.xlane.f32.xlu1 %v2505_v62 }
 0x362   : > { %1887 = vpow2.f32 %v1293_v42  ;;  %v1477_v42 = vld [vmem:[%s2720_s10 + $0x30] sm:$0xff] }
 0x365   : > { %v1248_v1 = vpop.xlane.xlu1 %1247 }
 0x366   : > { %v1267_v4 = vsub.f32 %v2459_v56, %v1248_v1 }
 0x368   : > { %v2509_v5 = vpop.eup %1887  ;;  %v1295_v53 = vmul.f32 1.442695, %v1267_v4  ;;  %v1478_v4 = vld [vmem:[%s2720_s10 + $0x38] sm:$0xff] }
 0x369   : > { %1325 = vadd.xlane.f32.xlu0 %v2509_v5 }
 0x36a   : > { %1889 = vpow2.f32 %v1295_v53 }
 0x36d   : > { %v1250_v6 = vpop.xlane.xlu0 %1249 }
 0x36e   : > { %v1268_v7 = vsub.f32 %v2462_v48, %v1250_v6 }
 0x370   : > { %v2513_v8 = vpop.eup %1889  ;;  %v1297_v55 = vmul.f32 1.442695, %v1268_v7 }
 0x371   : > { %1327 = vadd.xlane.f32.xlu1 %v2513_v8 }
 0x372   : > { %1891 = vpow2.f32 %v1297_v55 }
 0x375   : > { %v1252_v11 = vpop.xlane.xlu1 %1251 }
 0x376   : > { %v1269_v12 = vsub.f32 %v2465_v60, %v1252_v11  ;;  %v1019_v60 = vld [vmem:[%s2718_s8] sm:$0xff] }
 0x378   : > { %v2517_v13 = vpop.eup %1891  ;;  %v1299_v56 = vmul.f32 1.442695, %v1269_v12 }
 0x379   : > { %1329 = vadd.xlane.f32.xlu0 %v2517_v13 }
 0x37a   : > { %1893 = vpow2.f32 %v1299_v56 }
 0x37d   : > { %v1254_v15 = vpop.xlane.xlu0 %1253 }
 0x37e   : > { %v1270_v17 = vsub.f32 %v2468_v63, %v1254_v15  ;;  %v1021_v63 = vld [vmem:[%s2718_s8 + $0x10] sm:$0xff]  ;;  %v1304_v44 = vpop.xlane.xlu1 %1303 }
 0x380   : > { %v2521_v19 = vpop.eup %1893  ;;  %v1301_v48 = vmul.f32 1.442695, %v1270_v17 }
 0x381   : > { %1331 = vadd.xlane.f32.xlu1 %v2521_v19 }
 0x382   : > { %1895 = vpow2.f32 %v1301_v48 }
 0x386   : > { %v1306_v46 = vpop.xlane.xlu0 %1305 }
 0x387   : > { %1897 = vrcp.f32 %v1306_v46 }
 0x388   : > { %v2524_v23 = vpop.eup %1895  ;;  %1899 = vrcp.f32 %v1304_v44 }
 0x389   : > { %1333 = vadd.xlane.f32.xlu0 %v2524_v23 }
 0x38d   : > { %v1898_v11 = vpop.eup %1897 }
 0x38e   : > { %v1900_v12 = vpop.eup %1899  ;;  %v2576_v17 = vmul.f32 %v1898_v11, %v2474_v2 }
 0x394   : > { %v1308_v52 = vpop.xlane.xlu1 %1307 }
 0x395   : > { %1901 = vrcp.f32 %v1308_v52 }
 0x39a   : > { %1029 = vperm.xlu1 %1845, %v1019_v60   ;;  %v2579_v60 = vmul.f32 %v1900_v12, %v2470_v0 }
 0x39b   : > { %v1902_v15 = vpop.eup %1901 }
 0x39c   : > { %v1310_v43 = vpop.xlane.xlu0 %1309 }
 0x39d   : > { %1034 = vperm.xlu0 %1844, %v1020_v25   ;;  %1903 = vrcp.f32 %v1310_v43  ;;  %v2582_v25 = vmul.f32 %v1902_v15, %v2477_v10 }
 0x3a2   : > { %1039 = vperm.xlu1 %1845, %v1021_v63  }
 0x3a3   : > { %v1904_v48 = vpop.eup %1903 }
 0x3a4   : > { %v1312_v49 = vpop.xlane.xlu1 %1311 }
 0x3a5   : > { %1044 = vperm.xlu0 %1844, %v1022_v27   ;;  %1905 = vrcp.f32 %v1312_v49  ;;  %v1367_v27 = vadd.f32 %v2576_v17, %v2579_v60 }
 0x3a7   : > { %v1368_v2 = vadd.f32 %v1367_v27, %v2582_v25 }
 0x3aa   : > { %1049 = vperm.xlu1 %1845, %v1023_v28   ;;  %v2587_v28 = vmul.f32 %v1904_v48, %v2480_v14 }
 0x3ab   : > { %v1906_v63 = vpop.eup %1905 }
 0x3ac   : > { %v1314_v1 = vpop.xlane.xlu0 %1313  ;;  %v1369_v10 = vadd.f32 %v1368_v2, %v2587_v28 }
 0x3ad   : > { %1054 = vperm.xlu0 %1844, %v1024_v31   ;;  %1907 = vrcp.f32 %v1314_v1 }
 0x3b2   : > { %1059 = vperm.xlu1 %1845, %v1025_v32  }
 0x3b3   : > { %v1908_v32 = vpop.eup %1907 }
 0x3b4   : > { %v1316_v53 = vpop.xlane.xlu1 %1315 }
 0x3b5   : > { %1064 = vperm.xlu0 %1844, %v1026_v35   ;;  %1909 = vrcp.f32 %v1316_v53  ;;  %v2591_v35 = vmul.f32 %v1906_v63, %v2483_v22 }
 0x3b7   : > { %v1370_v14 = vadd.f32 %v1369_v10, %v2591_v35 }
 0x3ba   : > { %1481 = vperm.xlu1 %1845, %v1471_v36  }
 0x3bb   : > { %v1910_v36 = vpop.eup %1909 }
 0x3bc   : > { %v1318_v6 = vpop.xlane.xlu0 %1317 }
 0x3bd   : > { %1486 = vperm.xlu0 %1844, %v1472_v40   ;;  %1911 = vrcp.f32 %v1318_v6  ;;  %v2595_v40 = vmul.f32 %v1908_v32, %v2486_v29 }
 0x3c2   : > { %1491 = vperm.xlu1 %1845, %v1473_v45   ;;  %v1357_v45 = vmul.f32 %v1910_v36, %v2489_v33 }
 0x3c3   : > { %v1912_v44 = vpop.eup %1911 }
 0x3c4   : > { %v1320_v7 = vpop.xlane.xlu1 %1319  ;;  %v1358_v22 = vmul.f32 %v1912_v44, %v2493_v41 }
 0x3c5   : > { %1496 = vperm.xlu0 %1844, %v1474_v51   ;;  %1913 = vrcp.f32 %v1320_v7  ;;  %v1371_v51 = vadd.f32 %v1370_v14, %v2595_v40 }
 0x3c7   : > { %v1372_v43 = vadd.f32 %v1371_v51, %v1357_v45 }
 0x3ca   : > { %1501 = vperm.xlu1 %1845, %v1475_v57  }
 0x3cb   : > { %v1914_v46 = vpop.eup %1913 }
 0x3cc   : > { %v1322_v55 = vpop.xlane.xlu0 %1321 }
 0x3cd   : > { %1506 = vperm.xlu0 %1844, %v1476_v61   ;;  %1915 = vrcp.f32 %v1322_v55  ;;  %v1359_v61 = vmul.f32 %v1914_v46, %v2497_v50 }
 0x3d2   : > { %1511 = vperm.xlu1 %1845, %v1477_v42   ;;  %v1373_v42 = vadd.f32 %v1372_v43, %v1358_v22 }
 0x3d3   : > { %v1916_v57 = vpop.eup %1915 }
 0x3d4   : > { %v1324_v56 = vpop.xlane.xlu1 %1323  ;;  %v1360_v1 = vmul.f32 %v1916_v57, %v2501_v59  ;;  %v1374_v33 = vadd.f32 %v1373_v42, %v1359_v61 }
 0x3d5   : > { %1516 = vperm.xlu0 %1844, %v1478_v4   ;;  %1917 = vrcp.f32 %v1324_v56 }
 0x3d6   : > { %v1375_v7 = vadd.f32 %v1374_v33, %v1360_v1 }
 0x3db   : > { %v1918_v49 = vpop.eup %1917 }
 0x3dc   : > { %v1326_v31 = vpop.xlane.xlu0 %1325  ;;  %v1361_v53 = vmul.f32 %v1918_v49, %v2505_v62 }
 0x3dd   : > { %1919 = vrcp.f32 %v1326_v31 }
 0x3de   : > { %v1376_v11 = vadd.f32 %v1375_v7, %v1361_v53 }
 0x3e3   : > { %v1920_v4 = vpop.eup %1919 }
 0x3e4   : > { %v1328_v0 = vpop.xlane.xlu1 %1327  ;;  %v1362_v41 = vmul.f32 %v1920_v4, %v2509_v5 }
 0x3e5   : > { %1921 = vrcp.f32 %v1328_v0 }
 0x3e6   : > { %v1377_v15 = vadd.f32 %v1376_v11, %v1362_v41 }
 0x3eb   : > { %v1922_v6 = vpop.eup %1921 }
 0x3ec   : > { %v1330_v52 = vpop.xlane.xlu0 %1329  ;;  %v1363_v12 = vmul.f32 %v1922_v6, %v2513_v8 }
 0x3ed   : > { %1923 = vrcp.f32 %v1330_v52 }
 0x3ee   : > { %v1378_v59 = vadd.f32 %v1377_v15, %v1363_v12 }
 0x3f3   : > { %v1924_v55 = vpop.eup %1923 }
 0x3f4   : > { %v1332_v29 = vpop.xlane.xlu1 %1331  ;;  %v1364_v48 = vmul.f32 %v1924_v55, %v2517_v13 }
 0x3f5   : > { %1925 = vrcp.f32 %v1332_v29 }
 0x3f6   : > { %v1379_v27 = vadd.f32 %v1378_v59, %v1364_v48 }
 0x3fb   : > { %v1926_v56 = vpop.eup %1925 }
 0x3fc   : > { %v1334_v50 = vpop.xlane.xlu0 %1333  ;;  %v1365_v63 = vmul.f32 %v1926_v56, %v2521_v19 }
 0x3fd   : > { %1927 = vrcp.f32 %v1334_v50 }
 0x3fe   : > { %v1380_v32 = vadd.f32 %v1379_v27, %v1365_v63 }
 0x403   : > { %v1928_v31 = vpop.eup %1927 }
 0x404   : > { %v1366_v62 = vmul.f32 %v1928_v31, %v2524_v23 }
 0x406   : > { %v1381_v2 = vadd.f32 %v1380_v32, %v1366_v62 }
 0x408   : > { %v1382_v5 = vrot.slane %v1381_v2, 4 }
 0x40a   : > { %v1383_v0 = vadd.f32 %v1382_v5, %v1381_v2 }
 0x40c   : > { %v1384_v36 = vrot.slane %v1383_v0, 2 }
 0x40e   : > { %v1385_v10 = vadd.f32 %v1384_v36, %v1383_v0 }
 0x410   : > { %v1386_v8 = vrot.slane %v1385_v10, 1 }
 0x412   : > { %v1387_v44 = vadd.f32 %v1386_v8, %v1385_v10 }
 0x414   : > { %v1388_v14 = vadd.f32 1e-09, %v1387_v44 }
 0x416   : > { %1929 = vrcp.f32 %v1388_v14 }
 0x41c   : > { %v1930_v46 = vpop.eup %1929 }
 0x41d   : > { %v1404_v51 = vmul.f32 %v1930_v46, %v1365_v63  ;;  %v1405_v13 = vmul.f32 %v1930_v46, %v1366_v62  ;;  %v1402_v57 = vmul.f32 %v1930_v46, %v1363_v12  ;;  %v1403_v19 = vmul.f32 %v1930_v46, %v1364_v48 }
 0x41e   : > { %v1400_v29 = vmul.f32 %v1930_v46, %v1361_v53  ;;  %v1401_v23 = vmul.f32 %v1930_v46, %v1362_v41  ;;  %v1398_v42 = vmul.f32 %v1930_v46, %v1359_v61  ;;  %v1399_v4 = vmul.f32 %v1930_v46, %v1360_v1  ;;  %v1035_v41 = vpop.permute.xlu0 %1034 }
 0x41f   : > { %v1417_v52 = vpack.c.bf16 %v1405_v13, %v1404_v51  ;;  %v1416_v43 = vpack.c.bf16 %v1403_v19, %v1402_v57  ;;  %v1396_v6 = vmul.f32 %v1930_v46, %v1357_v45  ;;  %v1397_v7 = vmul.f32 %v1930_v46, %v1358_v22  ;;  %v1030_v22 = vpop.permute.xlu1 %1029 }
 0x420   : > { %v1415_v49 = vpack.c.bf16 %v1401_v23, %v1400_v29  ;;  %v1414_v33 = vpack.c.bf16 %v1399_v4, %v1398_v42  ;;  %v1394_v11 = vmul.f32 %v1930_v46, %v2591_v35  ;;  %v1395_v50 = vmul.f32 %v1930_v46, %v2595_v40  ;;  %v1452_v23 = vld [vmem:[%s2719_s9 + $0x28] sm:$0xff]  ;;  %v1453_v42 = vld [vmem:[%s2719_s9 + $0x30] sm:$0xff]  ;;  %v1454_v4 = vld [vmem:[%s2719_s9 + $0x38] sm:$0xff] }
 0x421   : > { %1418 = vmatpush.bf16.msra.mxu3 %v1417_v52  ;;  %v1413_v55 = vpack.c.bf16 %v1397_v7, %v1396_v6  ;;  %v1392_v56 = vmul.f32 %v1930_v46, %v2582_v25  ;;  %v1393_v53 = vmul.f32 %v1930_v46, %v2587_v28  ;;  %v1390_v1 = vmul.f32 %v1930_v46, %v2579_v60 }
 0x422   : > { %v1412_v12 = vpack.c.bf16 %v1395_v50, %v1394_v11  ;;  %v1391_v45 = vmul.f32 %v1930_v46, %v2576_v17  ;;  %v1091_v15 = vadd.f32 %v2429_v21, %v1035_v41  ;;  %v1089_v40 = vadd.f32 %v2426_v16, %v1030_v22 }
 0x423   : > { %v1411_v61 = vpack.c.bf16 %v1393_v53, %v1392_v56 }
 0x424   : > { %v1410_v35 = vpack.c.bf16 %v1391_v45, %v1390_v1  ;;  %v1406_v48 = vpack.c.bf16 %v1091_v15, %v1089_v40 }
 0x425   : > { %1419 = vmatpush.bf16.msra.mxu3 %v1416_v43 }
 0x426   : > { %v1045_v25 = vpop.permute.xlu0 %1044 }
 0x427   : > { %v1040_v59 = vpop.permute.xlu1 %1039  ;;  %v1096_v28 = vadd.f32 %v2434_v26, %v1045_v25 }
 0x428   : > { %v1094_v63 = vadd.f32 %v2432_v24, %v1040_v59 }
 0x429   : > { %1420 = vmatpush.bf16.msra.mxu3 %v1415_v49 }
 0x42a   : > { %v1407_v27 = vpack.c.bf16 %v1096_v28, %v1094_v63 }
 0x42d   : > { %1421 = vmatpush.bf16.msra.mxu3 %v1414_v33  ;;  %v1466_v33 = vpack.c.bf16 %v1454_v4, %v1453_v42 }
 0x42e   : > { %v1055_v60 = vpop.permute.xlu0 %1054 }
 0x42f   : > { %v1050_v17 = vpop.permute.xlu1 %1049  ;;  %v1101_v31 = vadd.f32 %v2439_v9, %v1055_v60 }
 0x430   : > { %v1099_v21 = vadd.f32 %v2437_v30, %v1050_v17 }
 0x431   : > { %1422 = vmatpush.bf16.msra.mxu3 %v1413_v55 }
 0x432   : > { %v1408_v62 = vpack.c.bf16 %v1101_v31, %v1099_v21 }
 0x435   : > { %1423 = vmatpush.bf16.msra.mxu3 %v1412_v12 }
 0x436   : > { %v1065_v16 = vpop.permute.xlu0 %1064 }
 0x437   : > { %v1060_v32 = vpop.permute.xlu1 %1059  ;;  %v1106_v2 = vadd.f32 %v2445_v37, %v1065_v16 }
 0x438   : > { %v1104_v5 = vadd.f32 %v2442_v34, %v1060_v32 }
 0x439   : > { %1424 = vmatpush.bf16.msra.mxu3 %v1411_v61 }
 0x43a   : > { %v1409_v0 = vpack.c.bf16 %v1106_v2, %v1104_v5 }
 0x43d   : > { %1425 = vmatpush.bf16.msra.mxu3 %v1410_v35 }
 0x43e   : > { %v1487_v50 = vpop.permute.xlu0 %1486 }
 0x43f   : > { %v1482_v6 = vpop.permute.xlu1 %1481 }
 0x440   : > { %1426 = vmatmul.bf16.vlgmr.msra.gmra.mxu3 %v1406_v48 }
 0x446   : > { %v1497_v22 = vpop.permute.xlu0 %1496 }
 0x447   : > { %v1492_v53 = vpop.permute.xlu1 %1491 }
 0x44e   : > { %v1507_v63 = vpop.permute.xlu0 %1506 }
 0x44f   : > { %v1502_v40 = vpop.permute.xlu1 %1501 }
 0x450   : > { %1431 = vmatmul.bf16.gmra.mxu3 %v1407_v27 }
 0x456   : > { %v1517_v16 = vpop.permute.xlu0 %1516 }
 0x457   : > { %v1512_v17 = vpop.permute.xlu1 %1511 }
 0x460   : > { %1436 = vmatmul.bf16.gmra.mxu3 %v1408_v62 }
 0x470   : > { %1441 = vmatmul.bf16.gmra.mxu3 %v1409_v0 }
 0x4c3   : > { %v1427_v26 = vpop.f32.mrf.mxu3 }
 0x4c4   : > { %v1455_v29 = vsub.f32 %v2377_v38, %v1427_v26 }
 0x4cb   : > { %v1429_v24 = vpop.f32.mrf.mxu3 }
 0x4cc   : > { %v1456_v19 = vsub.f32 %v2382_v47, %v1429_v24  ;;  %v1451_v47 = vld [vmem:[%s2719_s9 + $0x20] sm:$0xff] }
 0x4cd   : > { %v1465_v49 = vpack.c.bf16 %v1452_v23, %v1451_v47 }
 0x4d3   : > { %v1432_v36 = vpop.f32.mrf.mxu3 }
 0x4d4   : > { %v1457_v57 = vsub.f32 %v2363_v18, %v1432_v36  ;;  %v1449_v18 = vld [vmem:[%s2719_s9 + $0x10] sm:$0xff] }
 0x4db   : > { %v1434_v10 = vpop.f32.mrf.mxu3 }
 0x4dc   : > { %v1458_v34 = vsub.f32 %v2369_v20, %v1434_v10  ;;  %v1450_v20 = vld [vmem:[%s2719_s9 + $0x18] sm:$0xff] }
 0x4dd   : > { %v1464_v38 = vpack.c.bf16 %v1450_v20, %v1449_v18 }
 0x4de   : > { %v1468_v43 = vpack.c.bf16 %v1458_v34, %v1457_v57 }
 0x4e3   : > { %v1437_v8 = vpop.f32.mrf.mxu3 }
 0x4e4   : > { %v1459_v37 = vsub.f32 %v2348_v58, %v1437_v8  ;;  %v1467_v58 = vpack.c.bf16 %v1456_v19, %v1455_v29 }
 0x4eb   : > { %v1439_v44 = vpop.f32.mrf.mxu3 }
 0x4ec   : > { %v1460_v51 = vsub.f32 %v2354_v3, %v1439_v44 }
 0x4ee   : > { %v1469_v52 = vpack.c.bf16 %v1460_v51, %v1459_v37 }
 0x4f3   : > { %v1442_v14 = vpop.f32.mrf.mxu3 }
 0x4f4   : > { %v1461_v30 = vsub.f32 %v2335_v39, %v1442_v14  ;;  %v1447_v39 = vld [vmem:[%s2719_s9] sm:$0xff] }
 0x4fb   : > { %v1444_v9 = vpop.f32.mrf.mxu3 }
 0x4fc   : > { %v1462_v46 = vsub.f32 %v2341_v54, %v1444_v9  ;;  %v1448_v54 = vld [vmem:[%s2719_s9 + $0x8] sm:$0xff] }
 0x4fd   : > { %v1463_v3 = vpack.c.bf16 %v1448_v54, %v1447_v39 }
 0x4fe   : > { %v1470_v13 = vpack.c.bf16 %v1462_v46, %v1461_v30 }
 0x500   : > { %1535 = vmatpush.bf16.msrb.mxu0 %v1470_v13 }
 0x504   : > { %1536 = vmatpush.bf16.msrb.mxu0 %v1469_v52 }
 0x508   : > { %1537 = vmatpush.bf16.msrb.mxu0 %v1468_v43 }
 0x50c   : > { %1538 = vmatpush.bf16.msrb.mxu0 %v1467_v58 }
 0x50f   : > { %1820 = vmatmul.msk.bf16.vlgmr.msrb.gmra.mxu0 %vm989_vm11, %v1463_v3 }
 0x51f   : > { %1821 = vmatmul.msk.bf16.gmra.mxu0 %vm989_vm11, %v1464_v38 }
 0x52f   : > { %1822 = vmatmul.msk.bf16.gmra.mxu0 %vm989_vm11, %v1465_v49 }
 0x53f   : > { %1823 = vmatmul.msk.bf16.gmra.mxu0 %vm989_vm11, %v1466_v33 }
 0x58c   : > { %v1540_v7 = vpop.f32.mrf.mxu0 }
 0x58d   : > { %v1541_v55 = vadd.f32 %v1540_v7, %v1482_v6 }
 0x58f   : > { %1560 = vst [vmem:[%s2663_s22] sm:$0xff] %v1541_v55  ;;  %1568 = vadd.xlane.f32.xlu1 %v1541_v55  ;;  %v1584_v11 = vmul.f32 %v1541_v55, %v1541_v55 }
 0x591   : > { %1592 = vadd.xlane.f32.xlu2 %v1584_v11 }
 0x594   : > { %v1542_v12 = vpop.f32.mrf.mxu0 }
 0x595   : > { %v1543_v56 = vadd.f32 %v1542_v12, %v1487_v50 }
 0x597   : > { %1561 = vst [vmem:[%s2663_s22 + $0x8] sm:$0xff] %v1543_v56  ;;  %1570 = vadd.xlane.f32.xlu0 %v1543_v56  ;;  %v1585_v1 = vmul.f32 %v1543_v56, %v1543_v56 }
 0x59c   : > { %v1545_v41 = vpop.f32.mrf.mxu0 }
 0x59d   : > { %v1546_v61 = vadd.f32 %v1545_v41, %v1492_v53 }
 0x59f   : > { %1562 = vst [vmem:[%s2663_s22 + $0x10] sm:$0xff] %v1546_v61  ;;  %1594 = vadd.xlane.f32.xlu0 %v1585_v1  ;;  %1572 = vadd.xlane.f32.xlu2 %v1546_v61  ;;  %v1586_v45 = vmul.f32 %v1546_v61, %v1546_v61 }
 0x5a1   : > { %1596 = vadd.xlane.f32.xlu1 %v1586_v45 }
 0x5a4   : > { %v1547_v15 = vpop.f32.mrf.mxu0 }
 0x5a5   : > { %v1548_v35 = vadd.f32 %v1547_v15, %v1497_v22 }
 0x5a7   : > { %1563 = vst [vmem:[%s2663_s22 + $0x18] sm:$0xff] %v1548_v35  ;;  %1574 = vadd.xlane.f32.xlu2 %v1548_v35  ;;  %v1587_v59 = vmul.f32 %v1548_v35, %v1548_v35 }
 0x5ac   : > { %v1550_v48 = vpop.f32.mrf.mxu0 }
 0x5ad   : > { %v1551_v25 = vadd.f32 %v1550_v48, %v1502_v40 }
 0x5af   : > { %1564 = vst [vmem:[%s2663_s22 + $0x20] sm:$0xff] %v1551_v25  ;;  %1598 = vadd.xlane.f32.xlu2 %v1587_v59  ;;  %1576 = vadd.xlane.f32.xlu1 %v1551_v25  ;;  %v1588_v28 = vmul.f32 %v1551_v25, %v1551_v25 }
 0x5b1   : > { %1600 = vadd.xlane.f32.xlu0 %v1588_v28 }
 0x5b4   : > { %v1552_v27 = vpop.f32.mrf.mxu0 }
 0x5b5   : > { %v1553_v60 = vadd.f32 %v1552_v27, %v1507_v63 }
 0x5b7   : > { %1565 = vst [vmem:[%s2663_s22 + $0x28] sm:$0xff] %v1553_v60  ;;  %1578 = vadd.xlane.f32.xlu2 %v1553_v60  ;;  %v1589_v0 = vmul.f32 %v1553_v60, %v1553_v60 }
 0x5bc   : > { %v1555_v31 = vpop.f32.mrf.mxu0 }
 0x5bd   : > { %v1556_v21 = vadd.f32 %v1555_v31, %v1512_v17 }
 0x5bf   : > { %1566 = vst [vmem:[%s2663_s22 + $0x30] sm:$0xff] %v1556_v21  ;;  %1580 = vadd.xlane.f32.xlu0 %v1556_v21  ;;  %v1590_v62 = vmul.f32 %v1556_v21, %v1556_v21 }
 0x5c1   : > { %1604 = vadd.xlane.f32.xlu2 %v1590_v62 }
 0x5c4   : > { %v1557_v32 = vpop.f32.mrf.mxu0 }
 0x5c5   : > { %v1558_v2 = vadd.f32 %v1557_v32, %v1517_v16 }
 0x5c7   : > { %1567 = vst [vmem:[%s2663_s22 + $0x38] sm:$0xff] %v1558_v2  ;;  %1582 = vadd.xlane.f32.xlu1 %v1558_v2  ;;  %v1591_v5 = vmul.f32 %v1558_v2, %v1558_v2 }
 0x5c9   : > { %1606 = vadd.xlane.f32.xlu0 %v1591_v5 }
 0x5cf   : > { %1602 = vadd.xlane.f32.xlu1 %v1589_v0 }
 0x602   : > { %v1569_v26 = vpop.xlane.xlu1 %1568 }
 0x603   : > { %1608 = vst.msk [vmem:[%s519_s25] sm:$0xff] %vm566_vm0, %v1569_v26 }
 0x604   : > { %v1593_v24 = vpop.xlane.xlu2 %1592 }
 0x605   : > { %1616 = vst.msk [vmem:[%s2681_s15] sm:$0xff] %vm566_vm0, %v1593_v24 }
 0x60a   : > { %v1571_v36 = vpop.xlane.xlu0 %1570 }
 0x60b   : > { %1609 = vst.msk [vmem:[%s519_s25 + $0x8] sm:$0xff] %vm566_vm0, %v1571_v36 }
 0x612   : > { %v1595_v10 = vpop.xlane.xlu0 %1594  ;;  %v1573_v8 = vpop.xlane.xlu2 %1572 }
 0x613   : > { %1617 = vst.msk [vmem:[%s2681_s15 + $0x8] sm:$0xff] %vm566_vm0, %v1595_v10 }
 0x614   : > { %1610 = vst.msk [vmem:[%s519_s25 + $0x10] sm:$0xff] %vm566_vm0, %v1573_v8  ;;  %v1597_v44 = vpop.xlane.xlu1 %1596 }
 0x615   : > { %1618 = vst.msk [vmem:[%s2681_s15 + $0x10] sm:$0xff] %vm566_vm0, %v1597_v44 }
 0x61a   : > { %v1575_v14 = vpop.xlane.xlu2 %1574 }
 0x61b   : > { %1611 = vst.msk [vmem:[%s519_s25 + $0x18] sm:$0xff] %vm566_vm0, %v1575_v14 }
 0x622   : > { %v1599_v9 = vpop.xlane.xlu2 %1598  ;;  %v1577_v30 = vpop.xlane.xlu1 %1576 }
 0x623   : > { %1619 = vst.msk [vmem:[%s2681_s15 + $0x18] sm:$0xff] %vm566_vm0, %v1599_v9 }
 0x624   : > { %1612 = vst.msk [vmem:[%s519_s25 + $0x20] sm:$0xff] %vm566_vm0, %v1577_v30  ;;  %v1601_v46 = vpop.xlane.xlu0 %1600 }
 0x625   : > { %1620 = vst.msk [vmem:[%s2681_s15 + $0x20] sm:$0xff] %vm566_vm0, %v1601_v46 }
 0x62a   : > { %v1579_v51 = vpop.xlane.xlu2 %1578 }
 0x62b   : > { %1613 = vst.msk [vmem:[%s519_s25 + $0x28] sm:$0xff] %vm566_vm0, %v1579_v51 }
 0x632   : > { %v1581_v13 = vpop.xlane.xlu0 %1580 }
 0x633   : > { %1614 = vst.msk [vmem:[%s519_s25 + $0x30] sm:$0xff] %vm566_vm0, %v1581_v13 }
 0x634   : > { %v1605_v37 = vpop.xlane.xlu2 %1604 }
 0x635   : > { %1622 = vst.msk [vmem:[%s2681_s15 + $0x30] sm:$0xff] %vm566_vm0, %v1605_v37 }
 0x63a   : > { %v1583_v34 = vpop.xlane.xlu1 %1582 }
 0x63b   : > { %1615 = vst.msk [vmem:[%s519_s25 + $0x38] sm:$0xff] %vm566_vm0, %v1583_v34 }
 0x63c   : > { %v1607_v52 = vpop.xlane.xlu0 %1606 }
 0x63d   : > { %1623 = vst.msk [vmem:[%s2681_s15 + $0x38] sm:$0xff] %vm566_vm0, %v1607_v52 }
 0x642   : > { %v1603_v57 = vpop.xlane.xlu1 %1602 }
 0x643   : > { %1621 = vst.msk [vmem:[%s2681_s15 + $0x28] sm:$0xff] %vm566_vm0, %v1603_v57 }
 0x644 PF: > { %s25_s29 = sadd.s32 1, %s1937_s29  }
 0x645   : > { %p22_p4 = scmp.ge.s32.totalorder %s25_s29, 4  }
 0x647   :  { %24 = sbr.rel (!%p22_p4) target bundleno = 1 (0x1), region = 133 }

// kernel: stacked_attention.7
= control target key start
LH: loop header
LB: loop body
LE: loop exit
PB: predicated region body
PF: predicated region fallthrough
CT: control target
= control target key end

     0   :  { %s1933_s25 = smov 0   ;;  %s2610_s0 = inlined_call_operand.vmem [shape: f32[2,64,128], index: 0, kind: input, shape index: {}]   ;;  %s2611_s1 = inlined_call_operand.vmem [shape: f32[2,64,1], index: 1, kind: input, shape index: {}]   ;;  %s2612_s2 = inlined_call_operand.vmem [shape: f32[2,64,1], index: 2, kind: input, shape index: {}]   ;;  %s2613_s3 = inlined_call_operand.vmem [shape: f32[64,1], index: 3, kind: input, shape index: {}]   ;;  %s2614_s4 = inlined_call_operand.vmem [shape: f32[64,1], index: 4, kind: input, shape index: {}]   ;;  %s2615_s5 = inlined_call_operand.vmem [shape: f32[16,64], index: 5, kind: input, shape index: {}]   ;;  %s2616_s6 = inlined_call_operand.vmem [shape: f32[64,64], index: 6, kind: input, shape index: {}]   ;;  %s2617_s7 = inlined_call_operand.vmem [shape: f32[64,1], index: 7, kind: input, shape index: {}]   ;;  %s2618_s8 = inlined_call_operand.vmem [shape: f32[64,64], index: 8, kind: input, shape index: {}]   ;;  %s2619_s9 = inlined_call_operand.vmem [shape: f32[64,1], index: 9, kind: input, shape index: {}]   ;;  %s2620_s10 = inlined_call_operand.vmem [shape: f32[2,64,128], index: 10, kind: output, shape index: {0}]   ;;  %s2621_s11 = inlined_call_operand.vmem [shape: f32[2,64,128], index: 11, kind: output, shape index: {1}]   ;;  %s2622_s12 = inlined_call_operand.vmem [shape: f32[2,64,1], index: 12, kind: output, shape index: {2}]   ;;  %s2623_s13 = inlined_call_operand.vmem [shape: f32[2,64,1], index: 13, kind: output, shape index: {3}]  }
   0x1 LB: > { %s1715_s26 = sadd.s32 4294967295, %s1859_s25   ;;  %p1719_p0 = scmp.ge.s32.totalorder %s1859_s25, 1  ;;  %s1859_s25 = sphi %s1933_s25, %s24_s25  }
   0x2   : > { %p394_p1 = scmp.lt.s32.totalorder %s1859_s25, 3 }
   0x4   : > { %p395_p2 = pnand %p1719_p0, %p394_p1 }
   0x5   : > { %p453_p3 = scmp.lt.s32.totalorder (!%p395_p2), %s1715_s26, 1 }
   0x6   : > { %398 = sbr.rel (%p395_p2) target bundleno = 1602 (0x642), region = 60 }
   0xb   : > { %v798_v0 = vld [vmem:[%s2613_s3 + $0x38] sm:$0xff]  ;;  %v1861_v2 = vmov 0   ;;  %v797_v3 = vld [vmem:[%s2613_s3 + $0x30] sm:$0xff]  ;;  %v1862_v6 = vmov 256.0   ;;  %vm519_vm0 = vcmask 7168   ;;  %v491_v9 = vld [vmem:[%s2611_s1 + $0x20] sm:$0xff] }
   0xc   : > { %v854_v1 = vld [vmem:[%s2614_s4 + $0x38] sm:$0xff]  ;;  %1767 = vset.pattern.permute.xlu1 %v1861_v2  ;;  %1768 = vset.pattern.permute.xlu2 %v1861_v2  ;;  %v493_v4 = vld [vmem:[%s2611_s1 + $0x30] sm:$0xff]  ;;  %1769 = vrcp.f32 %v1862_v6  ;;  %v499_v10 = vld [vmem:[%s2611_s1 + $0x60] sm:$0xff]  ;;  %v532_v20 = vsel %vm519_vm0, %v491_v9, 0.0  ;;  %s2629_s26 = smov (!%p453_p3, %s1715_s26), 1 }
   0xd   : > { %v501_v5 = vld [vmem:[%s2611_s1 + $0x70] sm:$0xff]  ;;  %836 = vperm.xlu1 %1767, %v798_v0   ;;  %1766 = vset.pattern.permute.xlu0 %v1861_v2  ;;  %v507_v11 = vld [vmem:[%s2612_s2 + $0x20] sm:$0xff]  ;;  %v490_v13 = vld [vmem:[%s2611_s1 + $0x18] sm:$0xff]  ;;  %v538_v16 = vsel %vm519_vm0, %v493_v4, 0.0  ;;  %v533_v21 = vsel %vm519_vm0, %v499_v10, 0.0  ;;  %s2226_s16 = sshll.u32 %s2629_s26, 6 }
   0xe   : > { %v509_v7 = vld [vmem:[%s2612_s2 + $0x30] sm:$0xff]  ;;  %892 = vperm.xlu2 %1768, %v854_v1   ;;  %831 = vperm.xlu0 %1766, %v797_v3   ;;  %v515_v12 = vld [vmem:[%s2612_s2 + $0x60] sm:$0xff]  ;;  %v498_v14 = vld [vmem:[%s2611_s1 + $0x58] sm:$0xff]  ;;  %v539_v17 = vsel %vm519_vm0, %v501_v5, 0.0  ;;  %v571_v22 = vsel %vm519_vm0, %v507_v11, 0.0  ;;  %v529_v27 = vsel %vm519_vm0, %v490_v13, 0.0  ;;  %v534_v38 = vadd.f32 %v533_v21, %v532_v20  ;;  %s2232_s19 = scalar_lea.vmem %s2610_s0, %s2226_s16  ;;  %s2241_s21 = scalar_lea.vmem %s2620_s10, %s2226_s16 }
   0xf   : > { %v517_v8 = vld [vmem:[%s2612_s2 + $0x70] sm:$0xff]  ;;  %v577_v18 = vsel %vm519_vm0, %v509_v7, 0.0  ;;  %v572_v23 = vsel %vm519_vm0, %v515_v12, 0.0  ;;  %v506_v24 = vld [vmem:[%s2612_s2 + $0x18] sm:$0xff]  ;;  %v530_v28 = vsel %vm519_vm0, %v498_v14, 0.0  ;;  %v540_v32 = vadd.f32 %v539_v17, %v538_v16  ;;  %v492_v36 = vld [vmem:[%s2611_s1 + $0x28] sm:$0xff]  ;;  %s2563_s18 = scalar_lea.vmem %s2621_s11, %s2226_s16  ;;  %s472_s20 = scalar_lea.vmem %s2622_s12, %s2226_s16 }
  0x10   : > { %v853_v15 = vld [vmem:[%s2614_s4 + $0x30] sm:$0xff]  ;;  %v578_v19 = vsel %vm519_vm0, %v517_v8, 0.0  ;;  %v514_v25 = vld [vmem:[%s2612_s2 + $0x58] sm:$0xff]  ;;  %v500_v37 = vld [vmem:[%s2611_s1 + $0x68] sm:$0xff]  ;;  %v573_v39 = vadd.f32 %v572_v23, %v571_v22  ;;  %v568_v40 = vsel %vm519_vm0, %v506_v24, 0.0  ;;  %v531_v46 = vadd.f32 %v530_v28, %v529_v27  ;;  %s2581_s23 = scalar_lea.vmem %s2623_s13, %s2226_s16 }
  0x11   : > { %v494_v29 = vld [vmem:[%s2611_s1 + $0x38] sm:$0xff]  ;;  %v579_v34 = vadd.f32 %v578_v19, %v577_v18  ;;  %v569_v41 = vsel %vm519_vm0, %v514_v25, 0.0  ;;  %v508_v42 = vld [vmem:[%s2612_s2 + $0x28] sm:$0xff]  ;;  %v489_v44 = vld [vmem:[%s2611_s1 + $0x10] sm:$0xff]  ;;  %v535_v54 = vsel %vm519_vm0, %v492_v36, 0.0  ;;  %v536_v56 = vsel %vm519_vm0, %v500_v37, 0.0 }
  0x12   : > { %v1770_v26 = vpop.eup %1769  ;;  %v502_v30 = vld [vmem:[%s2611_s1 + $0x78] sm:$0xff]  ;;  %v516_v43 = vld [vmem:[%s2612_s2 + $0x68] sm:$0xff]  ;;  %v541_v47 = vsel %vm519_vm0, %v494_v29, 0.0  ;;  %v497_v49 = vld [vmem:[%s2611_s1 + $0x50] sm:$0xff]  ;;  %v574_v57 = vsel %vm519_vm0, %v508_v42, 0.0  ;;  %v526_v59 = vsel %vm519_vm0, %v489_v44, 0.0  ;;  %v570_v0 = vadd.f32 %v569_v41, %v568_v40 }
  0x13   : > { %v510_v31 = vld [vmem:[%s2612_s2 + $0x38] sm:$0xff]  ;;  %v545_v33 = vmul.f32 256.0, %v1770_v26  ;;  %v542_v48 = vsel %vm519_vm0, %v502_v30, 0.0  ;;  %v505_v50 = vld [vmem:[%s2612_s2 + $0x10] sm:$0xff]  ;;  %vm549_vm1 = vweird.f32 %v1770_v26  ;;  %v575_v58 = vsel %vm519_vm0, %v516_v43, 0.0  ;;  %v487_v3 = vld [vmem:[%s2611_s1] sm:$0xff] }
  0x14   : > { %v518_v35 = vld [vmem:[%s2612_s2 + $0x78] sm:$0xff]  ;;  %v513_v51 = vld [vmem:[%s2612_s2 + $0x50] sm:$0xff]  ;;  %v580_v52 = vsel %vm519_vm0, %v510_v31, 0.0  ;;  %v527_v60 = vsel %vm519_vm0, %v497_v49, 0.0  ;;  %v565_v61 = vsel %vm519_vm0, %v505_v50, 0.0  ;;  %v543_v1 = vadd.f32 %v542_v48, %v541_v47  ;;  %v495_v4 = vld [vmem:[%s2611_s1 + $0x40] sm:$0xff] }
  0x15   : > { %887 = vperm.xlu1 %1767, %v853_v15   ;;  %v546_v45 = vsub.f32 1.0, %v545_v33  ;;  %v581_v53 = vsel %vm519_vm0, %v518_v35, 0.0  ;;  %v566_v62 = vsel %vm519_vm0, %v513_v51, 0.0  ;;  %v537_v5 = vadd.f32 %v536_v56, %v535_v54  ;;  %v503_v24 = vld [vmem:[%s2612_s2] sm:$0xff]  ;;  %v496_v47 = vld [vmem:[%s2611_s1 + $0x48] sm:$0xff] }
  0x16   : > { %v582_v2 = vadd.f32 %v581_v53, %v580_v52  ;;  %v576_v6 = vadd.f32 %v575_v58, %v574_v57  ;;  %v520_v7 = vsel %vm519_vm0, %v487_v3, 0.0  ;;  %v521_v8 = vsel %vm519_vm0, %v495_v4, 0.0  ;;  %v511_v29 = vld [vmem:[%s2612_s2 + $0x40] sm:$0xff]  ;;  %v504_v53 = vld [vmem:[%s2612_s2 + $0x8] sm:$0xff] }
  0x17   : > { %v547_v55 = vmul.f32 %v1770_v26, %v546_v45  ;;  %v528_v10 = vadd.f32 %v527_v60, %v526_v59  ;;  %v567_v11 = vadd.f32 %v566_v62, %v565_v61  ;;  %v522_v12 = vadd.f32 %v521_v8, %v520_v7  ;;  %v512_v54 = vld [vmem:[%s2612_s2 + $0x48] sm:$0xff]  ;;  %v795_v60 = vld [vmem:[%s2613_s3 + $0x20] sm:$0xff] }
  0x18   : > { %v559_v37 = vsel %vm519_vm0, %v503_v24, 0.0  ;;  %v560_v41 = vsel %vm519_vm0, %v511_v29, 0.0  ;;  %v524_v52 = vsel %vm519_vm0, %v496_v47, 0.0  ;;  %v562_v62 = vsel %vm519_vm0, %v504_v53, 0.0  ;;  %v851_v53 = vld [vmem:[%s2614_s4 + $0x20] sm:$0xff] }
  0x19   : > { %v548_v63 = vadd.f32 %v1770_v26, %v547_v55  ;;  %v561_v50 = vadd.f32 %v560_v41, %v559_v37 }
  0x1b   : > { %v2058_v9 = vsel %vm549_vm1, %v1770_v26, %v548_v63  ;;  %v563_v63 = vsel %vm519_vm0, %v512_v54, 0.0 }
  0x1c   : > { %v557_v13 = vmul.f32 %v2058_v9, %v540_v32  ;;  %v589_v14 = vmul.f32 %v579_v34, %v2058_v9  ;;  %v555_v15 = vmul.f32 %v2058_v9, %v534_v38  ;;  %v587_v16 = vmul.f32 %v573_v39, %v2058_v9 }
  0x1d   : > { %v554_v17 = vmul.f32 %v2058_v9, %v531_v46  ;;  %v586_v18 = vmul.f32 %v570_v0, %v2058_v9  ;;  %v558_v19 = vmul.f32 %v2058_v9, %v543_v1  ;;  %v590_v20 = vmul.f32 %v582_v2, %v2058_v9  ;;  %v488_v46 = vld [vmem:[%s2611_s1 + $0x8] sm:$0xff] }
  0x1e   : > { %727 = vperm.xlu0 %1766, %v557_v13   ;;  %v597_v21 = vmul.f32 %v557_v13, %v557_v13  ;;  %717 = vperm.xlu2 %1768, %v555_v15   ;;  %v595_v22 = vmul.f32 %v555_v15, %v555_v15  ;;  %v556_v23 = vmul.f32 %v2058_v9, %v537_v5  ;;  %v523_v51 = vsel %vm519_vm0, %v488_v46, 0.0 }
  0x1f   : > { %712 = vperm.xlu1 %1767, %v554_v17   ;;  %v594_v25 = vmul.f32 %v554_v17, %v554_v17  ;;  %v598_v26 = vmul.f32 %v558_v19, %v558_v19  ;;  %v588_v27 = vmul.f32 %v576_v6, %v2058_v9  ;;  %v553_v28 = vmul.f32 %v2058_v9, %v528_v10 }
  0x20   : > { %v605_v30 = vsub.f32 %v589_v14, %v597_v21  ;;  %v603_v31 = vsub.f32 %v587_v16, %v595_v22  ;;  %v596_v32 = vmul.f32 %v556_v23, %v556_v23  ;;  %v585_v33 = vmul.f32 %v567_v11, %v2058_v9 }
  0x21   : > { %v602_v34 = vsub.f32 %v586_v18, %v594_v25  ;;  %v606_v35 = vsub.f32 %v590_v20, %v598_v26  ;;  %v593_v36 = vmul.f32 %v553_v28, %v553_v28  ;;  %v2101_v49 = vmul.f32 %v2058_v9, %v522_v12 }
  0x22   : > { %v2079_v38 = vadd.f32 1e-05, %v605_v30  ;;  %v2081_v39 = vadd.f32 1e-05, %v603_v31  ;;  %v604_v40 = vsub.f32 %v588_v27, %v596_v32  ;;  %v583_v55 = vmul.f32 %v561_v50, %v2058_v9  ;;  %v796_v30 = vld [vmem:[%s2613_s3 + $0x28] sm:$0xff] }
  0x23   : > { %v2084_v42 = vadd.f32 1e-05, %v602_v34  ;;  %v2086_v43 = vadd.f32 1e-05, %v606_v35  ;;  %v601_v44 = vsub.f32 %v585_v33, %v593_v36  ;;  %v591_v56 = vmul.f32 %v2101_v49, %v2101_v49 }
  0x24   : > { %1771 = vrsqrt.f32 %v2079_v38  ;;  %v2089_v45 = vadd.f32 1e-05, %v604_v40  ;;  %v525_v57 = vadd.f32 %v524_v52, %v523_v51  ;;  %vm661_vm2 = vweird.f32 %v2081_v39 }
  0x25   : > { %1773 = vrsqrt.f32 %v2081_v39  ;;  %v2098_v48 = vadd.f32 1e-05, %v601_v44  ;;  %vm681_vm3 = vweird.f32 %v2079_v38  ;;  %v599_v5 = vsub.f32 %v583_v55, %v591_v56 }
  0x26   : > { %1775 = vrsqrt.f32 %v2084_v42  ;;  %732 = vperm.xlu0 %1766, %v558_v19   ;;  %722 = vperm.xlu2 %1768, %v556_v23   ;;  %v2134_v6 = vmul.f32 %v2058_v9, %v525_v57  ;;  %vm691_vm4 = vweird.f32 %v2086_v43  ;;  %v564_v11 = vadd.f32 %v563_v63, %v562_v62  ;;  %v793_v63 = vld [vmem:[%s2613_s3 + $0x10] sm:$0xff] }
  0x27   : > { %1777 = vrsqrt.f32 %v2086_v43  ;;  %v2146_v22 = vadd.f32 1e-05, %v599_v5  ;;  %vm651_vm9 = vweird.f32 %v2084_v42  ;;  %vm671_vm11 = vweird.f32 %v2089_v45  ;;  %v850_v5 = vld [vmem:[%s2614_s4 + $0x18] sm:$0xff] }
  0x28   : > { %1779 = vrsqrt.f32 %v2089_v45  ;;  %v584_v26 = vmul.f32 %v564_v11, %v2058_v9  ;;  %v592_v27 = vmul.f32 %v2134_v6, %v2134_v6 }
  0x29   : > { %1781 = vrsqrt.f32 %v2098_v48 }
  0x2a   : > { %v1772_v58 = vpop.eup %1771  ;;  %1783 = vrsqrt.f32 %v2146_v22 }
  0x2b   : > { %v1774_v59 = vpop.eup %1773  ;;  %v676_v61 = vmul.f32 %v1772_v58, %v2079_v38  ;;  %vm682_vm5 = vweird.f32 %v1772_v58  ;;  %v600_v38 = vsub.f32 %v584_v26, %v592_v27 }
  0x2c   : > { %v2124_v0 = vpop.eup %1775  ;;  %v656_v1 = vmul.f32 %v1774_v59, %v2081_v39  ;;  %vm662_vm6 = vweird.f32 %v1774_v59  ;;  %vm2150_vm7 = vmor %vm681_vm3, %vm682_vm5  ;;  %vm621_vm5 = vweird.f32 %v2146_v22 }
  0x2d   : > { %v2129_v2 = vpop.eup %1777  ;;  %v677_v3 = vmul.f32 %v1772_v58, %v676_v61  ;;  %v646_v4 = vmul.f32 %v2124_v0, %v2084_v42  ;;  %vm2159_vm8 = vmor %vm661_vm2, %vm662_vm6  ;;  %vm652_vm13 = vweird.f32 %v2124_v0  ;;  %vm641_vm2 = vweird.f32 %v2098_v48  ;;  %v794_v61 = vld [vmem:[%s2613_s3 + $0x18] sm:$0xff] }
  0x2e   : > { %v1780_v7 = vpop.eup %1779  ;;  %821 = vperm.xlu2 %1768, %v795_v60   ;;  %707 = vperm.xlu0 %1766, %v553_v28   ;;  %v657_v8 = vmul.f32 %v1774_v59, %v656_v1  ;;  %v686_v10 = vmul.f32 %v2129_v2, %v2086_v43  ;;  %vm692_vm10 = vweird.f32 %v2129_v2  ;;  %vm653_vm1 = vmor %vm651_vm9, %vm652_vm13 }
  0x2f   : > { %v2139_v12 = vpop.eup %1781  ;;  %v678_v13 = vmul.f32 0.5, %v677_v3  ;;  %v647_v14 = vmul.f32 %v2124_v0, %v646_v4  ;;  %v666_v15 = vmul.f32 %v1780_v7, %v2089_v45  ;;  %vm672_vm12 = vweird.f32 %v1780_v7  ;;  %vm693_vm14 = vmor %vm691_vm4, %vm692_vm10 }
  0x30   : > { %v658_v16 = vmul.f32 0.5, %v657_v8  ;;  %v687_v17 = vmul.f32 %v2129_v2, %v686_v10  ;;  %v636_v18 = vmul.f32 %v2139_v12, %v2098_v48  ;;  %vm673_vm15 = vmor %vm671_vm11, %vm672_vm12  ;;  %v608_v45 = vadd.f32 1e-05, %v600_v38  ;;  %v1784_v51 = vpop.eup %1783  ;;  %v847_v8 = vld [vmem:[%s2614_s4] sm:$0xff]  ;;  %v848_v10 = vld [vmem:[%s2614_s4 + $0x8] sm:$0xff] }
  0x31   : > { %v679_v19 = vsub.f32 1.5, %v678_v13  ;;  %v648_v20 = vmul.f32 0.5, %v647_v14  ;;  %v667_v21 = vmul.f32 %v1780_v7, %v666_v15  ;;  %vm642_vm3 = vweird.f32 %v2139_v12 }
  0x32   : > { %v659_v23 = vsub.f32 1.5, %v658_v16  ;;  %v688_v25 = vmul.f32 0.5, %v687_v17  ;;  %v637_v32 = vmul.f32 %v2139_v12, %v636_v18  ;;  %1785 = vrsqrt.f32 %v608_v45  ;;  %vm643_vm4 = vmor %vm641_vm2, %vm642_vm3 }
  0x33   : > { %v680_v29 = vmul.f32 %v1772_v58, %v679_v19  ;;  %v668_v31 = vmul.f32 0.5, %v667_v21  ;;  %v649_v34 = vsub.f32 1.5, %v648_v20  ;;  %v616_v42 = vmul.f32 %v1784_v51, %v2146_v22 }
  0x34   : > { %v660_v9 = vmul.f32 %v1774_v59, %v659_v23  ;;  %v689_v33 = vsub.f32 1.5, %v688_v25  ;;  %v638_v41 = vmul.f32 0.5, %v637_v32  ;;  %vm622_vm6 = vweird.f32 %v1784_v51  ;;  %v485_v23 = vld [vmem:[%s2232_s19 + $0x30] sm:$0xff] }
  0x35   : > { %v684_v35 = vsel %vm2150_vm7, %v1772_v58, %v680_v29  ;;  %v669_v36 = vsub.f32 1.5, %v668_v31  ;;  %v650_v44 = vmul.f32 %v2124_v0, %v649_v34  ;;  %v617_v55 = vmul.f32 %v1784_v51, %v616_v42  ;;  %v852_v58 = vld [vmem:[%s2614_s4 + $0x28] sm:$0xff]  ;;  %vm623_vm7 = vmor %vm621_vm5, %vm622_vm6  ;;  %v486_v31 = vld [vmem:[%s2232_s19 + $0x38] sm:$0xff] }
  0x36   : > { %v664_v37 = vsel %vm2159_vm8, %v1774_v59, %v660_v9  ;;  %775 = vperm.xlu1 %1767, %v684_v35   ;;  %826 = vperm.xlu0 %1766, %v796_v30   ;;  %v690_v39 = vmul.f32 %v2129_v2, %v689_v33  ;;  %v639_v50 = vsub.f32 1.5, %v638_v41  ;;  %vm631_vm8 = vweird.f32 %v608_v45  ;;  %v483_v30 = vld [vmem:[%s2232_s19 + $0x20] sm:$0xff] }
  0x37   : > { %765 = vperm.xlu2 %1768, %v664_v37   ;;  %v670_v40 = vmul.f32 %v1780_v7, %v669_v36  ;;  %v654_v52 = vsel %vm653_vm1, %v2124_v0, %v650_v44  ;;  %v618_v48 = vmul.f32 0.5, %v617_v55  ;;  %v484_v44 = vld [vmem:[%s2232_s19 + $0x28] sm:$0xff]  ;;  %vm926_vm11 = vcmask 523264  }
  0x38   : > { %v694_v46 = vsel %vm693_vm14, %v2129_v2, %v690_v39  ;;  %v640_v43 = vmul.f32 %v2139_v12, %v639_v50  ;;  %v1786_v56 = vpop.eup %1785  ;;  %v849_v2 = vld [vmem:[%s2614_s4 + $0x10] sm:$0xff]  ;;  %vm1086_vm12 = vcmask 130048  }
  0x39   : > { %v674_v47 = vsel %vm673_vm15, %v1780_v7, %v670_v40  ;;  %v626_v57 = vmul.f32 %v1786_v56, %v608_v45  ;;  %v619_v59 = vsub.f32 1.5, %v618_v48  ;;  %vm632_vm9 = vweird.f32 %v1786_v56  ;;  %v791_v7 = vld [vmem:[%s2613_s3] sm:$0xff] }
  0x3a   : > { %v644_v54 = vsel %vm643_vm4, %v2139_v12, %v640_v43  ;;  %vm633_vm10 = vmor %vm631_vm8, %vm632_vm9 }
  0x3b   : > { %v627_v60 = vmul.f32 %v1786_v56, %v626_v57 }
  0x3d   : > { %v628_v62 = vmul.f32 0.5, %v627_v60 }
  0x3e   : > { %780 = vperm.xlu1 %1767, %v694_v46   ;;  %770 = vperm.xlu0 %1766, %v674_v47  }
  0x3f   : > { %760 = vperm.xlu2 %1768, %v654_v52   ;;  %v629_v1 = vsub.f32 1.5, %v628_v62  ;;  %v482_v62 = vld [vmem:[%s2232_s19 + $0x18] sm:$0xff] }
  0x41   : > { %v630_v3 = vmul.f32 %v1786_v56, %v629_v1 }
  0x43   : > { %v634_v4 = vsel %vm633_vm10, %v1786_v56, %v630_v3 }
  0x46   : > { %877 = vperm.xlu0 %1766, %v851_v53   ;;  %755 = vperm.xlu1 %1767, %v644_v54  }
  0x47   : > { %697 = vperm.xlu2 %1768, %v2101_v49   ;;  %v620_v49 = vmul.f32 %v1784_v51, %v619_v59 }
  0x49   : > { %v624_v0 = vsel %vm623_vm7, %v1784_v51, %v620_v49 }
  0x4e   : > { %882 = vperm.xlu1 %1767, %v852_v58   ;;  %702 = vperm.xlu0 %1766, %v2134_v6   ;;  %v792_v6 = vld [vmem:[%s2613_s3 + $0x8] sm:$0xff]  ;;  %v481_v58 = vld [vmem:[%s2232_s19 + $0x10] sm:$0xff] }
  0x4f   : > { %816 = vperm.xlu2 %1768, %v794_v61  }
  0x56   : > { %811 = vperm.xlu1 %1767, %v793_v63   ;;  %745 = vperm.xlu0 %1766, %v624_v0  }
  0x57   : > { %867 = vperm.xlu2 %1768, %v849_v2  }
  0x5e   : > { %750 = vperm.xlu1 %1767, %v634_v4   ;;  %872 = vperm.xlu0 %1766, %v850_v5  }
  0x5f   : > { %806 = vperm.xlu2 %1768, %v792_v6  }
  0x66   : > { %801 = vperm.xlu1 %1767, %v791_v7   ;;  %857 = vperm.xlu0 %1766, %v847_v8  }
  0x68   : > { %v893_v11 = vpop.permute.xlu2 %892 }
  0x6e   : > { %862 = vperm.xlu1 %1767, %v848_v10  }
  0x78   : > { %v718_v12 = vpop.permute.xlu2 %717 }
  0x79   : > { %v739_v9 = vsub.f32 %v483_v30, %v718_v12  ;;  %v479_v12 = vld [vmem:[%s2232_s19] sm:$0xff] }
  0x7a   : > { %v919_v30 = vld [vmem:[%s2615_s5] sm:$0xff] }
  0x7f   : > { %v837_v14 = vpop.permute.xlu1 %836 }
  0x80   : > { %v832_v13 = vpop.permute.xlu0 %831  ;;  %v723_v15 = vpop.permute.xlu2 %722 }
  0x81   : > { %v740_v51 = vsub.f32 %v484_v44, %v723_v15  ;;  %v949_v44 = vld [vmem:[%s2616_s6 + $0x28] sm:$0xff] }
  0x87   : > { %v888_v17 = vpop.permute.xlu1 %887 }
  0x88   : > { %v822_v18 = vpop.permute.xlu2 %821 }
  0x90   : > { %v728_v16 = vpop.permute.xlu0 %727 }
  0x91   : > { %v713_v20 = vpop.permute.xlu1 %712  ;;  %v766_v22 = vpop.permute.xlu2 %765  ;;  %v741_v24 = vsub.f32 %v485_v23, %v728_v16  ;;  %v480_v16 = vld [vmem:[%s2232_s19 + $0x8] sm:$0xff] }
  0x92   : > { %v787_v38 = vmul.f32 %v766_v22, %v739_v9  ;;  %v738_v3 = vsub.f32 %v482_v62, %v713_v20 }
  0x94   : > { %v843_v46 = vmul.f32 %v822_v18, %v787_v38  ;;  %v947_v38 = vld [vmem:[%s2616_s6 + $0x18] sm:$0xff] }
  0x98   : > { %v733_v19 = vpop.permute.xlu0 %732 }
  0x99   : > { %v761_v28 = vpop.permute.xlu2 %760  ;;  %v742_v33 = vsub.f32 %v486_v31, %v733_v19  ;;  %v920_v31 = vld [vmem:[%s2615_s5 + $0x8] sm:$0xff] }
  0x9a   : > { %v786_v5 = vmul.f32 %v761_v28, %v738_v3  ;;  %v921_v9 = vpack.c.bf16 %v920_v31, %v919_v30 }
  0xa0   : > { %v708_v21 = vpop.permute.xlu0 %707 }
  0xa1   : > { %v698_v40 = vpop.permute.xlu2 %697  ;;  %v737_v60 = vsub.f32 %v481_v58, %v708_v21 }
  0xa8   : > { %v776_v25 = vpop.permute.xlu1 %775  ;;  %v827_v26 = vpop.permute.xlu0 %826 }
  0xa9   : > { %v789_v27 = vmul.f32 %v776_v25, %v741_v24  ;;  %v817_v54 = vpop.permute.xlu2 %816 }
  0xaa   : > { %v842_v7 = vmul.f32 %v817_v54, %v786_v5 }
  0xab   : > { %v845_v29 = vmul.f32 %v832_v13, %v789_v27 }
  0xad   : > { %v901_v32 = vadd.f32 %v888_v17, %v845_v29 }
  0xaf   : > { %v2243_v34 = vmax.f32 %v901_v32, 0.0 }
  0xb0   : > { %v781_v35 = vpop.permute.xlu1 %780  ;;  %v771_v36 = vpop.permute.xlu0 %770 }
  0xb1   : > { %917 = vst [vmem:[%s2241_s21 + $0x30] sm:$0xff] %v2243_v34  ;;  %v790_v37 = vmul.f32 %v781_v35, %v742_v33  ;;  %v788_v42 = vmul.f32 %v771_v36, %v740_v51  ;;  %v868_v2 = vpop.permute.xlu2 %867  ;;  %v944_v33 = vld [vmem:[%s2616_s6] sm:$0xff]  ;;  %v945_v35 = vld [vmem:[%s2616_s6 + $0x8] sm:$0xff]  ;;  %v950_v51 = vld [vmem:[%s2616_s6 + $0x30] sm:$0xff] }
  0xb2   : > { %v952_v36 = vpack.c.bf16 %v945_v35, %v944_v33 }
  0xb3   : > { %v846_v39 = vmul.f32 %v837_v14, %v790_v37  ;;  %v844_v55 = vmul.f32 %v827_v26, %v788_v42  ;;  %v735_v14 = vsub.f32 %v479_v12, %v698_v40  ;;  %v946_v37 = vld [vmem:[%s2616_s6 + $0x10] sm:$0xff] }
  0xb5   : > { %v902_v41 = vadd.f32 %v893_v11, %v846_v39  ;;  %v953_v39 = vpack.c.bf16 %v947_v38, %v946_v37 }
  0xb7   : > { %v2248_v45 = vmax.f32 %v902_v41, 0.0  ;;  %v948_v41 = vld [vmem:[%s2616_s6 + $0x20] sm:$0xff] }
  0xb8   : > { %v878_v47 = vpop.permute.xlu0 %877  ;;  %v756_v50 = vpop.permute.xlu1 %755 }
  0xb9   : > { %918 = vst [vmem:[%s2241_s21 + $0x38] sm:$0xff] %v2248_v45  ;;  %v899_v52 = vadd.f32 %v878_v47, %v843_v46  ;;  %v925_v43 = vpack.c.bf16 %v2248_v45, %v2243_v34  ;;  %v785_v49 = vmul.f32 %v756_v50, %v737_v60  ;;  %v807_v25 = vpop.permute.xlu2 %806  ;;  %v954_v50 = vpack.c.bf16 %v949_v44, %v948_v41 }
  0xbb   : > { %v2254_v53 = vmax.f32 %v899_v52, 0.0  ;;  %934 = vmatpush.bf16.msra.mxu0 %v925_v43  ;;  %1020 = vmatpush.bf16.msra.mxu1 %v925_v43  ;;  %v951_v52 = vld [vmem:[%s2616_s6 + $0x38] sm:$0xff] }
  0xbc   : > { %v955_v43 = vpack.c.bf16 %v951_v52, %v950_v51 }
  0xbd   : > { %915 = vst [vmem:[%s2241_s21 + $0x20] sm:$0xff] %v2254_v53 }
  0xc0   : > { %v883_v56 = vpop.permute.xlu1 %882  ;;  %v703_v48 = vpop.permute.xlu0 %702 }
  0xc1   : > { %v900_v57 = vadd.f32 %v883_v56, %v844_v55  ;;  %v736_v19 = vsub.f32 %v480_v16, %v703_v48 }
  0xc3   : > { %v2259_v59 = vmax.f32 %v900_v57, 0.0 }
  0xc5   : > { %916 = vst [vmem:[%s2241_s21 + $0x28] sm:$0xff] %v2259_v59  ;;  %v924_v61 = vpack.c.bf16 %v2259_v59, %v2254_v53 }
  0xc7   : > { %935 = vmatpush.bf16.msra.mxu0 %v924_v61  ;;  %1021 = vmatpush.bf16.msra.mxu1 %v924_v61 }
  0xc8   : > { %v812_v63 = vpop.permute.xlu1 %811  ;;  %v746_v0 = vpop.permute.xlu0 %745 }
  0xc9   : > { %v841_v1 = vmul.f32 %v812_v63, %v785_v49  ;;  %v783_v17 = vmul.f32 %v746_v0, %v735_v14 }
  0xcb   : > { %v897_v4 = vadd.f32 %v868_v2, %v841_v1 }
  0xcd   : > { %v2266_v6 = vmax.f32 %v897_v4, 0.0 }
  0xcf   : > { %913 = vst [vmem:[%s2241_s21 + $0x10] sm:$0xff] %v2266_v6 }
  0xd0   : > { %v751_v8 = vpop.permute.xlu1 %750  ;;  %v873_v10 = vpop.permute.xlu0 %872 }
  0xd1   : > { %v898_v11 = vadd.f32 %v873_v10, %v842_v7  ;;  %v784_v22 = vmul.f32 %v751_v8, %v736_v19 }
  0xd3   : > { %v2271_v13 = vmax.f32 %v898_v11, 0.0  ;;  %v840_v26 = vmul.f32 %v807_v25, %v784_v22 }
  0xd5   : > { %914 = vst [vmem:[%s2241_s21 + $0x18] sm:$0xff] %v2271_v13  ;;  %v923_v15 = vpack.c.bf16 %v2271_v13, %v2266_v6 }
  0xd7   : > { %936 = vmatpush.bf16.msra.mxu0 %v923_v15  ;;  %1022 = vmatpush.bf16.msra.mxu1 %v923_v15 }
  0xd8   : > { %v802_v18 = vpop.permute.xlu1 %801  ;;  %v858_v21 = vpop.permute.xlu0 %857 }
  0xd9   : > { %v839_v20 = vmul.f32 %v802_v18, %v783_v17 }
  0xdb   : > { %v895_v23 = vadd.f32 %v858_v21, %v839_v20 }
  0xdd   : > { %v2278_v24 = vmax.f32 %v895_v23, 0.0 }
  0xdf   : > { %911 = vst [vmem:[%s2241_s21] sm:$0xff] %v2278_v24 }
  0xe0   : > { %v863_v27 = vpop.permute.xlu1 %862 }
  0xe1   : > { %v896_v28 = vadd.f32 %v863_v27, %v840_v26 }
  0xe3   : > { %v2282_v29 = vmax.f32 %v896_v28, 0.0 }
  0xe5   : > { %912 = vst [vmem:[%s2241_s21 + $0x8] sm:$0xff] %v2282_v29  ;;  %v922_v32 = vpack.c.bf16 %v2282_v29, %v2278_v24 }
  0xe7   : > { %937 = vmatpush.bf16.msra.mxu0 %v922_v32  ;;  %1023 = vmatpush.bf16.msra.mxu1 %v922_v32 }
  0xea   : > { %1730 = vmatmul.msk.bf16.vlgmr.msra.gmra.mxu0 %vm926_vm11, %v921_v9  ;;  %1731 = vmatmul.msk.bf16.vlgmr.msra.gmra.mxu1 %vm926_vm11, %v952_v36 }
  0xfa   : > { %1732 = vmatmul.msk.bf16.gmra.mxu1 %vm926_vm11, %v953_v39 }
 0x10a   : > { %1733 = vmatmul.msk.bf16.gmra.mxu1 %vm926_vm11, %v954_v50 }
 0x11a   : > { %1734 = vmatmul.msk.bf16.gmra.mxu1 %vm926_vm11, %v955_v43 }
 0x167   : > { %v939_v40 = vpop.f32.mrf.mxu0  ;;  %v2326_v63 = vpop.f32.mrf.mxu1 }
 0x168   : > { %1045 = vxpose.xlu2.b32.start [1/2] (short) %v939_v40, 128 }
 0x16f   : > { %v941_v46 = vpop.f32.mrf.mxu0  ;;  %v2329_v2 = vpop.f32.mrf.mxu1 }
 0x170   : > { %1046 = vxpose.xlu2.b32.end [2/2] (short) %v941_v46, 128  ;;  %v1085_v47 = vpack.c.bf16 %v941_v46, %v939_v40 }
 0x172   : > { %1118 = vmatpush.bf16.msrb.mxu1 %v1085_v47  ;;  %1754 = vmatpush.bf16.msra.mxu2 %v1085_v47 }
 0x177   : > { %v2332_v5 = vpop.f32.mrf.mxu1 }
 0x17f   : > { %v2334_v8 = vpop.f32.mrf.mxu1 }
 0x187   : > { %v2337_v14 = vpop.f32.mrf.mxu1 }
 0x18f   : > { %v2339_v17 = vpop.f32.mrf.mxu1 }
 0x197   : > { %v2342_v19 = vpop.f32.mrf.mxu1 }
 0x19f   : > { %v2345_v22 = vpop.f32.mrf.mxu1 }
 0x201   : > { %v1061_v42 = vpop.trf.xlu2 }
 0x209   : > { %v1062_v54 = vpop.trf.xlu2 }
 0x20a   : > { %v1077_v55 = vpack.c.bf16 %v1062_v54, %v1061_v42 }
 0x20c   : > { %1735 = vmatmul.msk.bf16.vlgmr.msrb.gmra.mxu1 %vm1086_vm12, %v1077_v55 }
 0x211   : > { %v1063_v56 = vpop.trf.xlu2 }
 0x219   : > { %v1064_v48 = vpop.trf.xlu2 }
 0x21a   : > { %v1078_v57 = vpack.c.bf16 %v1064_v48, %v1063_v56 }
 0x21c   : > { %1736 = vmatmul.msk.bf16.vlgmr.msra.gmra.mxu2 %vm1086_vm12, %v1078_v57 }
 0x221   : > { %v1065_v58 = vpop.trf.xlu2 }
 0x229   : > { %v1066_v60 = vpop.trf.xlu2 }
 0x22a   : > { %v1079_v61 = vpack.c.bf16 %v1066_v60, %v1065_v58 }
 0x22c   : > { %1737 = vmatmul.msk.bf16.gmra.mxu2 %vm1086_vm12, %v1079_v61 }
 0x231   : > { %v1067_v49 = vpop.trf.xlu2 }
 0x239   : > { %v1068_v62 = vpop.trf.xlu2 }
 0x23a   : > { %v1080_v0 = vpack.c.bf16 %v1068_v62, %v1067_v49 }
 0x23c   : > { %1738 = vmatmul.msk.bf16.gmra.mxu2 %vm1086_vm12, %v1080_v0 }
 0x241   : > { %v1069_v1 = vpop.trf.xlu2 }
 0x249   : > { %v1070_v3 = vpop.trf.xlu2 }
 0x24a   : > { %v1081_v4 = vpack.c.bf16 %v1070_v3, %v1069_v1 }
 0x24c   : > { %1739 = vmatmul.msk.bf16.gmra.mxu2 %vm1086_vm12, %v1081_v4 }
 0x251   : > { %v1071_v7 = vpop.trf.xlu2 }
 0x259   : > { %v1072_v10 = vpop.trf.xlu2 }
 0x25a   : > { %v1082_v11 = vpack.c.bf16 %v1072_v10, %v1071_v7 }
 0x25c   : > { %1740 = vmatmul.msk.bf16.gmra.mxu2 %vm1086_vm12, %v1082_v11 }
 0x261   : > { %v1073_v12 = vpop.trf.xlu2 }
 0x269   : > { %v1074_v15 = vpop.trf.xlu2 }
 0x26a   : > { %v1083_v16 = vpack.c.bf16 %v1074_v15, %v1073_v12 }
 0x26c   : > { %1741 = vmatmul.msk.bf16.gmra.mxu2 %vm1086_vm12, %v1083_v16 }
 0x271   : > { %v1075_v18 = vpop.trf.xlu2 }
 0x279   : > { %v1076_v20 = vpop.trf.xlu2 }
 0x27a   : > { %v1084_v21 = vpack.c.bf16 %v1076_v20, %v1075_v18 }
 0x27c   : > { %1742 = vmatmul.msk.bf16.gmra.mxu2 %vm1086_vm12, %v1084_v21 }
 0x289   : > { %v1120_v23 = vpop.f32.mrf.mxu1 }
 0x28a   : > { %1160 = vmax.xlane.f32.xlu0 %v1120_v23 }
 0x291   : > { %v1122_v25 = vpop.f32.mrf.mxu1 }
 0x292   : > { %1162 = vmax.xlane.f32.xlu1 %v1122_v25 }
 0x29f   : > { %v1125_v26 = vpop.f32.mrf.mxu2 }
 0x2a0   : > { %1164 = vmax.xlane.f32.xlu2 %v1125_v26 }
 0x2a7   : > { %v1127_v27 = vpop.f32.mrf.mxu2 }
 0x2a8   : > { %1166 = vmax.xlane.f32.xlu0 %v1127_v27 }
 0x2af   : > { %v1130_v28 = vpop.f32.mrf.mxu2 }
 0x2b0   : > { %1168 = vmax.xlane.f32.xlu1 %v1130_v28 }
 0x2b7   : > { %v1132_v30 = vpop.f32.mrf.mxu2 }
 0x2b8   : > { %1170 = vmax.xlane.f32.xlu0 %v1132_v30 }
 0x2bf   : > { %v1135_v31 = vpop.f32.mrf.mxu2 }
 0x2c0   : > { %1172 = vmax.xlane.f32.xlu1 %v1135_v31 }
 0x2c7   : > { %v1137_v32 = vpop.f32.mrf.mxu2 }
 0x2c8   : > { %1174 = vmax.xlane.f32.xlu0 %v1137_v32 }
 0x2cf   : > { %v2347_v9 = vpop.f32.mrf.mxu2 }
 0x2d0   : > { %1176 = vmax.xlane.f32.xlu1 %v2347_v9 }
 0x2d7   : > { %v2350_v33 = vpop.f32.mrf.mxu2 }
 0x2d8   : > { %1178 = vmax.xlane.f32.xlu0 %v2350_v33 }
 0x2df   : > { %v2353_v35 = vpop.f32.mrf.mxu2 }
 0x2e0   : > { %1180 = vmax.xlane.f32.xlu1 %v2353_v35 }
 0x2e7   : > { %v2356_v36 = vpop.f32.mrf.mxu2 }
 0x2e8   : > { %1182 = vmax.xlane.f32.xlu0 %v2356_v36 }
 0x2ef   : > { %v2359_v37 = vpop.f32.mrf.mxu2 }
 0x2f0   : > { %1184 = vmax.xlane.f32.xlu1 %v2359_v37 }
 0x2f7   : > { %v2362_v38 = vpop.f32.mrf.mxu2 }
 0x2f8   : > { %1186 = vmax.xlane.f32.xlu0 %v2362_v38 }
 0x2fd   : > { %v1161_v39 = vpop.xlane.xlu0 %1160 }
 0x2fe   : > { %v1192_v40 = vsub.f32 %v1120_v23, %v1161_v39 }
 0x2ff   : > { %v2365_v41 = vpop.f32.mrf.mxu2 }
 0x300   : > { %v1208_v44 = vmul.f32 1.442695, %v1192_v40  ;;  %1188 = vmax.xlane.f32.xlu1 %v2365_v41 }
 0x302   : > { %1787 = vpow2.f32 %v1208_v44 }
 0x305   : > { %v1163_v46 = vpop.xlane.xlu1 %1162 }
 0x306   : > { %v1193_v47 = vsub.f32 %v1122_v25, %v1163_v46 }
 0x307   : > { %v2368_v50 = vpop.f32.mrf.mxu2 }
 0x308   : > { %v2370_v51 = vpop.eup %1787  ;;  %v1210_v52 = vmul.f32 1.442695, %v1193_v47  ;;  %1190 = vmax.xlane.f32.xlu0 %v2368_v50 }
 0x309   : > { %1240 = vadd.xlane.f32.xlu1 %v2370_v51 }
 0x30a   : > { %1789 = vpow2.f32 %v1210_v52 }
 0x310   : > { %v2374_v43 = vpop.eup %1789 }
 0x311   : > { %1242 = vadd.xlane.f32.xlu0 %v2374_v43 }
 0x313   : > { %v1165_v42 = vpop.xlane.xlu2 %1164 }
 0x314   : > { %v1194_v54 = vsub.f32 %v1125_v26, %v1165_v42 }
 0x316   : > { %v1212_v55 = vmul.f32 1.442695, %v1194_v54 }
 0x318   : > { %1791 = vpow2.f32 %v1212_v55 }
 0x31b   : > { %v1167_v56 = vpop.xlane.xlu0 %1166 }
 0x31c   : > { %v1195_v48 = vsub.f32 %v1127_v27, %v1167_v56 }
 0x31e   : > { %v2377_v57 = vpop.eup %1791  ;;  %v1214_v58 = vmul.f32 1.442695, %v1195_v48 }
 0x31f   : > { %1244 = vadd.xlane.f32.xlu1 %v2377_v57 }
 0x320   : > { %1793 = vpow2.f32 %v1214_v58 }
 0x323   : > { %v1169_v60 = vpop.xlane.xlu1 %1168 }
 0x324   : > { %v1196_v61 = vsub.f32 %v1130_v28, %v1169_v60 }
 0x326   : > { %v2380_v49 = vpop.eup %1793  ;;  %v1216_v62 = vmul.f32 1.442695, %v1196_v61 }
 0x327   : > { %1246 = vadd.xlane.f32.xlu0 %v2380_v49 }
 0x328   : > { %1795 = vpow2.f32 %v1216_v62 }
 0x32b   : > { %v1171_v0 = vpop.xlane.xlu0 %1170 }
 0x32c   : > { %v1197_v1 = vsub.f32 %v1132_v30, %v1171_v0 }
 0x32e   : > { %v2383_v3 = vpop.eup %1795  ;;  %v1218_v4 = vmul.f32 1.442695, %v1197_v1 }
 0x32f   : > { %1248 = vadd.xlane.f32.xlu1 %v2383_v3 }
 0x330   : > { %1797 = vpow2.f32 %v1218_v4 }
 0x333   : > { %v1173_v7 = vpop.xlane.xlu1 %1172 }
 0x334   : > { %v1198_v10 = vsub.f32 %v1135_v31, %v1173_v7  ;;  %v957_v7 = vld [vmem:[%s2617_s7 + $0x8] sm:$0xff] }
 0x336   : > { %v2386_v11 = vpop.eup %1797  ;;  %v1220_v12 = vmul.f32 1.442695, %v1198_v10  ;;  %v959_v10 = vld [vmem:[%s2617_s7 + $0x18] sm:$0xff] }
 0x337   : > { %1250 = vadd.xlane.f32.xlu0 %v2386_v11 }
 0x338   : > { %1799 = vpow2.f32 %v1220_v12  ;;  %v960_v12 = vld [vmem:[%s2617_s7 + $0x20] sm:$0xff] }
 0x33b   : > { %v1175_v15 = vpop.xlane.xlu0 %1174 }
 0x33c   : > { %v1199_v16 = vsub.f32 %v1137_v32, %v1175_v15  ;;  %v961_v15 = vld [vmem:[%s2617_s7 + $0x28] sm:$0xff] }
 0x33e   : > { %v2389_v18 = vpop.eup %1799  ;;  %v1222_v20 = vmul.f32 1.442695, %v1199_v16  ;;  %v962_v16 = vld [vmem:[%s2617_s7 + $0x30] sm:$0xff] }
 0x33f   : > { %1252 = vadd.xlane.f32.xlu1 %v2389_v18 }
 0x340   : > { %1801 = vpow2.f32 %v1222_v20  ;;  %v963_v20 = vld [vmem:[%s2617_s7 + $0x38] sm:$0xff] }
 0x343   : > { %v1177_v21 = vpop.xlane.xlu1 %1176 }
 0x344   : > { %v1200_v23 = vsub.f32 %v2347_v9, %v1177_v21  ;;  %v1408_v21 = vld [vmem:[%s2619_s9] sm:$0xff] }
 0x346   : > { %v2393_v25 = vpop.eup %1801  ;;  %v1224_v26 = vmul.f32 1.442695, %v1200_v23  ;;  %v1409_v23 = vld [vmem:[%s2619_s9 + $0x8] sm:$0xff] }
 0x347   : > { %1254 = vadd.xlane.f32.xlu0 %v2393_v25 }
 0x348   : > { %1803 = vpow2.f32 %v1224_v26 }
 0x34b   : > { %v1179_v27 = vpop.xlane.xlu0 %1178 }
 0x34c   : > { %v1201_v28 = vsub.f32 %v2350_v33, %v1179_v27  ;;  %v1410_v27 = vld [vmem:[%s2619_s9 + $0x10] sm:$0xff] }
 0x34e   : > { %v2397_v30 = vpop.eup %1803  ;;  %v1226_v31 = vmul.f32 1.442695, %v1201_v28 }
 0x34f   : > { %1256 = vadd.xlane.f32.xlu1 %v2397_v30 }
 0x350   : > { %1805 = vpow2.f32 %v1226_v31  ;;  %v1411_v31 = vld [vmem:[%s2619_s9 + $0x18] sm:$0xff] }
 0x353   : > { %v1181_v32 = vpop.xlane.xlu1 %1180 }
 0x354   : > { %v1202_v39 = vsub.f32 %v2353_v35, %v1181_v32 }
 0x356   : > { %v2401_v40 = vpop.eup %1805  ;;  %v1228_v9 = vmul.f32 1.442695, %v1202_v39  ;;  %v1412_v39 = vld [vmem:[%s2619_s9 + $0x20] sm:$0xff] }
 0x357   : > { %1258 = vadd.xlane.f32.xlu0 %v2401_v40 }
 0x358   : > { %1807 = vpow2.f32 %v1228_v9 }
 0x35b   : > { %v1183_v44 = vpop.xlane.xlu0 %1182 }
 0x35c   : > { %v1203_v46 = vsub.f32 %v2356_v36, %v1183_v44  ;;  %v1413_v44 = vld [vmem:[%s2619_s9 + $0x28] sm:$0xff] }
 0x35e   : > { %v2405_v47 = vpop.eup %1807  ;;  %v1230_v33 = vmul.f32 1.442695, %v1203_v46 }
 0x35f   : > { %1260 = vadd.xlane.f32.xlu1 %v2405_v47 }
 0x360   : > { %1809 = vpow2.f32 %v1230_v33  ;;  %v1414_v33 = vld [vmem:[%s2619_s9 + $0x30] sm:$0xff] }
 0x363   : > { %v1185_v52 = vpop.xlane.xlu1 %1184 }
 0x364   : > { %v1204_v42 = vsub.f32 %v2359_v37, %v1185_v52 }
 0x366   : > { %v2409_v54 = vpop.eup %1809  ;;  %v1232_v35 = vmul.f32 1.442695, %v1204_v42  ;;  %v1415_v42 = vld [vmem:[%s2619_s9 + $0x38] sm:$0xff] }
 0x367   : > { %1262 = vadd.xlane.f32.xlu0 %v2409_v54 }
 0x368   : > { %1811 = vpow2.f32 %v1232_v35 }
 0x36b   : > { %v1187_v55 = vpop.xlane.xlu0 %1186 }
 0x36c   : > { %v1205_v56 = vsub.f32 %v2362_v38, %v1187_v55 }
 0x36e   : > { %v2413_v48 = vpop.eup %1811  ;;  %v1234_v36 = vmul.f32 1.442695, %v1205_v56 }
 0x36f   : > { %1264 = vadd.xlane.f32.xlu1 %v2413_v48 }
 0x370   : > { %1813 = vpow2.f32 %v1234_v36 }
 0x373   : > { %v1189_v58 = vpop.xlane.xlu1 %1188 }
 0x374   : > { %v1206_v60 = vsub.f32 %v2365_v41, %v1189_v58  ;;  %v956_v41 = vld [vmem:[%s2617_s7] sm:$0xff] }
 0x376   : > { %v2417_v61 = vpop.eup %1813  ;;  %v1236_v37 = vmul.f32 1.442695, %v1206_v60 }
 0x377   : > { %1266 = vadd.xlane.f32.xlu0 %v2417_v61 }
 0x378   : > { %1815 = vpow2.f32 %v1236_v37 }
 0x37b   : > { %v1191_v62 = vpop.xlane.xlu0 %1190 }
 0x37c   : > { %v1207_v0 = vsub.f32 %v2368_v50, %v1191_v62  ;;  %v958_v50 = vld [vmem:[%s2617_s7 + $0x10] sm:$0xff]  ;;  %v1241_v26 = vpop.xlane.xlu1 %1240 }
 0x37e   : > { %v2421_v1 = vpop.eup %1815  ;;  %v1238_v38 = vmul.f32 1.442695, %v1207_v0 }
 0x37f   : > { %1268 = vadd.xlane.f32.xlu1 %v2421_v1 }
 0x380   : > { %1817 = vpow2.f32 %v1238_v38 }
 0x384   : > { %v1243_v28 = vpop.xlane.xlu0 %1242 }
 0x385   : > { %1819 = vrcp.f32 %v1243_v28 }
 0x386   : > { %v2424_v4 = vpop.eup %1817  ;;  %1821 = vrcp.f32 %v1241_v26 }
 0x387   : > { %1270 = vadd.xlane.f32.xlu0 %v2424_v4 }
 0x38b   : > { %v1820_v58 = vpop.eup %1819 }
 0x38c   : > { %v1822_v60 = vpop.eup %1821  ;;  %v2476_v0 = vmul.f32 %v1820_v58, %v2374_v43 }
 0x392   : > { %v1245_v32 = vpop.xlane.xlu1 %1244 }
 0x393   : > { %1823 = vrcp.f32 %v1245_v32 }
 0x398   : > { %966 = vperm.xlu1 %1767, %v956_v41   ;;  %v2479_v41 = vmul.f32 %v1822_v60, %v2370_v51 }
 0x399   : > { %v1824_v62 = vpop.eup %1823 }
 0x39a   : > { %v1247_v9 = vpop.xlane.xlu0 %1246 }
 0x39b   : > { %971 = vperm.xlu0 %1766, %v957_v7   ;;  %1825 = vrcp.f32 %v1247_v9  ;;  %v2482_v7 = vmul.f32 %v1824_v62, %v2377_v57 }
 0x3a0   : > { %976 = vperm.xlu1 %1767, %v958_v50  }
 0x3a1   : > { %v1826_v38 = vpop.eup %1825 }
 0x3a2   : > { %v1249_v46 = vpop.xlane.xlu1 %1248 }
 0x3a3   : > { %981 = vperm.xlu0 %1766, %v959_v10   ;;  %1827 = vrcp.f32 %v1249_v46  ;;  %v1304_v10 = vadd.f32 %v2476_v0, %v2479_v41 }
 0x3a5   : > { %v1305_v43 = vadd.f32 %v1304_v10, %v2482_v7 }
 0x3a8   : > { %986 = vperm.xlu1 %1767, %v960_v12   ;;  %v2487_v12 = vmul.f32 %v1826_v38, %v2380_v49 }
 0x3a9   : > { %v1828_v50 = vpop.eup %1827 }
 0x3aa   : > { %v1251_v52 = vpop.xlane.xlu0 %1250  ;;  %v1306_v57 = vadd.f32 %v1305_v43, %v2487_v12 }
 0x3ab   : > { %991 = vperm.xlu0 %1766, %v961_v15   ;;  %1829 = vrcp.f32 %v1251_v52 }
 0x3b0   : > { %996 = vperm.xlu1 %1767, %v962_v16  }
 0x3b1   : > { %v1830_v16 = vpop.eup %1829 }
 0x3b2   : > { %v1253_v35 = vpop.xlane.xlu1 %1252 }
 0x3b3   : > { %1001 = vperm.xlu0 %1766, %v963_v20   ;;  %1831 = vrcp.f32 %v1253_v35  ;;  %v2491_v20 = vmul.f32 %v1828_v50, %v2383_v3 }
 0x3b5   : > { %v1307_v49 = vadd.f32 %v1306_v57, %v2491_v20 }
 0x3b8   : > { %1418 = vperm.xlu1 %1767, %v1408_v21  }
 0x3b9   : > { %v1832_v21 = vpop.eup %1831 }
 0x3ba   : > { %v1255_v55 = vpop.xlane.xlu0 %1254 }
 0x3bb   : > { %1423 = vperm.xlu0 %1766, %v1409_v23   ;;  %1833 = vrcp.f32 %v1255_v55  ;;  %v2495_v23 = vmul.f32 %v1830_v16, %v2386_v11 }
 0x3c0   : > { %1428 = vperm.xlu1 %1767, %v1410_v27   ;;  %v1294_v27 = vmul.f32 %v1832_v21, %v2389_v18 }
 0x3c1   : > { %v1834_v26 = vpop.eup %1833 }
 0x3c2   : > { %v1257_v56 = vpop.xlane.xlu1 %1256  ;;  %v1295_v3 = vmul.f32 %v1834_v26, %v2393_v25 }
 0x3c3   : > { %1433 = vperm.xlu0 %1766, %v1411_v31   ;;  %1835 = vrcp.f32 %v1257_v56  ;;  %v1308_v31 = vadd.f32 %v1307_v49, %v2495_v23 }
 0x3c5   : > { %v1309_v9 = vadd.f32 %v1308_v31, %v1294_v27 }
 0x3c8   : > { %1438 = vperm.xlu1 %1767, %v1412_v39  }
 0x3c9   : > { %v1836_v28 = vpop.eup %1835 }
 0x3ca   : > { %v1259_v36 = vpop.xlane.xlu0 %1258 }
 0x3cb   : > { %1443 = vperm.xlu0 %1766, %v1413_v44   ;;  %1837 = vrcp.f32 %v1259_v36  ;;  %v1296_v44 = vmul.f32 %v1836_v28, %v2397_v30 }
 0x3d0   : > { %1448 = vperm.xlu1 %1767, %v1414_v33   ;;  %v1310_v33 = vadd.f32 %v1309_v9, %v1295_v3 }
 0x3d1   : > { %v1838_v39 = vpop.eup %1837 }
 0x3d2   : > { %v1261_v37 = vpop.xlane.xlu1 %1260  ;;  %v1297_v52 = vmul.f32 %v1838_v39, %v2401_v40  ;;  %v1311_v18 = vadd.f32 %v1310_v33, %v1296_v44 }
 0x3d3   : > { %1453 = vperm.xlu0 %1766, %v1415_v42   ;;  %1839 = vrcp.f32 %v1261_v37 }
 0x3d4   : > { %v1312_v56 = vadd.f32 %v1311_v18, %v1297_v52 }
 0x3d9   : > { %v1840_v46 = vpop.eup %1839 }
 0x3da   : > { %v1263_v15 = vpop.xlane.xlu0 %1262  ;;  %v1298_v35 = vmul.f32 %v1840_v46, %v2405_v47 }
 0x3db   : > { %1841 = vrcp.f32 %v1263_v15 }
 0x3dc   : > { %v1313_v58 = vadd.f32 %v1312_v56, %v1298_v35 }
 0x3e1   : > { %v1842_v42 = vpop.eup %1841 }
 0x3e2   : > { %v1265_v51 = vpop.xlane.xlu1 %1264  ;;  %v1299_v25 = vmul.f32 %v1842_v42, %v2409_v54 }
 0x3e3   : > { %1843 = vrcp.f32 %v1265_v51 }
 0x3e4   : > { %v1314_v62 = vadd.f32 %v1313_v58, %v1299_v25 }
 0x3e9   : > { %v1844_v55 = vpop.eup %1843 }
 0x3ea   : > { %v1267_v32 = vpop.xlane.xlu0 %1266  ;;  %v1300_v60 = vmul.f32 %v1844_v55, %v2413_v48 }
 0x3eb   : > { %1845 = vrcp.f32 %v1267_v32 }
 0x3ec   : > { %v1315_v40 = vadd.f32 %v1314_v62, %v1300_v60 }
 0x3f1   : > { %v1846_v36 = vpop.eup %1845 }
 0x3f2   : > { %v1269_v11 = vpop.xlane.xlu1 %1268  ;;  %v1301_v38 = vmul.f32 %v1846_v36, %v2417_v61 }
 0x3f3   : > { %1847 = vrcp.f32 %v1269_v11 }
 0x3f4   : > { %v1316_v10 = vadd.f32 %v1315_v40, %v1301_v38 }
 0x3f9   : > { %v1848_v37 = vpop.eup %1847 }
 0x3fa   : > { %v1271_v30 = vpop.xlane.xlu0 %1270  ;;  %v1302_v50 = vmul.f32 %v1848_v37, %v2421_v1 }
 0x3fb   : > { %1849 = vrcp.f32 %v1271_v30 }
 0x3fc   : > { %v1317_v16 = vadd.f32 %v1316_v10, %v1302_v50 }
 0x401   : > { %v1850_v15 = vpop.eup %1849 }
 0x402   : > { %v1303_v47 = vmul.f32 %v1850_v15, %v2424_v4 }
 0x404   : > { %v1318_v43 = vadd.f32 %v1317_v16, %v1303_v47 }
 0x406   : > { %v1319_v54 = vrot.slane %v1318_v43, 4 }
 0x408   : > { %v1320_v51 = vadd.f32 %v1319_v54, %v1318_v43 }
 0x40a   : > { %v1321_v21 = vrot.slane %v1320_v51, 2 }
 0x40c   : > { %v1322_v57 = vadd.f32 %v1321_v21, %v1320_v51 }
 0x40e   : > { %v1323_v48 = vrot.slane %v1322_v57, 1 }
 0x410   : > { %v1324_v26 = vadd.f32 %v1323_v48, %v1322_v57 }
 0x412   : > { %v1325_v49 = vadd.f32 1e-09, %v1324_v26 }
 0x414   : > { %1851 = vrcp.f32 %v1325_v49 }
 0x41a   : > { %v1852_v28 = vpop.eup %1851 }
 0x41b   : > { %v1341_v31 = vmul.f32 %v1852_v28, %v1302_v50  ;;  %v1342_v61 = vmul.f32 %v1852_v28, %v1303_v47  ;;  %v1339_v39 = vmul.f32 %v1852_v28, %v1300_v60  ;;  %v1340_v1 = vmul.f32 %v1852_v28, %v1301_v38 }
 0x41c   : > { %v1337_v11 = vmul.f32 %v1852_v28, %v1298_v35  ;;  %v1338_v4 = vmul.f32 %v1852_v28, %v1299_v25  ;;  %v1335_v33 = vmul.f32 %v1852_v28, %v1296_v44  ;;  %v1336_v42 = vmul.f32 %v1852_v28, %v1297_v52  ;;  %v972_v25 = vpop.permute.xlu0 %971 }
 0x41d   : > { %v1354_v32 = vpack.c.bf16 %v1342_v61, %v1341_v31  ;;  %v1353_v9 = vpack.c.bf16 %v1340_v1, %v1339_v39  ;;  %v1333_v55 = vmul.f32 %v1852_v28, %v1294_v27  ;;  %v1334_v56 = vmul.f32 %v1852_v28, %v1295_v3  ;;  %v967_v3 = vpop.permute.xlu1 %966 }
 0x41e   : > { %v1352_v46 = vpack.c.bf16 %v1338_v4, %v1337_v11  ;;  %v1351_v18 = vpack.c.bf16 %v1336_v42, %v1335_v33  ;;  %v1331_v58 = vmul.f32 %v1852_v28, %v2491_v20  ;;  %v1332_v30 = vmul.f32 %v1852_v28, %v2495_v23  ;;  %v1389_v4 = vld [vmem:[%s2618_s8 + $0x28] sm:$0xff]  ;;  %v1390_v33 = vld [vmem:[%s2618_s8 + $0x30] sm:$0xff]  ;;  %v1391_v42 = vld [vmem:[%s2618_s8 + $0x38] sm:$0xff] }
 0x41f   : > { %1355 = vmatpush.bf16.msra.mxu3 %v1354_v32  ;;  %v1350_v36 = vpack.c.bf16 %v1334_v56, %v1333_v55  ;;  %v1329_v37 = vmul.f32 %v1852_v28, %v2482_v7  ;;  %v1330_v35 = vmul.f32 %v1852_v28, %v2487_v12  ;;  %v1327_v52 = vmul.f32 %v1852_v28, %v2479_v41 }
 0x420   : > { %v1349_v60 = vpack.c.bf16 %v1332_v30, %v1331_v58  ;;  %v1328_v27 = vmul.f32 %v1852_v28, %v2476_v0  ;;  %v1028_v62 = vadd.f32 %v2329_v2, %v972_v25  ;;  %v1026_v23 = vadd.f32 %v2326_v63, %v967_v3 }
 0x421   : > { %v1348_v44 = vpack.c.bf16 %v1330_v35, %v1329_v37 }
 0x422   : > { %v1347_v20 = vpack.c.bf16 %v1328_v27, %v1327_v52  ;;  %v1343_v38 = vpack.c.bf16 %v1028_v62, %v1026_v23 }
 0x423   : > { %1356 = vmatpush.bf16.msra.mxu3 %v1353_v9 }
 0x424   : > { %v982_v7 = vpop.permute.xlu0 %981 }
 0x425   : > { %v977_v40 = vpop.permute.xlu1 %976  ;;  %v1033_v12 = vadd.f32 %v2334_v8, %v982_v7 }
 0x426   : > { %v1031_v50 = vadd.f32 %v2332_v5, %v977_v40 }
 0x427   : > { %1357 = vmatpush.bf16.msra.mxu3 %v1352_v46 }
 0x428   : > { %v1344_v10 = vpack.c.bf16 %v1033_v12, %v1031_v50 }
 0x42b   : > { %1358 = vmatpush.bf16.msra.mxu3 %v1351_v18  ;;  %v1403_v18 = vpack.c.bf16 %v1391_v42, %v1390_v33 }
 0x42c   : > { %v992_v41 = vpop.permute.xlu0 %991 }
 0x42d   : > { %v987_v0 = vpop.permute.xlu1 %986  ;;  %v1038_v15 = vadd.f32 %v2339_v17, %v992_v41 }
 0x42e   : > { %v1036_v2 = vadd.f32 %v2337_v14, %v987_v0 }
 0x42f   : > { %1359 = vmatpush.bf16.msra.mxu3 %v1350_v36 }
 0x430   : > { %v1345_v47 = vpack.c.bf16 %v1038_v15, %v1036_v2 }
 0x433   : > { %1360 = vmatpush.bf16.msra.mxu3 %v1349_v60 }
 0x434   : > { %v1002_v63 = vpop.permute.xlu0 %1001 }
 0x435   : > { %v997_v16 = vpop.permute.xlu1 %996  ;;  %v1043_v43 = vadd.f32 %v2345_v22, %v1002_v63 }
 0x436   : > { %v1041_v54 = vadd.f32 %v2342_v19, %v997_v16 }
 0x437   : > { %1361 = vmatpush.bf16.msra.mxu3 %v1348_v44 }
 0x438   : > { %v1346_v51 = vpack.c.bf16 %v1043_v43, %v1041_v54 }
 0x43b   : > { %1362 = vmatpush.bf16.msra.mxu3 %v1347_v20 }
 0x43c   : > { %v1424_v30 = vpop.permute.xlu0 %1423 }
 0x43d   : > { %v1419_v55 = vpop.permute.xlu1 %1418 }
 0x43e   : > { %1363 = vmatmul.bf16.vlgmr.msra.gmra.mxu3 %v1343_v38 }
 0x444   : > { %v1434_v3 = vpop.permute.xlu0 %1433 }
 0x445   : > { %v1429_v35 = vpop.permute.xlu1 %1428 }
 0x44c   : > { %v1444_v50 = vpop.permute.xlu0 %1443 }
 0x44d   : > { %v1439_v23 = vpop.permute.xlu1 %1438 }
 0x44e   : > { %1368 = vmatmul.bf16.gmra.mxu3 %v1344_v10 }
 0x454   : > { %v1454_v63 = vpop.permute.xlu0 %1453 }
 0x455   : > { %v1449_v0 = vpop.permute.xlu1 %1448 }
 0x45e   : > { %1373 = vmatmul.bf16.gmra.mxu3 %v1345_v47 }
 0x46e   : > { %1378 = vmatmul.bf16.gmra.mxu3 %v1346_v51 }
 0x4c1   : > { %v1364_v8 = vpop.f32.mrf.mxu3 }
 0x4c2   : > { %v1392_v11 = vsub.f32 %v2278_v24, %v1364_v8 }
 0x4c9   : > { %v1366_v5 = vpop.f32.mrf.mxu3 }
 0x4ca   : > { %v1393_v1 = vsub.f32 %v2282_v29, %v1366_v5  ;;  %v1388_v29 = vld [vmem:[%s2618_s8 + $0x20] sm:$0xff] }
 0x4cb   : > { %v1402_v46 = vpack.c.bf16 %v1389_v4, %v1388_v29 }
 0x4d1   : > { %v1369_v21 = vpop.f32.mrf.mxu3 }
 0x4d2   : > { %v1394_v39 = vsub.f32 %v2266_v6, %v1369_v21  ;;  %v1386_v6 = vld [vmem:[%s2618_s8 + $0x10] sm:$0xff] }
 0x4d9   : > { %v1371_v57 = vpop.f32.mrf.mxu3 }
 0x4da   : > { %v1395_v19 = vsub.f32 %v2271_v13, %v1371_v57  ;;  %v1387_v13 = vld [vmem:[%s2618_s8 + $0x18] sm:$0xff] }
 0x4db   : > { %v1401_v24 = vpack.c.bf16 %v1387_v13, %v1386_v6 }
 0x4dc   : > { %v1405_v9 = vpack.c.bf16 %v1395_v19, %v1394_v39 }
 0x4e1   : > { %v1374_v48 = vpop.f32.mrf.mxu3 }
 0x4e2   : > { %v1396_v22 = vsub.f32 %v2254_v53, %v1374_v48  ;;  %v1404_v53 = vpack.c.bf16 %v1393_v1, %v1392_v11 }
 0x4e9   : > { %v1376_v26 = vpop.f32.mrf.mxu3 }
 0x4ea   : > { %v1397_v31 = vsub.f32 %v2259_v59, %v1376_v26 }
 0x4ec   : > { %v1406_v32 = vpack.c.bf16 %v1397_v31, %v1396_v22 }
 0x4f1   : > { %v1379_v49 = vpop.f32.mrf.mxu3 }
 0x4f2   : > { %v1398_v14 = vsub.f32 %v2243_v34, %v1379_v49  ;;  %v1384_v34 = vld [vmem:[%s2618_s8] sm:$0xff] }
 0x4f9   : > { %v1381_v17 = vpop.f32.mrf.mxu3 }
 0x4fa   : > { %v1399_v28 = vsub.f32 %v2248_v45, %v1381_v17  ;;  %v1385_v45 = vld [vmem:[%s2618_s8 + $0x8] sm:$0xff] }
 0x4fb   : > { %v1400_v59 = vpack.c.bf16 %v1385_v45, %v1384_v34 }
 0x4fc   : > { %v1407_v61 = vpack.c.bf16 %v1399_v28, %v1398_v14 }
 0x4fe   : > { %1472 = vmatpush.bf16.msrb.mxu0 %v1407_v61 }
 0x502   : > { %1473 = vmatpush.bf16.msrb.mxu0 %v1406_v32 }
 0x506   : > { %1474 = vmatpush.bf16.msrb.mxu0 %v1405_v9 }
 0x50a   : > { %1475 = vmatpush.bf16.msrb.mxu0 %v1404_v53 }
 0x50d   : > { %1743 = vmatmul.msk.bf16.vlgmr.msrb.gmra.mxu0 %vm926_vm11, %v1400_v59 }
 0x51d   : > { %1744 = vmatmul.msk.bf16.gmra.mxu0 %vm926_vm11, %v1401_v24 }
 0x52d   : > { %1745 = vmatmul.msk.bf16.gmra.mxu0 %vm926_vm11, %v1402_v46 }
 0x53d   : > { %1746 = vmatmul.msk.bf16.gmra.mxu0 %vm926_vm11, %v1403_v18 }
 0x58a   : > { %v1477_v56 = vpop.f32.mrf.mxu0 }
 0x58b   : > { %v1478_v36 = vadd.f32 %v1477_v56, %v1419_v55 }
 0x58d   : > { %1497 = vst [vmem:[%s2563_s18] sm:$0xff] %v1478_v36  ;;  %1505 = vadd.xlane.f32.xlu1 %v1478_v36  ;;  %v1521_v58 = vmul.f32 %v1478_v36, %v1478_v36 }
 0x58f   : > { %1529 = vadd.xlane.f32.xlu2 %v1521_v58 }
 0x592   : > { %v1479_v60 = vpop.f32.mrf.mxu0 }
 0x593   : > { %v1480_v37 = vadd.f32 %v1479_v60, %v1424_v30 }
 0x595   : > { %1498 = vst [vmem:[%s2563_s18 + $0x8] sm:$0xff] %v1480_v37  ;;  %1507 = vadd.xlane.f32.xlu0 %v1480_v37  ;;  %v1522_v52 = vmul.f32 %v1480_v37, %v1480_v37 }
 0x59a   : > { %v1482_v25 = vpop.f32.mrf.mxu0 }
 0x59b   : > { %v1483_v44 = vadd.f32 %v1482_v25, %v1429_v35 }
 0x59d   : > { %1499 = vst [vmem:[%s2563_s18 + $0x10] sm:$0xff] %v1483_v44  ;;  %1531 = vadd.xlane.f32.xlu0 %v1522_v52  ;;  %1509 = vadd.xlane.f32.xlu2 %v1483_v44  ;;  %v1523_v27 = vmul.f32 %v1483_v44, %v1483_v44 }
 0x59f   : > { %1533 = vadd.xlane.f32.xlu1 %v1523_v27 }
 0x5a2   : > { %v1484_v62 = vpop.f32.mrf.mxu0 }
 0x5a3   : > { %v1485_v20 = vadd.f32 %v1484_v62, %v1434_v3 }
 0x5a5   : > { %1500 = vst [vmem:[%s2563_s18 + $0x18] sm:$0xff] %v1485_v20  ;;  %1511 = vadd.xlane.f32.xlu2 %v1485_v20  ;;  %v1524_v40 = vmul.f32 %v1485_v20, %v1485_v20 }
 0x5aa   : > { %v1487_v38 = vpop.f32.mrf.mxu0 }
 0x5ab   : > { %v1488_v7 = vadd.f32 %v1487_v38, %v1439_v23 }
 0x5ad   : > { %1501 = vst [vmem:[%s2563_s18 + $0x20] sm:$0xff] %v1488_v7  ;;  %1535 = vadd.xlane.f32.xlu2 %v1524_v40  ;;  %1513 = vadd.xlane.f32.xlu1 %v1488_v7  ;;  %v1525_v12 = vmul.f32 %v1488_v7, %v1488_v7 }
 0x5af   : > { %1537 = vadd.xlane.f32.xlu0 %v1525_v12 }
 0x5b2   : > { %v1489_v10 = vpop.f32.mrf.mxu0 }
 0x5b3   : > { %v1490_v41 = vadd.f32 %v1489_v10, %v1444_v50 }
 0x5b5   : > { %1502 = vst [vmem:[%s2563_s18 + $0x28] sm:$0xff] %v1490_v41  ;;  %1515 = vadd.xlane.f32.xlu2 %v1490_v41  ;;  %v1526_v51 = vmul.f32 %v1490_v41, %v1490_v41 }
 0x5ba   : > { %v1492_v15 = vpop.f32.mrf.mxu0 }
 0x5bb   : > { %v1493_v2 = vadd.f32 %v1492_v15, %v1449_v0 }
 0x5bd   : > { %1503 = vst [vmem:[%s2563_s18 + $0x30] sm:$0xff] %v1493_v2  ;;  %1517 = vadd.xlane.f32.xlu0 %v1493_v2  ;;  %v1527_v47 = vmul.f32 %v1493_v2, %v1493_v2 }
 0x5bf   : > { %1541 = vadd.xlane.f32.xlu2 %v1527_v47 }
 0x5c2   : > { %v1494_v16 = vpop.f32.mrf.mxu0 }
 0x5c3   : > { %v1495_v43 = vadd.f32 %v1494_v16, %v1454_v63 }
 0x5c5   : > { %1504 = vst [vmem:[%s2563_s18 + $0x38] sm:$0xff] %v1495_v43  ;;  %1519 = vadd.xlane.f32.xlu1 %v1495_v43  ;;  %v1528_v54 = vmul.f32 %v1495_v43, %v1495_v43 }
 0x5c7   : > { %1543 = vadd.xlane.f32.xlu0 %v1528_v54 }
 0x5cd   : > { %1539 = vadd.xlane.f32.xlu1 %v1526_v51 }
 0x600   : > { %v1506_v8 = vpop.xlane.xlu1 %1505 }
 0x601   : > { %1545 = vst.msk [vmem:[%s472_s20] sm:$0xff] %vm519_vm0, %v1506_v8 }
 0x602   : > { %v1530_v5 = vpop.xlane.xlu2 %1529 }
 0x603   : > { %1553 = vst.msk [vmem:[%s2581_s23] sm:$0xff] %vm519_vm0, %v1530_v5 }
 0x608   : > { %v1508_v21 = vpop.xlane.xlu0 %1507 }
 0x609   : > { %1546 = vst.msk [vmem:[%s472_s20 + $0x8] sm:$0xff] %vm519_vm0, %v1508_v21 }
 0x610   : > { %v1532_v57 = vpop.xlane.xlu0 %1531  ;;  %v1510_v48 = vpop.xlane.xlu2 %1509 }
 0x611   : > { %1554 = vst.msk [vmem:[%s2581_s23 + $0x8] sm:$0xff] %vm519_vm0, %v1532_v57 }
 0x612   : > { %1547 = vst.msk [vmem:[%s472_s20 + $0x10] sm:$0xff] %vm519_vm0, %v1510_v48  ;;  %v1534_v26 = vpop.xlane.xlu1 %1533 }
 0x613   : > { %1555 = vst.msk [vmem:[%s2581_s23 + $0x10] sm:$0xff] %vm519_vm0, %v1534_v26 }
 0x618   : > { %v1512_v49 = vpop.xlane.xlu2 %1511 }
 0x619   : > { %1548 = vst.msk [vmem:[%s472_s20 + $0x18] sm:$0xff] %vm519_vm0, %v1512_v49 }
 0x620   : > { %v1536_v17 = vpop.xlane.xlu2 %1535  ;;  %v1514_v14 = vpop.xlane.xlu1 %1513 }
 0x621   : > { %1556 = vst.msk [vmem:[%s2581_s23 + $0x18] sm:$0xff] %vm519_vm0, %v1536_v17 }
 0x622   : > { %1549 = vst.msk [vmem:[%s472_s20 + $0x20] sm:$0xff] %vm519_vm0, %v1514_v14  ;;  %v1538_v28 = vpop.xlane.xlu0 %1537 }
 0x623   : > { %1557 = vst.msk [vmem:[%s2581_s23 + $0x20] sm:$0xff] %vm519_vm0, %v1538_v28 }
 0x628   : > { %v1516_v31 = vpop.xlane.xlu2 %1515 }
 0x629   : > { %1550 = vst.msk [vmem:[%s472_s20 + $0x28] sm:$0xff] %vm519_vm0, %v1516_v31 }
 0x630   : > { %v1518_v61 = vpop.xlane.xlu0 %1517 }
 0x631   : > { %1551 = vst.msk [vmem:[%s472_s20 + $0x30] sm:$0xff] %vm519_vm0, %v1518_v61 }
 0x632   : > { %v1542_v22 = vpop.xlane.xlu2 %1541 }
 0x633   : > { %1559 = vst.msk [vmem:[%s2581_s23 + $0x30] sm:$0xff] %vm519_vm0, %v1542_v22 }
 0x638   : > { %v1520_v19 = vpop.xlane.xlu1 %1519 }
 0x639   : > { %1552 = vst.msk [vmem:[%s472_s20 + $0x38] sm:$0xff] %vm519_vm0, %v1520_v19 }
 0x63a   : > { %v1544_v32 = vpop.xlane.xlu0 %1543 }
 0x63b   : > { %1560 = vst.msk [vmem:[%s2581_s23 + $0x38] sm:$0xff] %vm519_vm0, %v1544_v32 }
 0x640   : > { %v1540_v39 = vpop.xlane.xlu1 %1539 }
 0x641   : > { %1558 = vst.msk [vmem:[%s2581_s23 + $0x28] sm:$0xff] %vm519_vm0, %v1540_v39 }
 0x642 PF: > { %s24_s25 = sadd.s32 1, %s1859_s25  }
 0x643   : > { %p21_p4 = scmp.ge.s32.totalorder %s24_s25, 4  }
 0x645   :  { %23 = sbr.rel (!%p21_p4) target bundleno = 1 (0x1), region = 126 }

// kernel: stacked_attention.9
= control target key start
LH: loop header
LB: loop body
LE: loop exit
PB: predicated region body
PF: predicated region fallthrough
CT: control target
= control target key end

     0   :  { %11 = vsyncpa [#allocation3], 0  ;;  %s1471_s0 = inlined_call_operand.vmem [shape: f32[2,64,128], index: 0, kind: input, shape index: {}]   ;;  %s1472_s1 = inlined_call_operand.vmem [shape: f32[2,64,1], index: 1, kind: input, shape index: {}]   ;;  %s1473_s2 = inlined_call_operand.vmem [shape: f32[2,64,1], index: 2, kind: input, shape index: {}]   ;;  %s1474_s3 = inlined_call_operand.vmem [shape: f32[64,1], index: 3, kind: input, shape index: {}]   ;;  %s1475_s4 = inlined_call_operand.vmem [shape: f32[64,1], index: 4, kind: input, shape index: {}]   ;;  %s1476_s5 = inlined_call_operand.vmem [shape: f32[2,64,128], index: 5, kind: input, shape index: {}]   ;;  %s1477_s6 = inlined_call_operand.hbm [shape: f32[2,128,128], index: 6, kind: output, shape index: {}]  }
   0x1   :  { %13 = vsyncpa [#allocation3 + $0x1], 0  ;;  %s1008_s21 = smov 0   ;;  %s1010_s22 = smov 0  }
   0x2   :  { %s1012_s23 = smov 0   ;;  %s1014_s24 = smov 0  }
   0x3 LB: > { %s1029_s25 = sadd.s32 4294967295, %s967_s24   ;;  %s824_s26 = sadd.s32 4294967294, %s967_s24   ;;  %s967_s24 = sphi %s1014_s24, %s1493_s24   ;;  %s963_s23 = sphi %s1012_s23, %s1492_s23   ;;  %s959_s22 = sphi %s1010_s22, %s1491_s22   ;;  %s955_s21 = sphi %s1008_s21, %s1490_s21  }
   0x4   : > { %s1033_s27 = sadd.s32 1, %s967_s24   ;;  %s162_s28 = sadd.s32 1, %s963_s23 }
   0x5   : > { %s159_s29 = ssub.s32 %s967_s24, %s1033_s27  ;;  %p172_p0 = scmp.ne.s32.totalorder %s963_s23, %s959_s22 }
   0x6   : > { %p160_p1 = scmp.eq.s32.totalorder %s159_s29, 0  ;;  %p173_p2 = scmp.eq.s32.totalorder %s1029_s25, 1 }
   0x7   : > { %p178_p3 = scmp.ne.s32.totalorder %s959_s22, %s955_s21  ;;  %p179_p4 = scmp.eq.s32.totalorder %s824_s26, 1 }
   0x8   : > { %s1044_s30 = scalar_select %p160_p1, %s963_s23, %s162_s28  }
   0x9   : > { %p1046_p5 = por %p173_p2, %p172_p0  ;;  %p1050_p6 = por %p179_p4, %p178_p3 }
   0xa   : > { %p827_p7 = scmp.ge.s32.totalorder %s967_s24, 1  ;;  %p225_p8 = scmp.lt.s32.totalorder %s967_s24, 3 }
   0xc   : > { %p226_p9 = pnand %p827_p7, %p225_p8 }
   0xd   : > { %p260_p10 = scmp.lt.s32.totalorder (!%p226_p9), %s1029_s25, 1  ;;  %s257_s16 = sand.u32 (!%p226_p9), 1, %s959_s22  }
   0xe   : > { %229 = sbr.rel (%p226_p9) target bundleno = 248 (0xf8), region = 44  ;;  %s828_s26 = sshll.u32 (!%p226_p9), %s257_s16, 7 }
   0xf   : > { %s1365_s28 = scalar_lea.vmem (!%p226_p9), [#allocation2], %s828_s26  ;;  %s840_s11 = sshll.u32 (!%p226_p9), %s1029_s25, 7 }
  0x10   : > { %s746_s14 = scalar_lea.hbm (!%p226_p9), %s1477_s6, %s840_s11  ;;  %s925_s29 = scalar_lea.hbm (!%p226_p9), %s1477_s6, 256 }
  0x13   : > { %v282_v0 = vld [vmem:[%s1472_s1 + $0x20] sm:$0xff]  ;;  %vm310_vm0 = vcmask 7168   ;;  %v969_v3 = vmov 0   ;;  %v970_v5 = vmov 256.0   ;;  %v280_v6 = vld [vmem:[%s1472_s1 + $0x10] sm:$0xff]  ;;  %v283_v22 = vld [vmem:[%s1472_s1 + $0x28] sm:$0xff] }
  0x14   : > { %v290_v1 = vld [vmem:[%s1472_s1 + $0x60] sm:$0xff]  ;;  %886 = vset.pattern.permute.xlu2 %v969_v3  ;;  %885 = vset.pattern.permute.xlu1 %v969_v3  ;;  %887 = vrcp.f32 %v970_v5  ;;  %v288_v7 = vld [vmem:[%s1472_s1 + $0x50] sm:$0xff]  ;;  %v323_v8 = vsel %vm310_vm0, %v282_v0, 0.0  ;;  %v317_v18 = vsel %vm310_vm0, %v280_v6, 0.0  ;;  %v291_v23 = vld [vmem:[%s1472_s1 + $0x68] sm:$0xff]  ;;  %v326_v39 = vsel %vm310_vm0, %v283_v22, 0.0 }
  0x15   : > { %v298_v2 = vld [vmem:[%s1473_s2 + $0x20] sm:$0xff]  ;;  %884 = vset.pattern.permute.xlu0 %v969_v3  ;;  %v296_v9 = vld [vmem:[%s1473_s2 + $0x10] sm:$0xff]  ;;  %v324_v12 = vsel %vm310_vm0, %v290_v1, 0.0  ;;  %v318_v19 = vsel %vm310_vm0, %v288_v7, 0.0  ;;  %v299_v26 = vld [vmem:[%s1473_s2 + $0x28] sm:$0xff]  ;;  %v327_v40 = vsel %vm310_vm0, %v291_v23, 0.0 }
  0x16   : > { %v306_v4 = vld [vmem:[%s1473_s2 + $0x60] sm:$0xff]  ;;  %v304_v10 = vld [vmem:[%s1473_s2 + $0x50] sm:$0xff]  ;;  %v362_v13 = vsel %vm310_vm0, %v298_v2, 0.0  ;;  %v356_v20 = vsel %vm310_vm0, %v296_v9, 0.0  ;;  %v307_v27 = vld [vmem:[%s1473_s2 + $0x68] sm:$0xff]  ;;  %v325_v29 = vadd.f32 %v324_v12, %v323_v8  ;;  %v319_v37 = vadd.f32 %v318_v19, %v317_v18  ;;  %s261_s15 = scalar_select %p260_p10, %s1029_s25, 1 }
  0x17   : > { %v278_v11 = vld [vmem:[%s1472_s1] sm:$0xff]  ;;  %v363_v14 = vsel %vm310_vm0, %v306_v4, 0.0  ;;  %v357_v21 = vsel %vm310_vm0, %v304_v10, 0.0  ;;  %v281_v28 = vld [vmem:[%s1472_s1 + $0x18] sm:$0xff]  ;;  %v279_v41 = vld [vmem:[%s1472_s1 + $0x8] sm:$0xff]  ;;  %v365_v46 = vsel %vm310_vm0, %v299_v26, 0.0 }
  0x18   : > { %v286_v15 = vld [vmem:[%s1472_s1 + $0x40] sm:$0xff]  ;;  %v311_v24 = vsel %vm310_vm0, %v278_v11, 0.0  ;;  %v364_v30 = vadd.f32 %v363_v14, %v362_v13  ;;  %v289_v33 = vld [vmem:[%s1472_s1 + $0x58] sm:$0xff]  ;;  %v358_v38 = vadd.f32 %v357_v21, %v356_v20  ;;  %v287_v42 = vld [vmem:[%s1472_s1 + $0x48] sm:$0xff]  ;;  %v366_v47 = vsel %vm310_vm0, %v307_v27, 0.0  ;;  %s838_s17 = sshll.u32 %s261_s15, 6 }
  0x19   : > { %v294_v16 = vld [vmem:[%s1473_s2] sm:$0xff]  ;;  %v312_v25 = vsel %vm310_vm0, %v286_v15, 0.0  ;;  %v297_v34 = vld [vmem:[%s1473_s2 + $0x18] sm:$0xff]  ;;  %v295_v43 = vld [vmem:[%s1473_s2 + $0x8] sm:$0xff]  ;;  %v320_v52 = vsel %vm310_vm0, %v281_v28, 0.0  ;;  %v321_v53 = vsel %vm310_vm0, %v289_v33, 0.0  ;;  %v328_v13 = vadd.f32 %v327_v40, %v326_v39  ;;  %s1358_s20 = scalar_lea.vmem %s1476_s5, %s838_s17  ;;  %s1384_s10 = scalar_lea.vmem %s1471_s0, %s838_s17 }
  0x1a   : > { %v302_v17 = vld [vmem:[%s1473_s2 + $0x40] sm:$0xff]  ;;  %v350_v31 = vsel %vm310_vm0, %v294_v16, 0.0  ;;  %v305_v35 = vld [vmem:[%s1473_s2 + $0x58] sm:$0xff]  ;;  %v888_v36 = vpop.eup %887  ;;  %v313_v45 = vadd.f32 %v312_v25, %v311_v24  ;;  %v303_v48 = vld [vmem:[%s1473_s2 + $0x48] sm:$0xff]  ;;  %v359_v54 = vsel %vm310_vm0, %v297_v34, 0.0  ;;  %v314_v60 = vsel %vm310_vm0, %v279_v41, 0.0 }
  0x1b   : > { %v351_v32 = vsel %vm310_vm0, %v302_v17, 0.0  ;;  %v336_v44 = vmul.f32 256.0, %v888_v36  ;;  %v285_v49 = vld [vmem:[%s1472_s1 + $0x38] sm:$0xff]  ;;  %v284_v57 = vld [vmem:[%s1472_s1 + $0x30] sm:$0xff]  ;;  %vm340_vm1 = vweird.f32 %v888_v36  ;;  %v360_v59 = vsel %vm310_vm0, %v305_v35, 0.0  ;;  %s747_s25 = sshll.u32 %s1365_s28, 4  ;;  %s748_s25 = int_to_ptr.vmem [resolvable:$true] %s747_s25 }
  0x1c   : > { %v293_v50 = vld [vmem:[%s1472_s1 + $0x78] sm:$0xff]  ;;  %v352_v51 = vadd.f32 %v351_v32, %v350_v31  ;;  %v292_v61 = vld [vmem:[%s1472_s1 + $0x70] sm:$0xff]  ;;  %v315_v0 = vsel %vm310_vm0, %v287_v42, 0.0  ;;  %v353_v1 = vsel %vm310_vm0, %v295_v43, 0.0  ;;  %v354_v2 = vsel %vm310_vm0, %v303_v48, 0.0  ;;  %s749_s15 = sshll.u32 %s746_s14, 4  ;;  %s750_s15 = int_to_ptr.hbm [resolvable:$true] %s749_s15 }
  0x1d   : > { %v301_v55 = vld [vmem:[%s1473_s2 + $0x38] sm:$0xff]  ;;  %v337_v58 = vsub.f32 1.0, %v336_v44  ;;  %v300_v62 = vld [vmem:[%s1473_s2 + $0x30] sm:$0xff]  ;;  %v332_v3 = vsel %vm310_vm0, %v285_v49, 0.0  ;;  %v333_v5 = vsel %vm310_vm0, %v293_v50, 0.0  ;;  %v329_v8 = vsel %vm310_vm0, %v284_v57, 0.0 }
  0x1e   : > { %v309_v56 = vld [vmem:[%s1473_s2 + $0x78] sm:$0xff]  ;;  %v308_v63 = vld [vmem:[%s1473_s2 + $0x70] sm:$0xff]  ;;  %v371_v6 = vsel %vm310_vm0, %v301_v55, 0.0  ;;  %v330_v9 = vsel %vm310_vm0, %v292_v61, 0.0  ;;  %v368_v10 = vsel %vm310_vm0, %v300_v62, 0.0  ;;  %v367_v14 = vadd.f32 %v366_v47, %v365_v46  ;;  %s735_s17 = scalar_lea.sflag [#allocation3], %s257_s16 }
  0x1f   : > { %v338_v4 = vmul.f32 %v888_v36, %v337_v58  ;;  %v372_v7 = vsel %vm310_vm0, %v309_v56, 0.0  ;;  %v369_v11 = vsel %vm310_vm0, %v308_v63, 0.0  ;;  %v322_v15 = vadd.f32 %v321_v53, %v320_v52  ;;  %s919_s18 = sshra.s32 %s750_s15, 4  ;;  %s920_s18 = int_to_ptr.hbm [resolvable:$true] %s919_s18 }
  0x20   : > { %v361_v16 = vadd.f32 %v360_v59, %v359_v54  ;;  %v316_v17 = vadd.f32 %v315_v0, %v314_v60  ;;  %v355_v18 = vadd.f32 %v354_v2, %v353_v1  ;;  %v334_v19 = vadd.f32 %v333_v5, %v332_v3  ;;  %v591_v3 = vld [vmem:[%s1474_s3 + $0x8] sm:$0xff]  ;;  %s921_s19 = scalar_lea.hbm %s920_s18, 128  ;;  %p926_p0 = scmp.lt.s32.totalorder %s920_s18, %s1477_s6 }
  0x21   : > { %v339_v12 = vadd.f32 %v888_v36, %v338_v4  ;;  %v373_v21 = vadd.f32 %v372_v7, %v371_v6  ;;  %v331_v22 = vadd.f32 %v330_v9, %v329_v8  ;;  %v370_v23 = vadd.f32 %v369_v11, %v368_v10  ;;  %p922_p11 = scmp.ne.s32.totalorder %s920_s18, %s921_s19  ;;  %p927_p1 = scmp.lt.s32.totalorder %s925_s29, %s921_s19 }
  0x23   : > { %v341_v20 = vsel %vm340_vm1, %v888_v36, %v339_v12  ;;  %p923_p12 = pnand %p922_p11, %p1046_p5  ;;  %p928_p2 = por %p927_p1, %p926_p0 }
  0x24   : > { %v346_v24 = vmul.f32 %v341_v20, %v325_v29  ;;  %v378_v25 = vmul.f32 %v364_v30, %v341_v20  ;;  %v344_v26 = vmul.f32 %v341_v20, %v319_v37  ;;  %v376_v27 = vmul.f32 %v358_v38, %v341_v20 }
  0x25   : > { %v342_v28 = vmul.f32 %v341_v20, %v313_v45  ;;  %v374_v31 = vmul.f32 %v352_v51, %v341_v20  ;;  %v347_v32 = vmul.f32 %v341_v20, %v328_v13  ;;  %v379_v33 = vmul.f32 %v367_v14, %v341_v20  ;;  %p924_p13 = pneg %p923_p12 }
  0x26   : > { %516 = vperm.xlu2 %886, %v346_v24   ;;  %v386_v34 = vmul.f32 %v346_v24, %v346_v24  ;;  %506 = vperm.xlu1 %885, %v344_v26   ;;  %v384_v35 = vmul.f32 %v344_v26, %v344_v26  ;;  %v345_v39 = vmul.f32 %v341_v20, %v322_v15 }
  0x27   : > { %496 = vperm.xlu0 %884, %v342_v28   ;;  %v382_v40 = vmul.f32 %v342_v28, %v342_v28  ;;  %v387_v41 = vmul.f32 %v347_v32, %v347_v32  ;;  %v377_v36 = vmul.f32 %v361_v16, %v341_v20  ;;  %v343_v42 = vmul.f32 %v341_v20, %v316_v17  ;;  %p929_p3 = pnand %p928_p2, %p924_p13 }
  0x28   : > { %v394_v43 = vsub.f32 %v378_v25, %v386_v34  ;;  %v392_v44 = vsub.f32 %v376_v27, %v384_v35  ;;  %v385_v29 = vmul.f32 %v345_v39, %v345_v39  ;;  %v375_v30 = vmul.f32 %v355_v18, %v341_v20 }
  0x29   : > { %v390_v37 = vsub.f32 %v374_v31, %v382_v40  ;;  %v395_v38 = vsub.f32 %v379_v33, %v387_v41  ;;  %v383_v45 = vmul.f32 %v343_v42, %v343_v42  ;;  %v349_v46 = vmul.f32 %v341_v20, %v334_v19  ;;  %v1387_v41 = vld [vmem:[%s1358_s20 + $0x20] sm:$0xff] }
  0x2a   : > { %v1185_v47 = vadd.f32 1e-05, %v394_v43  ;;  %v1187_v48 = vadd.f32 1e-05, %v392_v44  ;;  %v393_v49 = vsub.f32 %v377_v36, %v385_v29  ;;  %v381_v50 = vmul.f32 %v373_v21, %v341_v20  ;;  %722 = vst [vmem:[%s1365_s28 + $0x20] sm:$0xff] %v1387_v41 }
  0x2b   : > { %v398_v51 = vadd.f32 1e-05, %v390_v37  ;;  %v1189_v52 = vadd.f32 1e-05, %v395_v38  ;;  %v391_v53 = vsub.f32 %v375_v30, %v383_v45  ;;  %v389_v54 = vmul.f32 %v349_v46, %v349_v46 }
  0x2c   : > { %889 = vrsqrt.f32 %v1185_v47  ;;  %v1192_v55 = vadd.f32 1e-05, %v393_v49  ;;  %v348_v56 = vmul.f32 %v341_v20, %v331_v22  ;;  %v380_v57 = vmul.f32 %v370_v23, %v341_v20  ;;  %v590_v23 = vld [vmem:[%s1474_s3] sm:$0xff] }
  0x2d   : > { %891 = vrsqrt.f32 %v1187_v48  ;;  %v399_v58 = vadd.f32 1e-05, %v391_v53  ;;  %v397_v59 = vsub.f32 %v381_v50, %v389_v54  ;;  %vm412_vm2 = vweird.f32 %v398_v51 }
  0x2e   : > { %893 = vrsqrt.f32 %v398_v51  ;;  %521 = vperm.xlu2 %886, %v347_v32   ;;  %511 = vperm.xlu1 %885, %v345_v39   ;;  %v388_v60 = vmul.f32 %v348_v56, %v348_v56  ;;  %vm432_vm7 = vweird.f32 %v1187_v48  ;;  %vm442_vm9 = vweird.f32 %v1192_v55 }
  0x2f   : > { %895 = vrsqrt.f32 %v1189_v52  ;;  %501 = vperm.xlu0 %884, %v343_v42   ;;  %v1196_v61 = vadd.f32 1e-05, %v397_v59  ;;  %vm422_vm4 = vweird.f32 %v399_v58  ;;  %vm452_vm13 = vweird.f32 %v1185_v47 }
  0x30   : > { %897 = vrsqrt.f32 %v1192_v55  ;;  %v396_v62 = vsub.f32 %v380_v57, %v388_v60  ;;  %vm462_vm1 = vweird.f32 %v1189_v52 }
  0x31   : > { %899 = vrsqrt.f32 %v399_v58 }
  0x32   : > { %v1199_v63 = vpop.eup %889  ;;  %v1201_v0 = vadd.f32 1e-05, %v396_v62  ;;  %901 = vrsqrt.f32 %v1196_v61 }
  0x33   : > { %v1203_v1 = vpop.eup %891  ;;  %v447_v2 = vmul.f32 %v1199_v63, %v1185_v47  ;;  %vm453_vm14 = vweird.f32 %v1199_v63 }
  0x34   : > { %v894_v4 = vpop.eup %893  ;;  %v427_v5 = vmul.f32 %v1203_v1, %v1187_v48  ;;  %903 = vrsqrt.f32 %v1201_v0  ;;  %vm433_vm8 = vweird.f32 %v1203_v1  ;;  %vm1274_vm0 = vmor %vm452_vm13, %vm453_vm14 }
  0x35   : > { %v1214_v6 = vpop.eup %895  ;;  %v407_v7 = vmul.f32 %v894_v4, %v398_v51  ;;  %v448_v10 = vmul.f32 %v1199_v63, %v447_v2  ;;  %vm413_vm3 = vweird.f32 %v894_v4  ;;  %vm1254_vm12 = vmor %vm432_vm7, %vm433_vm8  ;;  %v596_v2 = vld [vmem:[%s1474_s3 + $0x30] sm:$0xff] }
  0x36   : > { %v1216_v8 = vpop.eup %897  ;;  %605 = vperm.xlu2 %886, %v591_v3   ;;  %531 = vperm.xlu1 %885, %v349_v46   ;;  %v428_v9 = vmul.f32 %v1203_v1, %v427_v5  ;;  %v457_v14 = vmul.f32 %v1214_v6, %v1189_v52  ;;  %vm1233_vm6 = vmor %vm412_vm2, %vm413_vm3  ;;  %vm463_vm2 = vweird.f32 %v1214_v6  ;;  %vm472_vm3 = vweird.f32 %v1201_v0  ;;  %v597_v3 = vld [vmem:[%s1474_s3 + $0x38] sm:$0xff]  ;;  %v647_v5 = vld [vmem:[%s1475_s4 + $0x8] sm:$0xff] }
  0x37   : > { %v900_v11 = vpop.eup %899  ;;  %526 = vperm.xlu0 %884, %v348_v56   ;;  %v408_v12 = vmul.f32 %v894_v4, %v407_v7  ;;  %v437_v13 = vmul.f32 %v1216_v8, %v1192_v55  ;;  %v449_v22 = vmul.f32 0.5, %v448_v10  ;;  %vm443_vm11 = vweird.f32 %v1216_v8  ;;  %v646_v7 = vld [vmem:[%s1475_s4] sm:$0xff]  ;;  %v649_v10 = vld [vmem:[%s1475_s4 + $0x18] sm:$0xff] }
  0x38   : > { %v417_v15 = vmul.f32 %v900_v11, %v399_v58  ;;  %v429_v16 = vmul.f32 0.5, %v428_v9  ;;  %v1224_v17 = vpop.eup %901  ;;  %v458_v27 = vmul.f32 %v1214_v6, %v457_v14  ;;  %vm423_vm5 = vweird.f32 %v900_v11  ;;  %vm1266_vm15 = vmor %vm442_vm9, %vm443_vm11  ;;  %v651_v9 = vld [vmem:[%s1475_s4 + $0x28] sm:$0xff] }
  0x39   : > { %v409_v18 = vmul.f32 0.5, %v408_v12  ;;  %v438_v19 = vmul.f32 %v1216_v8, %v437_v13  ;;  %v477_v32 = vmul.f32 %v1224_v17, %v1196_v61  ;;  %vm1246_vm10 = vmor %vm422_vm4, %vm423_vm5  ;;  %v450_v30 = vsub.f32 1.5, %v449_v22  ;;  %v652_v12 = vld [vmem:[%s1475_s4 + $0x30] sm:$0xff] }
  0x3a   : > { %v1227_v20 = vpop.eup %903  ;;  %v418_v21 = vmul.f32 %v900_v11, %v417_v15  ;;  %v430_v25 = vsub.f32 1.5, %v429_v16  ;;  %v459_v43 = vmul.f32 0.5, %v458_v27  ;;  %vm464_vm5 = vmor %vm462_vm1, %vm463_vm2  ;;  %vm483_vm7 = vweird.f32 %v1224_v17 }
  0x3b   : > { %v410_v24 = vsub.f32 1.5, %v409_v18  ;;  %v439_v26 = vmul.f32 0.5, %v438_v19  ;;  %v467_v33 = vmul.f32 %v1227_v20, %v1201_v0  ;;  %v478_v37 = vmul.f32 %v1224_v17, %v477_v32  ;;  %v594_v0 = vld [vmem:[%s1474_s3 + $0x20] sm:$0xff] }
  0x3c   : > { %v419_v28 = vmul.f32 0.5, %v418_v21  ;;  %v431_v42 = vmul.f32 %v1203_v1, %v430_v25  ;;  %v460_v50 = vsub.f32 1.5, %v459_v43  ;;  %v451_v51 = vmul.f32 %v1199_v63, %v450_v30  ;;  %v1393_v43 = vld [vmem:[%s1358_s20 + $0x18] sm:$0xff] }
  0x3d   : > { %v411_v34 = vmul.f32 %v894_v4, %v410_v24  ;;  %v440_v35 = vsub.f32 1.5, %v439_v26  ;;  %v468_v40 = vmul.f32 %v1227_v20, %v467_v33  ;;  %v479_v53 = vmul.f32 0.5, %v478_v37  ;;  %v488_v24 = vld [vmem:[%s1358_s20 + $0x10] sm:$0xff]  ;;  %721 = vst [vmem:[%s1365_s28 + $0x18] sm:$0xff] %v1393_v43  ;;  %v1398_v37 = vld [vmem:[%s1358_s20 + $0x38] sm:$0xff] }
  0x3e   : > { %600 = vperm.xlu1 %885, %v590_v23   ;;  %v420_v39 = vsub.f32 1.5, %v419_v28  ;;  %v435_v49 = vsel %vm1254_vm12, %v1203_v1, %v431_v42  ;;  %v461_v56 = vmul.f32 %v1214_v6, %v460_v50  ;;  %vm473_vm4 = vweird.f32 %v1227_v20  ;;  %v592_v1 = vld [vmem:[%s1474_s3 + $0x10] sm:$0xff]  ;;  %720 = vst [vmem:[%s1365_s28 + $0x10] sm:$0xff] %v488_v24  ;;  %v491_v28 = vld [vmem:[%s1358_s20 + $0x28] sm:$0xff] }
  0x3f   : > { %v415_v36 = vsel %vm1233_vm6, %v894_v4, %v411_v34  ;;  %v441_v38 = vmul.f32 %v1216_v8, %v440_v35  ;;  %v469_v45 = vmul.f32 0.5, %v468_v40  ;;  %v455_v57 = vsel %vm1274_vm0, %v1199_v63, %v451_v51  ;;  %vm474_vm8 = vmor %vm472_vm3, %vm473_vm4  ;;  %v595_v4 = vld [vmem:[%s1474_s3 + $0x28] sm:$0xff]  ;;  %723 = vst [vmem:[%s1365_s28 + $0x28] sm:$0xff] %v491_v28  ;;  %v1375_v35 = vld [vmem:[%s1358_s20] sm:$0xff] }
  0x40   : > { %v421_v44 = vmul.f32 %v900_v11, %v420_v39  ;;  %544 = vperm.xlu2 %886, %v415_v36   ;;  %v480_v58 = vsub.f32 1.5, %v479_v53  ;;  %vm482_vm6 = vweird.f32 %v1196_v61  ;;  %v465_v52 = vsel %vm464_vm5, %v1214_v6, %v461_v56  ;;  %v593_v61 = vld [vmem:[%s1474_s3 + $0x18] sm:$0xff]  ;;  %v648_v6 = vld [vmem:[%s1475_s4 + $0x10] sm:$0xff]  ;;  %v487_v34 = vld [vmem:[%s1358_s20 + $0x8] sm:$0xff]  ;;  %718 = vst [vmem:[%s1365_s28] sm:$0xff] %v1375_v35 }
  0x41   : > { %v445_v47 = vsel %vm1266_vm15, %v1216_v8, %v441_v38  ;;  %v470_v55 = vsub.f32 1.5, %v469_v45  ;;  %vm484_vm9 = vmor %vm482_vm6, %vm483_vm7  ;;  %v650_v8 = vld [vmem:[%s1475_s4 + $0x20] sm:$0xff]  ;;  %719 = vst [vmem:[%s1365_s28 + $0x8] sm:$0xff] %v487_v34  ;;  %v272_v42 = vld [vmem:[%s1384_s10 + $0x10] sm:$0xff] }
  0x42   : > { %v425_v46 = vsel %vm1246_vm10, %v900_v11, %v421_v44  ;;  %v481_v60 = vmul.f32 %v1224_v17, %v480_v58  ;;  %v653_v11 = vld [vmem:[%s1475_s4 + $0x38] sm:$0xff]  ;;  %725 = vst [vmem:[%s1365_s28 + $0x38] sm:$0xff] %v1398_v37  ;;  %v1405_v50 = vld [vmem:[%s1358_s20 + $0x30] sm:$0xff]  ;;  %v270_v56 = vld [vmem:[%s1384_s10] sm:$0xff] }
  0x43   : > { %549 = vperm.xlu0 %884, %v425_v46   ;;  %v471_v59 = vmul.f32 %v1227_v20, %v470_v55  ;;  %v271_v46 = vld [vmem:[%s1384_s10 + $0x8] sm:$0xff]  ;;  %724 = vst [vmem:[%s1365_s28 + $0x30] sm:$0xff] %v1405_v50 }
  0x44   : > { %v485_v63 = vsel %vm484_vm9, %v1224_v17, %v481_v60  ;;  %v274_v60 = vld [vmem:[%s1384_s10 + $0x20] sm:$0xff] }
  0x45   : > { %v475_v62 = vsel %vm474_vm8, %v1227_v20, %v471_v59 }
  0x46   : > { %554 = vperm.xlu1 %885, %v435_v49   ;;  %v275_v49 = vld [vmem:[%s1384_s10 + $0x28] sm:$0xff] }
  0x48   : > { %559 = vperm.xlu2 %886, %v445_v47  }
  0x4b   : > { %564 = vperm.xlu0 %884, %v455_v57  }
  0x4e   : > { %569 = vperm.xlu1 %885, %v465_v52  }
  0x50   : > { %574 = vperm.xlu2 %886, %v475_v62  }
  0x53   : > { %579 = vperm.xlu0 %884, %v485_v63  }
  0x56   : > { %615 = vperm.xlu1 %885, %v593_v61  }
  0x58   : > { %620 = vperm.xlu2 %886, %v594_v0  }
  0x5b   : > { %610 = vperm.xlu0 %884, %v592_v1  }
  0x5e   : > { %630 = vperm.xlu1 %885, %v596_v2  }
  0x60   : > { %635 = vperm.xlu2 %886, %v597_v3  }
  0x63   : > { %625 = vperm.xlu0 %884, %v595_v4  }
  0x66   : > { %661 = vperm.xlu1 %885, %v647_v5  }
  0x68   : > { %666 = vperm.xlu2 %886, %v648_v6  }
  0x6b   : > { %656 = vperm.xlu0 %884, %v646_v7   ;;  %v273_v7 = vld [vmem:[%s1384_s10 + $0x18] sm:$0xff] }
  0x6e   : > { %676 = vperm.xlu1 %885, %v650_v8  }
  0x70   : > { %681 = vperm.xlu2 %886, %v651_v9  }
  0x73   : > { %671 = vperm.xlu0 %884, %v649_v10  }
  0x76   : > { %691 = vperm.xlu1 %885, %v653_v11  }
  0x7b   : > { %686 = vperm.xlu0 %884, %v652_v12  }
  0x80   : > { %v1338_v13 = vpop.permute.xlu2 %516 }
  0x81   : > { %v538_v3 = vsub.f32 %v274_v60, %v1338_v13 }
  0x88   : > { %v522_v14 = vpop.permute.xlu2 %521 }
  0x89   : > { %v539_v47 = vsub.f32 %v275_v49, %v522_v14 }
  0x90   : > { %v1340_v15 = vpop.permute.xlu2 %605 }
  0x98   : > { %v507_v16 = vpop.permute.xlu1 %506 }
  0x99   : > { %v1342_v17 = vpop.permute.xlu0 %496  ;;  %v536_v29 = vsub.f32 %v272_v42, %v507_v16  ;;  %v277_v16 = vld [vmem:[%s1384_s10 + $0x38] sm:$0xff] }
  0x9a   : > { %v1344_v18 = vpop.permute.xlu2 %544  ;;  %v534_v62 = vsub.f32 %v270_v56, %v1342_v17 }
  0x9c   : > { %v582_v5 = vmul.f32 %v1344_v18, %v534_v62 }
  0xa0   : > { %v1346_v19 = vpop.permute.xlu1 %511 }
  0xa1   : > { %v502_v20 = vpop.permute.xlu0 %501 }
  0xa2   : > { %v1350_v21 = vpop.permute.xlu2 %559  ;;  %v535_v54 = vsub.f32 %v271_v46, %v502_v20 }
  0xa8   : > { %v1353_v22 = vpop.permute.xlu1 %531 }
  0xa9   : > { %v1362_v23 = vpop.permute.xlu0 %526 }
  0xaa   : > { %v1368_v25 = vpop.permute.xlu2 %574 }
  0xb0   : > { %v601_v26 = vpop.permute.xlu1 %600 }
  0xb1   : > { %v638_v10 = vmul.f32 %v601_v26, %v582_v5 }
  0xb2   : > { %v621_v32 = vpop.permute.xlu2 %620 }
  0xb5   : > { %v550_v27 = vpop.permute.xlu0 %549 }
  0xb6   : > { %v583_v57 = vmul.f32 %v550_v27, %v535_v54 }
  0xb8   : > { %v555_v31 = vpop.permute.xlu1 %554  ;;  %v639_v0 = vmul.f32 %v1340_v15, %v583_v57  ;;  %v537_v15 = vsub.f32 %v273_v7, %v1346_v19 }
  0xb9   : > { %v584_v30 = vmul.f32 %v555_v31, %v536_v29  ;;  %v276_v31 = vld [vmem:[%s1384_s10 + $0x30] sm:$0xff] }
  0xba   : > { %v1379_v40 = vpop.permute.xlu2 %635  ;;  %v585_v26 = vmul.f32 %v1350_v21, %v537_v15  ;;  %v540_v42 = vsub.f32 %v276_v31, %v1362_v23 }
  0xbd   : > { %v565_v33 = vpop.permute.xlu0 %564 }
  0xbe   : > { %v586_v8 = vmul.f32 %v565_v33, %v538_v3 }
  0xc0   : > { %v570_v39 = vpop.permute.xlu1 %569  ;;  %v642_v13 = vmul.f32 %v621_v32, %v586_v8 }
  0xc1   : > { %v587_v58 = vmul.f32 %v570_v39, %v539_v47 }
  0xc2   : > { %v667_v38 = vpop.permute.xlu2 %666 }
  0xc5   : > { %v580_v36 = vpop.permute.xlu0 %579 }
  0xc8   : > { %v616_v44 = vpop.permute.xlu1 %615 }
  0xca   : > { %v682_v61 = vpop.permute.xlu2 %681 }
  0xcd   : > { %v611_v45 = vpop.permute.xlu0 %610 }
  0xce   : > { %v640_v48 = vmul.f32 %v611_v45, %v584_v30 }
  0xd0   : > { %v696_v51 = vadd.f32 %v667_v38, %v640_v48  ;;  %v631_v53 = vpop.permute.xlu1 %630 }
  0xd2   : > { %v704_v55 = vmax.f32 %v696_v51, 0.0 }
  0xd4   : > { %v712_v59 = vadd.f32 %v704_v55, %v488_v24  ;;  %v541_v24 = vsub.f32 %v277_v16, %v1353_v22 }
  0xd5   : > { %v626_v52 = vpop.permute.xlu0 %625 }
  0xd6   : > { %728 = vst [vmem:[%s1365_s28 + $0x50] sm:$0xff] %v712_v59  ;;  %v643_v63 = vmul.f32 %v626_v52, %v587_v58  ;;  %v589_v33 = vmul.f32 %v580_v36, %v541_v24  ;;  %v588_v36 = vmul.f32 %v1368_v25, %v540_v42 }
  0xd8   : > { %v699_v1 = vadd.f32 %v682_v61, %v643_v63  ;;  %v662_v2 = vpop.permute.xlu1 %661  ;;  %v645_v22 = vmul.f32 %v1379_v40, %v589_v33  ;;  %v644_v23 = vmul.f32 %v631_v53, %v588_v36 }
  0xd9   : > { %v695_v4 = vadd.f32 %v662_v2, %v639_v0 }
  0xda   : > { %v707_v6 = vmax.f32 %v699_v1, 0.0 }
  0xdb   : > { %v703_v9 = vmax.f32 %v695_v4, 0.0 }
  0xdc   : > { %v715_v11 = vadd.f32 %v707_v6, %v491_v28 }
  0xdd   : > { %v711_v12 = vadd.f32 %v703_v9, %v487_v34  ;;  %v657_v14 = vpop.permute.xlu0 %656  ;;  %v641_v34 = vmul.f32 %v616_v44, %v585_v26 }
  0xde   : > { %731 = vst [vmem:[%s1365_s28 + $0x68] sm:$0xff] %v715_v11  ;;  %v694_v17 = vadd.f32 %v657_v14, %v638_v10 }
  0xdf   : > { %727 = vst [vmem:[%s1365_s28 + $0x48] sm:$0xff] %v711_v12 }
  0xe0   : > { %v702_v20 = vmax.f32 %v694_v17, 0.0  ;;  %v677_v18 = vpop.permute.xlu1 %676 }
  0xe1   : > { %v698_v27 = vadd.f32 %v677_v18, %v642_v13 }
  0xe2   : > { %v710_v28 = vadd.f32 %v702_v20, %v1375_v35 }
  0xe3   : > { %v706_v19 = vmax.f32 %v698_v27, 0.0 }
  0xe4   : > { %726 = vst [vmem:[%s1365_s28 + $0x40] sm:$0xff] %v710_v28 }
  0xe5   : > { %v714_v39 = vadd.f32 %v706_v19, %v1387_v41  ;;  %v672_v32 = vpop.permute.xlu0 %671 }
  0xe6   : > { %v697_v29 = vadd.f32 %v672_v32, %v641_v34 }
  0xe7   : > { %730 = vst [vmem:[%s1365_s28 + $0x60] sm:$0xff] %v714_v39 }
  0xe8   : > { %v705_v21 = vmax.f32 %v697_v29, 0.0  ;;  %v692_v30 = vpop.permute.xlu1 %691 }
  0xe9   : > { %v701_v35 = vadd.f32 %v692_v30, %v645_v22 }
  0xea   : > { %v713_v44 = vadd.f32 %v705_v21, %v1393_v43 }
  0xeb   : > { %v709_v41 = vmax.f32 %v701_v35, 0.0 }
  0xec   : > { %729 = vst [vmem:[%s1365_s28 + $0x58] sm:$0xff] %v713_v44 }
  0xed   : > { %v717_v40 = vadd.f32 %v709_v41, %v1398_v37  ;;  %v687_v38 = vpop.permute.xlu0 %686 }
  0xee   : > { %v700_v45 = vadd.f32 %v687_v38, %v644_v23 }
  0xef   : > { %733 = vst [vmem:[%s1365_s28 + $0x78] sm:$0xff] %v717_v40 }
  0xf0   : > { %v708_v25 = vmax.f32 %v700_v45, 0.0 }
  0xf2   : > { %v716_v43 = vadd.f32 %v708_v25, %v1405_v50 }
  0xf4   : > { %732 = vst [vmem:[%s1365_s28 + $0x70] sm:$0xff] %v716_v43 }
  0xf5   : > { %932 = shalt.err (!%p929_p3)
}
  0xf6   : > { %s971_s16 = smov 128   ;;  %s972_s28 = smov 8  }
  0xf7   : > { %841 = dma.vmem_to_hbm [thread:$0]  (%p1046_p5), %s748_s25, 2048, %s750_s15, %s735_s17, %s971_s16, %s971_s16, %s972_s28  }
  0xf8 PF: > { %p847_p4 = scmp.ge.s32.totalorder %s967_s24, 2  ;;  %s764_s11 = sand.u32 1, %s955_s21  }
  0xf9   : > { %s765_s12 = scalar_lea.sflag [#allocation3], %s764_s11 }
  0xfa   : > { %p844_p7 = pnand %p847_p4, %p1050_p6 }
  0xfc   : > { %p845_p8 = pneg %p844_p7 }
  0xfe   : > { %950 = dma.done.wait (%p845_p8), %s765_s12, 2048  }
  0xff   : > { %952 = vsyncadd (%p845_p8), %s765_s12, 4294965248  ;;  %p16_p9 = scmp.ge.s32.totalorder %s1033_s27, 4   ;;  %s1490_s21 = smov %s959_s22 }
 0x100   : > { %s1491_s22 = smov %s963_s23  ;;  %s1492_s23 = smov %s1044_s30 }
 0x101   : > { %s1493_s24 = smov %s1033_s27  ;;  %18 = sbr.rel (!%p16_p9) target bundleno = 3 (0x3), region = 82 }
 0x106   :  { %771 = vsyncpa [#allocation3], 1 }
 0x107   :  { %773 = vsyncpa [#allocation3 + $0x1], 1 }

</bundles_post_ra>
